<compile_context>
chip_gen: v7x
topology: tpu7x:2x2x1
jax: 0.10.0
libtpu: 0.0.40
codegen_flags: <defaults>
</compile_context>

<pallas_src>
import functools

import jax
import jax.numpy as jnp
from jax.experimental import pallas as pl
from jax.experimental.pallas import tpu as pltpu


def _residual_block_kernel(xp_ref, x_ref, w1_ref, b1_ref, w2_ref, b2_ref,
                           out_ref, ypad_ref, *, bt, h, w, cp, mxu_dtype):
    """One batch-block per grid step.

    xp_ref : (bt, h+2, w+2, cp)  zero-padded input (conv1 taps)
    x_ref  : (bt, h,   w,   cp)  unpadded input (residual, aligned read)
    w1_ref : (9*cp, cp)          conv1 weights, BN1 scale folded, im2col layout
    b1_ref : (1, cp)             folded BN1 bias (f32)
    w2_ref : (9*cp, cp)          conv2 weights, BN2 scale folded
    b2_ref : (1, cp)             folded BN2 bias (f32)
    out_ref: (bt, h, w, cp)
    ypad_ref: VMEM (bt, h+2, w+2, cp) scratch holding the padded conv2 input.
    """
    m = bt * h * w

    def conv3x3(padded, w_ref, b_ref):
        # im2col: nine shifted HxW windows concatenated along lanes (each
        # piece is 128-lane aligned), then a single MXU matmul with K = 9*cp.
        cols = []
        for dh in range(3):
            for dw in range(3):
                tap = padded[:, dh:dh + h, dw:dw + w, :]
                cols.append(tap.reshape(m, cp))
        patch = jnp.concatenate(cols, axis=-1)                      # (m, 9*cp)
        acc = jnp.dot(patch, w_ref[...],
                      preferred_element_type=jnp.float32)           # (m, cp) f32
        return acc + b_ref[...]                                     # folded BN bias

    # ---- conv1 (BN1 scale pre-folded into w1) -> bias -> ReLU (f32) ----
    xp = xp_ref[...].astype(mxu_dtype)
    y = jnp.maximum(conv3x3(xp, w1_ref, b1_ref), 0.0)               # (m, cp) f32

    # ---- build padded conv2 input in VMEM scratch.
    # Zero only the 1-pixel border (cheap thin stores; safe under megacore
    # "parallel" splitting), then write the activation interior once.
    ypad_ref[:, 0:1, :, :] = jnp.zeros((bt, 1, w + 2, cp), ypad_ref.dtype)
    ypad_ref[:, h + 1:h + 2, :, :] = jnp.zeros((bt, 1, w + 2, cp), ypad_ref.dtype)
    ypad_ref[:, :, 0:1, :] = jnp.zeros((bt, h + 2, 1, cp), ypad_ref.dtype)
    ypad_ref[:, :, w + 1:w + 2, :] = jnp.zeros((bt, h + 2, 1, cp), ypad_ref.dtype)
    ypad_ref[:, 1:h + 1, 1:w + 1, :] = y.reshape(bt, h, w, cp).astype(ypad_ref.dtype)

    # ---- conv2 (BN2 scale pre-folded into w2) -> bias ----
    z = conv3x3(ypad_ref[...].astype(mxu_dtype), w2_ref, b2_ref)    # (m, cp) f32

    # ---- identity residual (aligned unpadded x) + ReLU ----
    res = x_ref[...].reshape(m, cp).astype(jnp.float32)
    out = jnp.maximum(z + res, 0.0)
    out_ref[...] = out.reshape(bt, h, w, cp).astype(out_ref.dtype)


def _round_up(n, mult):
    return (n + mult - 1) // mult * mult


def _fold_bn(w_hwio, bn, eps):
    """Eval-mode BN folded into conv weights: conv(x; w*s) + (beta - mean*s)."""
    gamma, beta, mean, var = bn
    scale = gamma * jax.lax.rsqrt(var.astype(jnp.float32) + eps)
    return w_hwio * scale[None, None, None, :], beta - mean * scale


def residual_block_nhwc(x, w1, w2, bn1, bn2, *, eps=1e-5,
                        compute_dtype=jnp.bfloat16, batch_block=1):
    """x: (B,H,W,C) NHWC; w1,w2: (3,3,C,C) HWIO; bn*: (gamma,beta,mean,var)."""
    B, H, W, C = x.shape
    assert w1.shape == (3, 3, C, C) and w2.shape == (3, 3, C, C)
    assert B % batch_block == 0, "batch must divide batch_block"
    bt = batch_block  # raise to 4-8 for large batches to amortize per-step cost

    # BN scale folded into conv weights (only a bias add remains in-kernel).
    w1f, b1 = _fold_bn(w1, bn1, eps)
    w2f, b2 = _fold_bn(w2, bn2, eps)

    # Lane-dense channel padding (zeros in padded in/out channels keep the
    # math exact; padded output channels stay identically zero).
    cp = _round_up(C, 128)
    pc = cp - C
    x_cpad = jnp.pad(x, ((0, 0), (0, 0), (0, 0), (0, pc)))
    xp = jnp.pad(x_cpad, ((0, 0), (1, 1), (1, 1), (0, 0)))

    # im2col weight layout: row index = (dh*3 + dw)*cp + cin.
    w1m = jnp.pad(w1f, ((0, 0), (0, 0), (0, pc), (0, pc)))
    w2m = jnp.pad(w2f, ((0, 0), (0, 0), (0, pc), (0, pc)))
    w1m = w1m.reshape(9 * cp, cp).astype(compute_dtype)
    w2m = w2m.reshape(9 * cp, cp).astype(compute_dtype)
    b1m = jnp.pad(b1, ((0, pc),)).reshape(1, cp).astype(jnp.float32)
    b2m = jnp.pad(b2, ((0, pc),)).reshape(1, cp).astype(jnp.float32)

    kernel = functools.partial(_residual_block_kernel, bt=bt, h=H, w=W, cp=cp,
                               mxu_dtype=compute_dtype)

    itemsize_x = jnp.dtype(x.dtype).itemsize
    itemsize_w = jnp.dtype(compute_dtype).itemsize
    cost = pl.CostEstimate(
        flops=4 * 9 * B * H * W * cp * cp,          # two 3x3 convs on the MXU
        transcendentals=0,
        bytes_accessed=(xp.size + x_cpad.size + B * H * W * cp) * itemsize_x
        + (w1m.size + w2m.size) * itemsize_w + (b1m.size + b2m.size) * 4)

    out = pl.pallas_call(
        kernel,
        out_shape=jax.ShapeDtypeStruct((B, H, W, cp), x.dtype),
        grid=(B // bt,),
        in_specs=[
            pl.BlockSpec((bt, H + 2, W + 2, cp), lambda b: (b, 0, 0, 0)),
            pl.BlockSpec((bt, H, W, cp), lambda b: (b, 0, 0, 0)),
            pl.BlockSpec((9 * cp, cp), lambda b: (0, 0)),   # weights resident
            pl.BlockSpec((1, cp), lambda b: (0, 0)),
            pl.BlockSpec((9 * cp, cp), lambda b: (0, 0)),
            pl.BlockSpec((1, cp), lambda b: (0, 0)),
        ],
        out_specs=pl.BlockSpec((bt, H, W, cp), lambda b: (b, 0, 0, 0)),
        scratch_shapes=[pltpu.VMEM((bt, H + 2, W + 2, cp), compute_dtype)],
        compiler_params=pltpu.CompilerParams(
            dimension_semantics=("parallel",),
            vmem_limit_bytes=48 * 1024 * 1024),  # headroom below v7x 64 MiB
        cost_estimate=cost,
    )(xp, x_cpad, w1m, b1m, w2m, b2m)

    return out[..., :C]


def residual_block_nchw(x_nchw, w1_oihw, w2_oihw, bn1, bn2, **kwargs):
    """PyTorch-layout entry point: NCHW activations, OIHW conv weights."""
    x = jnp.transpose(x_nchw, (0, 2, 3, 1))
    w1 = jnp.transpose(w1_oihw, (2, 3, 1, 0))
    w2 = jnp.transpose(w2_oihw, (2, 3, 1, 0))
    y = residual_block_nhwc(x, w1, w2, bn1, bn2, **kwargs)
    return jnp.transpose(y, (0, 3, 1, 2))


def residual_block_ref(x_nhwc, w1, w2, bn1, bn2, eps=1e-5):
    """Pure-JAX reference, PyTorch-faithful op order (eval-mode BN)."""
    dn = jax.lax.conv_dimension_numbers(x_nhwc.shape, w1.shape,
                                        ('NHWC', 'HWIO', 'NHWC'))

    def conv(u, w):
        return jax.lax.conv_general_dilated(
            u, w, (1, 1), 'SAME', dimension_numbers=dn,
            precision=jax.lax.Precision.HIGHEST)

    def bn(u, p):
        gamma, beta, mean, var = p
        return (u - mean) * (gamma * jax.lax.rsqrt(var + eps)) + beta

    y = jnp.maximum(bn(conv(x_nhwc, w1), bn1), 0.0)
    z = bn(conv(y, w2), bn2)
    return jnp.maximum(z + x_nhwc, 0.0)


if __name__ == "__main__":
    B, C, H, W = 2, 4, 16, 16  # in_channels == out_channels == 4, stride=1

    keys = jax.random.split(jax.random.PRNGKey(0), 9)
    x_nchw = jax.random.normal(keys[0], (B, C, H, W), jnp.float32)
    # conv3x3 weights, PyTorch OIHW layout
    w1_oihw = 0.1 * jax.random.normal(keys[1], (C, C, 3, 3), jnp.float32)
    w2_oihw = 0.1 * jax.random.normal(keys[2], (C, C, 3, 3), jnp.float32)
    # BatchNorm (eval mode): affine params + running stats
    gamma1 = 1.0 + 0.1 * jax.random.normal(keys[3], (C,), jnp.float32)
    beta1 = 0.1 * jax.random.normal(keys[4], (C,), jnp.float32)
    gamma2 = 1.0 + 0.1 * jax.random.normal(keys[5], (C,), jnp.float32)
    beta2 = 0.1 * jax.random.normal(keys[6], (C,), jnp.float32)
    mean1 = 0.05 * jax.random.normal(keys[7], (C,), jnp.float32)
    var1 = 1.0 + 0.1 * jnp.abs(jax.random.normal(keys[8], (C,), jnp.float32))
    mean2 = jnp.zeros((C,), jnp.float32)
    var2 = jnp.ones((C,), jnp.float32)
    bn1 = (gamma1, beta1, mean1, var1)
    bn2 = (gamma2, beta2, mean2, var2)

    # reference (NHWC / HWIO), mapped back to NCHW
    x_nhwc = jnp.transpose(x_nchw, (0, 2, 3, 1))
    w1_hwio = jnp.transpose(w1_oihw, (2, 3, 1, 0))
    w2_hwio = jnp.transpose(w2_oihw, (2, 3, 1, 0))
    ref_nchw = jnp.transpose(
        residual_block_ref(x_nhwc, w1_hwio, w2_hwio, bn1, bn2), (0, 3, 1, 2))

    # Exactness check: f32 MXU operands.
    out_f32 = jax.block_until_ready(
        residual_block_nchw(x_nchw, w1_oihw, w2_oihw, bn1, bn2,
                            compute_dtype=jnp.float32))
    err_f32 = float(jnp.max(jnp.abs(out_f32 - ref_nchw)))
    assert err_f32 < 1e-3, f"f32 path mismatch vs reference, max_err={err_f32}"

    # Fast path (default): bf16 MXU operands, f32 accumulation.
    # Looser tolerance only reflects bf16 operand rounding (accumulation is f32).
    out_bf16 = jax.block_until_ready(
        residual_block_nchw(x_nchw, w1_oihw, w2_oihw, bn1, bn2))
    err_bf16 = float(jnp.max(jnp.abs(out_bf16 - ref_nchw)))
    assert err_bf16 < 5e-2, f"bf16 path mismatch vs reference, max_err={err_bf16}"

    print("KERNEL_OK")
</pallas_src>

<mosaic_0001>
module attributes {stable_mosaic.version = 11 : i64} {
  func.func @_residual_block_kernel(%arg0: i32, %arg1: memref<1x18x18x128xf32, #tpu.memory_space<vmem>>, %arg2: memref<1x16x16x128xf32, #tpu.memory_space<vmem>>, %arg3: memref<1152x128xf32, #tpu.memory_space<vmem>>, %arg4: memref<1x128xf32, #tpu.memory_space<vmem>>, %arg5: memref<1152x128xf32, #tpu.memory_space<vmem>>, %arg6: memref<1x128xf32, #tpu.memory_space<vmem>>, %arg7: memref<1x16x16x128xf32, #tpu.memory_space<vmem>>, %arg8: memref<1x18x18x128xf32, #tpu.memory_space<vmem>>) attributes {dimension_semantics = [#tpu.dimension_semantics<parallel>], iteration_bounds = array<i64: 2>, scalar_prefetch = 0 : i64, scratch_operands = 1 : i64, tpu.core_type = #tpu.core_type<tc>, window_params = [{transform_indices = @transform_0, window_bounds = array<i64: 1, 18, 18, 128>}, {transform_indices = @transform_1, window_bounds = array<i64: 1, 16, 16, 128>}, {pipeline_mode = #tpu.pipeline_mode<synchronous>, transform_indices = @transform_2, window_bounds = array<i64: 1152, 128>}, {pipeline_mode = #tpu.pipeline_mode<synchronous>, transform_indices = @transform_3, window_bounds = array<i64: 1, 128>}, {pipeline_mode = #tpu.pipeline_mode<synchronous>, transform_indices = @transform_4, window_bounds = array<i64: 1152, 128>}, {pipeline_mode = #tpu.pipeline_mode<synchronous>, transform_indices = @transform_5, window_bounds = array<i64: 1, 128>}, {transform_indices = @transform_6, window_bounds = array<i64: 1, 16, 16, 128>}]} {
    %c0 = arith.constant 0 : index
    %c0_0 = arith.constant 0 : index
    %c0_1 = arith.constant 0 : index
    %c0_2 = arith.constant 0 : index
    %0 = vector.load %arg1[%c0, %c0_0, %c0_1, %c0_2] : memref<1x18x18x128xf32, #tpu.memory_space<vmem>>, vector<1x18x18x128xf32>
    %1 = vector.extract_strided_slice %0 {offsets = [0, 0, 0, 0], sizes = [1, 16, 16, 128], strides = [1, 1, 1, 1]} : vector<1x18x18x128xf32> to vector<1x16x16x128xf32>
    %2 = vector.shape_cast %1 : vector<1x16x16x128xf32> to vector<256x128xf32>
    %3 = vector.extract_strided_slice %0 {offsets = [0, 0, 1, 0], sizes = [1, 16, 16, 128], strides = [1, 1, 1, 1]} : vector<1x18x18x128xf32> to vector<1x16x16x128xf32>
    %4 = vector.shape_cast %3 : vector<1x16x16x128xf32> to vector<256x128xf32>
    %5 = vector.extract_strided_slice %0 {offsets = [0, 0, 2, 0], sizes = [1, 16, 16, 128], strides = [1, 1, 1, 1]} : vector<1x18x18x128xf32> to vector<1x16x16x128xf32>
    %6 = vector.shape_cast %5 : vector<1x16x16x128xf32> to vector<256x128xf32>
    %7 = vector.extract_strided_slice %0 {offsets = [0, 1, 0, 0], sizes = [1, 16, 16, 128], strides = [1, 1, 1, 1]} : vector<1x18x18x128xf32> to vector<1x16x16x128xf32>
    %8 = vector.shape_cast %7 : vector<1x16x16x128xf32> to vector<256x128xf32>
    %9 = vector.extract_strided_slice %0 {offsets = [0, 1, 1, 0], sizes = [1, 16, 16, 128], strides = [1, 1, 1, 1]} : vector<1x18x18x128xf32> to vector<1x16x16x128xf32>
    %10 = vector.shape_cast %9 : vector<1x16x16x128xf32> to vector<256x128xf32>
    %11 = vector.extract_strided_slice %0 {offsets = [0, 1, 2, 0], sizes = [1, 16, 16, 128], strides = [1, 1, 1, 1]} : vector<1x18x18x128xf32> to vector<1x16x16x128xf32>
    %12 = vector.shape_cast %11 : vector<1x16x16x128xf32> to vector<256x128xf32>
    %13 = vector.extract_strided_slice %0 {offsets = [0, 2, 0, 0], sizes = [1, 16, 16, 128], strides = [1, 1, 1, 1]} : vector<1x18x18x128xf32> to vector<1x16x16x128xf32>
    %14 = vector.shape_cast %13 : vector<1x16x16x128xf32> to vector<256x128xf32>
    %15 = vector.extract_strided_slice %0 {offsets = [0, 2, 1, 0], sizes = [1, 16, 16, 128], strides = [1, 1, 1, 1]} : vector<1x18x18x128xf32> to vector<1x16x16x128xf32>
    %16 = vector.shape_cast %15 : vector<1x16x16x128xf32> to vector<256x128xf32>
    %17 = vector.extract_strided_slice %0 {offsets = [0, 2, 2, 0], sizes = [1, 16, 16, 128], strides = [1, 1, 1, 1]} : vector<1x18x18x128xf32> to vector<1x16x16x128xf32>
    %18 = vector.shape_cast %17 : vector<1x16x16x128xf32> to vector<256x128xf32>
    %19 = tpu.concatenate %2, %4, %6, %8, %10, %12, %14, %16, %18 in 1 : vector<256x128xf32>, vector<256x128xf32>, vector<256x128xf32>, vector<256x128xf32>, vector<256x128xf32>, vector<256x128xf32>, vector<256x128xf32>, vector<256x128xf32>, vector<256x128xf32> -> vector<256x1152xf32>
    %c0_3 = arith.constant 0 : index
    %c0_4 = arith.constant 0 : index
    %20 = vector.load %arg3[%c0_3, %c0_4] : memref<1152x128xf32, #tpu.memory_space<vmem>>, vector<1152x128xf32>
    %cst = arith.constant dense<0.000000e+00> : vector<256x128xf32>
    %21 = tpu.matmul %19, %20, %cst {dimension_numbers = #tpu.dot_dimension_numbers<[1], [0], [0], [1], [0, 0, 1, 1], [], []>} : vector<256x1152xf32>, vector<1152x128xf32>, vector<256x128xf32> -> vector<256x128xf32>
    %c0_5 = arith.constant 0 : index
    %c0_6 = arith.constant 0 : index
    %22 = vector.load %arg4[%c0_5, %c0_6] : memref<1x128xf32, #tpu.memory_space<vmem>>, vector<1x128xf32>
    %23 = vector.broadcast %22 : vector<1x128xf32> to vector<256x128xf32>
    %24 = arith.addf %21, %23 : vector<256x128xf32>
    %cst_7 = arith.constant 0.000000e+00 : f32
    %25 = vector.broadcast %cst_7 : f32 to vector<256x128xf32>
    %26 = arith.maximumf %24, %25 : vector<256x128xf32>
    %cst_8 = arith.constant 0.000000e+00 : f32
    %27 = vector.broadcast %cst_8 : f32 to vector<1x1x18x128xf32>
    %c0_9 = arith.constant 0 : index
    %c0_10 = arith.constant 0 : index
    %c0_11 = arith.constant 0 : index
    %c0_12 = arith.constant 0 : index
    %28 = vector.load %arg8[%c0_9, %c0_10, %c0_11, %c0_12] : memref<1x18x18x128xf32, #tpu.memory_space<vmem>>, vector<1x1x18x128xf32>
    tpu.vector_store %arg8[%c0_9, %c0_10, %c0_11, %c0_12], %27 {strides = array<i32>} : memref<1x18x18x128xf32, #tpu.memory_space<vmem>>, vector<1x1x18x128xf32>,
    %cst_13 = arith.constant 0.000000e+00 : f32
    %29 = vector.broadcast %cst_13 : f32 to vector<1x1x18x128xf32>
    %c0_14 = arith.constant 0 : index
    %c17 = arith.constant 17 : index
    %c0_15 = arith.constant 0 : index
    %c0_16 = arith.constant 0 : index
    %30 = vector.load %arg8[%c0_14, %c17, %c0_15, %c0_16] : memref<1x18x18x128xf32, #tpu.memory_space<vmem>>, vector<1x1x18x128xf32>
    tpu.vector_store %arg8[%c0_14, %c17, %c0_15, %c0_16], %29 {strides = array<i32>} : memref<1x18x18x128xf32, #tpu.memory_space<vmem>>, vector<1x1x18x128xf32>,
    %cst_17 = arith.constant 0.000000e+00 : f32
    %31 = vector.broadcast %cst_17 : f32 to vector<1x18x1x128xf32>
    %c0_18 = arith.constant 0 : index
    %c0_19 = arith.constant 0 : index
    %c0_20 = arith.constant 0 : index
    %c0_21 = arith.constant 0 : index
    %32 = vector.load %arg8[%c0_18, %c0_19, %c0_20, %c0_21] : memref<1x18x18x128xf32, #tpu.memory_space<vmem>>, vector<1x18x1x128xf32>
    tpu.vector_store %arg8[%c0_18, %c0_19, %c0_20, %c0_21], %31 {strides = array<i32>} : memref<1x18x18x128xf32, #tpu.memory_space<vmem>>, vector<1x18x1x128xf32>,
    %cst_22 = arith.constant 0.000000e+00 : f32
    %33 = vector.broadcast %cst_22 : f32 to vector<1x18x1x128xf32>
    %c0_23 = arith.constant 0 : index
    %c0_24 = arith.constant 0 : index
    %c17_25 = arith.constant 17 : index
    %c0_26 = arith.constant 0 : index
    %34 = vector.load %arg8[%c0_23, %c0_24, %c17_25, %c0_26] : memref<1x18x18x128xf32, #tpu.memory_space<vmem>>, vector<1x18x1x128xf32>
    tpu.vector_store %arg8[%c0_23, %c0_24, %c17_25, %c0_26], %33 {strides = array<i32>} : memref<1x18x18x128xf32, #tpu.memory_space<vmem>>, vector<1x18x1x128xf32>,
    %35 = vector.shape_cast %26 : vector<256x128xf32> to vector<1x16x16x128xf32>
    %c0_27 = arith.constant 0 : index
    %c1 = arith.constant 1 : index
    %c1_28 = arith.constant 1 : index
    %c0_29 = arith.constant 0 : index
    %36 = vector.load %arg8[%c0_27, %c1, %c1_28, %c0_29] : memref<1x18x18x128xf32, #tpu.memory_space<vmem>>, vector<1x16x16x128xf32>
    tpu.vector_store %arg8[%c0_27, %c1, %c1_28, %c0_29], %35 {strides = array<i32>} : memref<1x18x18x128xf32, #tpu.memory_space<vmem>>, vector<1x16x16x128xf32>,
    %c0_30 = arith.constant 0 : index
    %c0_31 = arith.constant 0 : index
    %c0_32 = arith.constant 0 : index
    %c0_33 = arith.constant 0 : index
    %37 = vector.load %arg8[%c0_30, %c0_31, %c0_32, %c0_33] : memref<1x18x18x128xf32, #tpu.memory_space<vmem>>, vector<1x18x18x128xf32>
    %38 = vector.extract_strided_slice %37 {offsets = [0, 0, 0, 0], sizes = [1, 16, 16, 128], strides = [1, 1, 1, 1]} : vector<1x18x18x128xf32> to vector<1x16x16x128xf32>
    %39 = vector.shape_cast %38 : vector<1x16x16x128xf32> to vector<256x128xf32>
    %40 = vector.extract_strided_slice %37 {offsets = [0, 0, 1, 0], sizes = [1, 16, 16, 128], strides = [1, 1, 1, 1]} : vector<1x18x18x128xf32> to vector<1x16x16x128xf32>
    %41 = vector.shape_cast %40 : vector<1x16x16x128xf32> to vector<256x128xf32>
    %42 = vector.extract_strided_slice %37 {offsets = [0, 0, 2, 0], sizes = [1, 16, 16, 128], strides = [1, 1, 1, 1]} : vector<1x18x18x128xf32> to vector<1x16x16x128xf32>
    %43 = vector.shape_cast %42 : vector<1x16x16x128xf32> to vector<256x128xf32>
    %44 = vector.extract_strided_slice %37 {offsets = [0, 1, 0, 0], sizes = [1, 16, 16, 128], strides = [1, 1, 1, 1]} : vector<1x18x18x128xf32> to vector<1x16x16x128xf32>
    %45 = vector.shape_cast %44 : vector<1x16x16x128xf32> to vector<256x128xf32>
    %46 = vector.extract_strided_slice %37 {offsets = [0, 1, 1, 0], sizes = [1, 16, 16, 128], strides = [1, 1, 1, 1]} : vector<1x18x18x128xf32> to vector<1x16x16x128xf32>
    %47 = vector.shape_cast %46 : vector<1x16x16x128xf32> to vector<256x128xf32>
    %48 = vector.extract_strided_slice %37 {offsets = [0, 1, 2, 0], sizes = [1, 16, 16, 128], strides = [1, 1, 1, 1]} : vector<1x18x18x128xf32> to vector<1x16x16x128xf32>
    %49 = vector.shape_cast %48 : vector<1x16x16x128xf32> to vector<256x128xf32>
    %50 = vector.extract_strided_slice %37 {offsets = [0, 2, 0, 0], sizes = [1, 16, 16, 128], strides = [1, 1, 1, 1]} : vector<1x18x18x128xf32> to vector<1x16x16x128xf32>
    %51 = vector.shape_cast %50 : vector<1x16x16x128xf32> to vector<256x128xf32>
    %52 = vector.extract_strided_slice %37 {offsets = [0, 2, 1, 0], sizes = [1, 16, 16, 128], strides = [1, 1, 1, 1]} : vector<1x18x18x128xf32> to vector<1x16x16x128xf32>
    %53 = vector.shape_cast %52 : vector<1x16x16x128xf32> to vector<256x128xf32>
    %54 = vector.extract_strided_slice %37 {offsets = [0, 2, 2, 0], sizes = [1, 16, 16, 128], strides = [1, 1, 1, 1]} : vector<1x18x18x128xf32> to vector<1x16x16x128xf32>
    %55 = vector.shape_cast %54 : vector<1x16x16x128xf32> to vector<256x128xf32>
    %56 = tpu.concatenate %39, %41, %43, %45, %47, %49, %51, %53, %55 in 1 : vector<256x128xf32>, vector<256x128xf32>, vector<256x128xf32>, vector<256x128xf32>, vector<256x128xf32>, vector<256x128xf32>, vector<256x128xf32>, vector<256x128xf32>, vector<256x128xf32> -> vector<256x1152xf32>
    %c0_34 = arith.constant 0 : index
    %c0_35 = arith.constant 0 : index
    %57 = vector.load %arg5[%c0_34, %c0_35] : memref<1152x128xf32, #tpu.memory_space<vmem>>, vector<1152x128xf32>
    %cst_36 = arith.constant dense<0.000000e+00> : vector<256x128xf32>
    %58 = tpu.matmul %56, %57, %cst_36 {dimension_numbers = #tpu.dot_dimension_numbers<[1], [0], [0], [1], [0, 0, 1, 1], [], []>} : vector<256x1152xf32>, vector<1152x128xf32>, vector<256x128xf32> -> vector<256x128xf32>
    %c0_37 = arith.constant 0 : index
    %c0_38 = arith.constant 0 : index
    %59 = vector.load %arg6[%c0_37, %c0_38] : memref<1x128xf32, #tpu.memory_space<vmem>>, vector<1x128xf32>
    %60 = vector.broadcast %59 : vector<1x128xf32> to vector<256x128xf32>
    %61 = arith.addf %58, %60 : vector<256x128xf32>
    %c0_39 = arith.constant 0 : index
    %c0_40 = arith.constant 0 : index
    %c0_41 = arith.constant 0 : index
    %c0_42 = arith.constant 0 : index
    %62 = vector.load %arg2[%c0_39, %c0_40, %c0_41, %c0_42] : memref<1x16x16x128xf32, #tpu.memory_space<vmem>>, vector<1x16x16x128xf32>
    %63 = vector.shape_cast %62 : vector<1x16x16x128xf32> to vector<256x128xf32>
    %64 = arith.addf %61, %63 : vector<256x128xf32>
    %cst_43 = arith.constant 0.000000e+00 : f32
    %65 = vector.broadcast %cst_43 : f32 to vector<256x128xf32>
    %66 = arith.maximumf %64, %65 : vector<256x128xf32>
    %67 = vector.shape_cast %66 : vector<256x128xf32> to vector<1x16x16x128xf32>
    %c0_44 = arith.constant 0 : index
    %c0_45 = arith.constant 0 : index
    %c0_46 = arith.constant 0 : index
    %c0_47 = arith.constant 0 : index
    %68 = vector.load %arg7[%c0_44, %c0_45, %c0_46, %c0_47] : memref<1x16x16x128xf32, #tpu.memory_space<vmem>>, vector<1x16x16x128xf32>
    tpu.vector_store %arg7[%c0_44, %c0_45, %c0_46, %c0_47], %67 {strides = array<i32>} : memref<1x16x16x128xf32, #tpu.memory_space<vmem>>, vector<1x16x16x128xf32>,
    return
  }
  func.func @transform_0(%arg0: i32) -> (i32, i32, i32, i32) {
    %c0_i32 = arith.constant 0 : i32
    %c0_i32_0 = arith.constant 0 : i32
    %c0_i32_1 = arith.constant 0 : i32
    %c0_i32_2 = arith.constant 0 : i32
    return %arg0, %c0_i32, %c0_i32_0, %c0_i32_1 : i32, i32, i32, i32
  }
  func.func @transform_1(%arg0: i32) -> (i32, i32, i32, i32) {
    %c0_i32 = arith.constant 0 : i32
    %c0_i32_0 = arith.constant 0 : i32
    %c0_i32_1 = arith.constant 0 : i32
    %c0_i32_2 = arith.constant 0 : i32
    return %arg0, %c0_i32, %c0_i32_0, %c0_i32_1 : i32, i32, i32, i32
  }
  func.func @transform_2(%arg0: i32) -> (i32, i32) {
    %c0_i32 = arith.constant 0 : i32
    %c0_i32_0 = arith.constant 0 : i32
    %c0_i32_1 = arith.constant 0 : i32
    return %c0_i32, %c0_i32_0 : i32, i32
  }
  func.func @transform_3(%arg0: i32) -> (i32, i32) {
    %c0_i32 = arith.constant 0 : i32
    %c0_i32_0 = arith.constant 0 : i32
    %c0_i32_1 = arith.constant 0 : i32
    return %c0_i32, %c0_i32_0 : i32, i32
  }
  func.func @transform_4(%arg0: i32) -> (i32, i32) {
    %c0_i32 = arith.constant 0 : i32
    %c0_i32_0 = arith.constant 0 : i32
    %c0_i32_1 = arith.constant 0 : i32
    return %c0_i32, %c0_i32_0 : i32, i32
  }
  func.func @transform_5(%arg0: i32) -> (i32, i32) {
    %c0_i32 = arith.constant 0 : i32
    %c0_i32_0 = arith.constant 0 : i32
    %c0_i32_1 = arith.constant 0 : i32
    return %c0_i32, %c0_i32_0 : i32, i32
  }
  func.func @transform_6(%arg0: i32) -> (i32, i32, i32, i32) {
    %c0_i32 = arith.constant 0 : i32
    %c0_i32_0 = arith.constant 0 : i32
    %c0_i32_1 = arith.constant 0 : i32
    %c0_i32_2 = arith.constant 0 : i32
    return %arg0, %c0_i32, %c0_i32_0, %c0_i32_1 : i32, i32, i32, i32
  }
}

</mosaic_0001>

<bundles_post_ra>
// kernel: tpu_custom_call.1
= control target key start
LH: loop header
LB: loop body
LE: loop exit
PB: predicated region body
PF: predicated region fallthrough
CT: control target
= control target key end

     0   :  { %11 = vsyncpa [#allocation4], 0  ;;  %s7941_s0 = inlined_call_operand.vmem [shape: f32[2,18,18,128], index: 0, kind: input, shape index: {}]   ;;  %s7942_s1 = inlined_call_operand.hbm [shape: f32[2,16,16,128], index: 1, kind: input, shape index: {}]   ;;  %s7943_s2 = inlined_call_operand.vmem [shape: f32[1152,128], index: 2, kind: input, shape index: {}]   ;;  %s7944_s3 = inlined_call_operand.vmem [shape: f32[1,128], index: 3, kind: input, shape index: {}]   ;;  %s7945_s4 = inlined_call_operand.hbm [shape: f32[1152,128], index: 4, kind: input, shape index: {}]   ;;  %s7946_s5 = inlined_call_operand.vmem [shape: f32[1,128], index: 5, kind: input, shape index: {}]   ;;  %s7947_s6 = inlined_call_operand.hbm [shape: f32[2,16,16,128], index: 6, kind: output, shape index: {}]  }
   0x1   :  { %13 = vsyncpa [#allocation4 + $0x1], 0 }
   0x2   :  { %14 = vsyncpa [#allocation7], 0 }
   0x3   :  { %15 = vsyncpa [#allocation5], 0 }
   0x4   :  { %17 = vsyncpa [#allocation5 + $0x1], 0  ;;  %s5402_s21 = smov 0   ;;  %s5404_s22 = smov 0  }
   0x5   :  { %s5406_s23 = smov 0   ;;  %s5408_s24 = smov 0  }
   0x6 LB: > { %s5423_s25 = sadd.s32 4294967295, %s5356_s24   ;;  %s3924_s26 = sadd.s32 4294967294, %s5356_s24   ;;  %s5356_s24 = sphi %s5408_s24, %s8282_s24   ;;  %s5352_s23 = sphi %s5406_s23, %s8281_s23   ;;  %s5348_s22 = sphi %s5404_s22, %s8280_s22   ;;  %s5344_s21 = sphi %s5402_s21, %s8279_s21  }
   0x7   : > { %p69_p0 = scmp.ne.s32.totalorder %s5348_s22, %s5344_s21  ;;  %p7948_p1 = scmp.eq.s32.totalorder %s5423_s25, 0 }
   0x8   : > { %p183_p3 = scmp.eq.s32.totalorder %s3924_s26, 1  ;;  %p3925_p5 = scmp.ge.s32.totalorder %s5356_s24, 1 }
   0x9   : > { %p5432_p4 = por %p7948_p1, %p69_p0  ;;  %p190_p7 = scmp.lt.s32.totalorder %s5356_s24, 3 }
   0xa   : > { %p5437_p6 = por %p183_p3, %p69_p0  ;;  %s5358_s30 = smov [#allocation6]  }
   0xb   : > { %s8092_s27 = scalar_select %p5432_p4, 1, 0 }
   0xc   : > { %s8093_s28 = scalar_select %p5437_p6, 1, 0 }
   0xd   : > { %p5442_p8 = pnand %p3925_p5, %p190_p7  ;;  %s208_s7 = sshll.u32 %s5358_s30, 4  ;;  %s5446_s7 = int_to_ptr.vmem [resolvable:$true] %s208_s7 }
   0xe   : > { %s5458_s9 = sadd.s32 1, %s5356_s24   ;;  %s56_s10 = sadd.s32 1, %s5352_s23 }
   0xf   : > { %s8094_s29 = scalar_select %p5442_p8, 1, 0 }
  0x10   : > { %p5122_p9 = pneg %p5442_p8  ;;  %s53_s11 = ssub.s32 %s5356_s24, %s5458_s9 }
  0x11   : > { %s5228_s14 = scalar_lea.hbm %s7945_s4, 18432 }
  0x12   : > { %p5453_p11 = pnand %p5122_p9, %p7948_p1  ;;  %p5229_p12 = scmp.ne.s32.totalorder %s7945_s4, %s5228_s14 }
  0x13   : > { %p5235_p5 = scmp.lt.u32.totalorder %s5228_s14, %s7945_s4 }
  0x14   : > { %p5230_p13 = pneg %p5453_p11 }
  0x16   : > { %p5231_p0 = pnand %p5230_p13, %p5229_p12 }
  0x18   : > { %p5232_p3 = pneg %p5231_p0 }
  0x1a   : > { %p5237_p7 = pnand %p5235_p5, %p5232_p3 }
  0x1c   : > { %5240 = shalt.err (!%p5237_p7)
}
  0x1d   : > { %s5241_s19 = scalar_lea.vmem %s5446_s7, 18432  ;;  %p5249_p2 = scmp.lt.s32.totalorder %s5446_s7, %s5446_s7 }
  0x1e   : > { %p5242_p9 = scmp.ne.s32.totalorder %s5446_s7, %s5241_s19  ;;  %p5250_p6 = scmp.lt.s32.totalorder %s5241_s19, %s5241_s19 }
  0x20   : > { %p5244_p10 = pnand %p5242_p9, %p5230_p13  ;;  %p5251_p4 = por %p5250_p6, %p5249_p2 }
  0x22   : > { %p5245_p1 = pneg %p5244_p10 }
  0x24   : > { %p5252_p8 = pnand %p5251_p4, %p5245_p1 }
  0x26   : > { %5255 = shalt.err (!%p5252_p8)
}
  0x27   : > { %s5359_s20 = smov 128   ;;  %s5360_s26 = smov 8  }
  0x28   : > { %5125 = dma.hbm_to_vmem [thread:$0]  (!%p5453_p11), %s7945_s4, 18432, %s5446_s7, [#allocation7], %s5359_s20, %s5359_s20, %s5360_s26  }
  0x29   : > { %p54_p1 = scmp.eq.s32.totalorder %s53_s11, 0  ;;  %p63_p2 = scmp.ne.s32.totalorder %s5352_s23, %s5348_s22 }
  0x2a   : > { %p64_p4 = scmp.eq.s32.totalorder %s5356_s24, 0  ;;  %p5135_p6 = scmp.lt.s32.totalorder %s5356_s24, 2 }
  0x2b   : > { %s5492_s13 = scalar_select %p54_p1, %s5352_s23, %s56_s10  }
  0x2c   : > { %p65_p8 = por %p64_p4, %p63_p2  ;;  %p8096_p10 = scmp.eq.s32.totalorder %s5423_s25, 1 }
  0x2d   : > { %s233_s8 = sand.u32 1, %s5352_s23   ;;  %s3943_s15 = sshll.u32 %s5356_s24, 12 }
  0x2e   : > { %p5496_p12 = por %p8096_p10, %p63_p2  ;;  %s3928_s16 = sshll.u32 %s233_s8, 8 }
  0x2f   : > { %s5505_s19 = scalar_lea.hbm %s7942_s1, %s3943_s15  ;;  %s237_s7 = scalar_lea.vmem [#allocation3], %s3928_s16 }
  0x30   : > { %s244_s10 = sshll.u32 %s237_s7, 4  ;;  %p5507_p11 = pnand %p5135_p6, %p65_p8  ;;  %s5511_s10 = int_to_ptr.vmem [resolvable:$true] %s244_s10 }
  0x31   : > { %s5513_s30 = scalar_lea.sflag [#allocation4], %s233_s8  ;;  %s5256_s12 = scalar_lea.hbm %s5505_s19, 4096 }
  0x32   : > { %p5257_p13 = scmp.ne.s32.totalorder %s5505_s19, %s5256_s12  ;;  %p5258_p0 = pneg %p5507_p11 }
  0x33   : > { %s5261_s17 = scalar_lea.hbm %s7942_s1, 8192  ;;  %p5262_p7 = scmp.lt.u32.totalorder %s5505_s19, %s7942_s1 }
  0x34   : > { %p5259_p3 = pnand %p5258_p0, %p5257_p13  ;;  %p5263_p9 = scmp.lt.u32.totalorder %s5261_s17, %s5256_s12 }
  0x35   : > { %p5265_p2 = scmp.lt.u32.totalorder %s5256_s12, %s5505_s19 }
  0x36   : > { %p5260_p5 = pneg %p5259_p3  ;;  %p5264_p1 = por %p5263_p9, %p5262_p7 }
  0x38   : > { %p5266_p4 = por %p5265_p2, %p5264_p1 }
  0x3a   : > { %p5267_p6 = pnand %p5266_p4, %p5260_p5 }
  0x3c   : > { %5270 = shalt.err (!%p5267_p6)
}
  0x3d   : > { %s5271_s8 = scalar_lea.vmem %s5511_s10, 4096  ;;  %s5361_s15 = smov [#allocation3]  }
  0x3e   : > { %p5272_p8 = scmp.ne.s32.totalorder %s5511_s10, %s5271_s8  ;;  %s5276_s16 = sshll.u32 %s5361_s15, 4  ;;  %s5277_s16 = int_to_ptr.vmem [resolvable:$false] %s5276_s16 }
  0x3f   : > { %s5278_s18 = scalar_lea.vmem %s5277_s16, 8192  ;;  %p5279_p3 = scmp.lt.s32.totalorder %s5511_s10, %s5277_s16 }
  0x40   : > { %p5274_p10 = pnand %p5272_p8, %p5258_p0  ;;  %p5280_p7 = scmp.lt.s32.totalorder %s5278_s18, %s5271_s8 }
  0x42   : > { %p5275_p13 = pneg %p5274_p10  ;;  %p5281_p9 = por %p5280_p7, %p5279_p3 }
  0x44   : > { %p5282_p1 = pnand %p5281_p9, %p5275_p13 }
  0x46   : > { %5285 = shalt.err (!%p5282_p1)
}
  0x47   : > { %5129 = dma.hbm_to_vmem [thread:$0]  (!%p5507_p11), %s5505_s19, 4096, %s5511_s10, %s5513_s30, %s5359_s20, %s5359_s20, %s5360_s26  }
  0x48   : > { %p8099_p0 = scmp.ne.s32.totalorder %s8094_s29, 0 }
  0x4a   : > { %256 = sbr.rel (%p8099_p0) target bundleno = 1522 (0x5f2), region = 44 }
  0x51   : > { %s5547_s12 = sand.u32 1, %s5348_s22   ;;  %p8100_p5 = scmp.ne.s32.totalorder %s8092_s27, 0 }
  0x52   : > { %s3932_s17 = sshll.u32 %s5547_s12, 8  ;;  %s259_s7 = scalar_lea.sflag [#allocation4], %s5547_s12 }
  0x53   : > { %s5553_s11 = scalar_lea.vmem [#allocation3], %s3932_s17 }
  0x54   : > { %5331 = dma.done.wait (%p8100_p5), %s259_s7, 4096  }
  0x55   : > { %5333 = vsyncadd (%p8100_p5), %s259_s7, 4294963200  ;;  %p8101_p11 = scmp.eq.s32.totalorder %s5423_s25, 0 }
  0x57   : > { %5335 = dma.done.wait (%p8101_p11), [#allocation7], 18432   ;;  %p8102_p2 = pmov %p8101_p11 }
  0x58   : > { %v7952_v0 = vmov 0.0|0.0   ;;  %p300_p4 = scmp.lt.s32.totalorder %s5423_s25, 1  ;;  %v667_v1 = vld [vmem:[%s7943_s2] sm:$0xff]  ;;  %v668_v2 = vld [vmem:[%s7943_s2 + $0x8] sm:$0xff]  ;;  %v669_v3 = vld [vmem:[%s7943_s2 + $0x10] sm:$0xff]  ;;  %vm407_vm0 = vcmask 1046528  }
  0x59   : > { %5337 = vsyncadd (%p8102_p2), [#allocation7], 4294948864  ;;  %4201 = vmatprep.subr.bf16.mxu0 %v7952_v0  ;;  %v4202_v4 = vpack.c.bf16 %v668_v2, %v667_v1  ;;  %v670_v5 = vld [vmem:[%s7943_s2 + $0x18] sm:$0xff]  ;;  %v671_v7 = vld [vmem:[%s7943_s2 + $0x20] sm:$0xff]  ;;  %vm520_vm1 = vcmask 1045504   ;;  %s5364_s19 = smov [#allocation8]  }
  0x5a   : > { %s301_s29 = scalar_select %p300_p4, %s5423_s25, 1  ;;  %v4205_v6 = vpack.c.bf16 %v670_v5, %v669_v3  ;;  %v672_v8 = vld [vmem:[%s7943_s2 + $0x28] sm:$0xff]  ;;  %v673_v10 = vld [vmem:[%s7943_s2 + $0x30] sm:$0xff]  ;;  %v674_v11 = vld [vmem:[%s7943_s2 + $0x38] sm:$0xff] }
  0x5b   : > { %4203 = vmatpush1.bf16.msra.mxu0 %v4202_v4  ;;  %v4208_v9 = vpack.c.bf16 %v672_v8, %v671_v7  ;;  %v4211_v13 = vpack.c.bf16 %v674_v11, %v673_v10  ;;  %v675_v16 = vld [vmem:[%s7943_s2 + $0x40] sm:$0xff]  ;;  %v676_v17 = vld [vmem:[%s7943_s2 + $0x48] sm:$0xff]  ;;  %v677_v21 = vld [vmem:[%s7943_s2 + $0x50] sm:$0xff]  ;;  %s5290_s27 = sshll.u32 %s5364_s19, 4  ;;  %s5291_s27 = int_to_ptr.vmem [resolvable:$false] %s5290_s27 }
  0x5c   : > { %s5113_s16 = smul.u32 432, %s301_s29  ;;  %4204 = vmatprep.subr.bf16.mxu0 %v7952_v0  ;;  %v4214_v20 = vpack.c.bf16 %v676_v17, %v675_v16  ;;  %v678_v22 = vld [vmem:[%s7943_s2 + $0x58] sm:$0xff]  ;;  %v679_v24 = vld [vmem:[%s7943_s2 + $0x60] sm:$0xff]  ;;  %v680_v25 = vld [vmem:[%s7943_s2 + $0x68] sm:$0xff]  ;;  %s5292_s29 = scalar_lea.vmem %s5291_s27, 8192 }
  0x5d   : > { %v4217_v23 = vpack.c.bf16 %v678_v22, %v677_v21  ;;  %v4220_v26 = vpack.c.bf16 %v680_v25, %v679_v24  ;;  %v681_v27 = vld [vmem:[%s7943_s2 + $0x70] sm:$0xff]  ;;  %v682_v28 = vld [vmem:[%s7943_s2 + $0x78] sm:$0xff]  ;;  %v683_v30 = vld [vmem:[%s7943_s2 + $0x80] sm:$0xff] }
  0x5e   : > { %s5588_s10 = scalar_lea.vmem %s7941_s0, %s5113_s16  ;;  %v4223_v29 = vpack.c.bf16 %v682_v28, %v681_v27  ;;  %v684_v31 = vld [vmem:[%s7943_s2 + $0x88] sm:$0xff]  ;;  %v685_v33 = vld [vmem:[%s7943_s2 + $0x90] sm:$0xff]  ;;  %v686_v34 = vld [vmem:[%s7943_s2 + $0x98] sm:$0xff]  ;;  %s7774_s16 = scalar_lea.vmem [#allocation8], %s3932_s17 }
  0x5f   : > { %4206 = vmatpush1.bf16.msra.mxu0 %v4205_v6  ;;  %v5598_v12 = vld [vmem:[%s5588_s10] sm:$0xff]  ;;  %v5601_v14 = vld [vmem:[%s5588_s10 + $0x8] sm:$0xff]  ;;  %v4226_v32 = vpack.c.bf16 %v684_v31, %v683_v30  ;;  %v4229_v35 = vpack.c.bf16 %v686_v34, %v685_v33  ;;  %v689_v39 = vld [vmem:[%s7943_s2 + $0xb0] sm:$0xff]  ;;  %s3944_s17 = sshll.u32 %s5423_s25, 12  ;;  %s3829_s18 = sshll.u32 %s7774_s16, 4  ;;  %s7895_s18 = int_to_ptr.vmem [resolvable:$true] %s3829_s18 }
  0x60   : > { %4207 = vmatprep.subr.bf16.mxu0 %v7952_v0  ;;  %v408_v15 = vrot.slane %v5598_v12, 1  ;;  %v409_v18 = vrot.slane %v5601_v14, 1  ;;  %v687_v36 = vld [vmem:[%s7943_s2 + $0xa0] sm:$0xff]  ;;  %v688_v37 = vld [vmem:[%s7943_s2 + $0xa8] sm:$0xff]  ;;  %v690_v40 = vld [vmem:[%s7943_s2 + $0xb8] sm:$0xff]  ;;  %v521_v55 = vrot.slane %v5598_v12, 2  ;;  %s7893_s26 = scalar_lea.hbm %s7947_s6, %s3944_s17  ;;  %p5293_p13 = scmp.lt.s32.totalorder %s7895_s18, %s5291_s27 }
  0x61   : > { %v4232_v38 = vpack.c.bf16 %v688_v37, %v687_v36  ;;  %v4235_v41 = vpack.c.bf16 %v690_v40, %v689_v39  ;;  %v691_v42 = vld [vmem:[%s7943_s2 + $0xc0] sm:$0xff]  ;;  %v692_v43 = vld [vmem:[%s7943_s2 + $0xc8] sm:$0xff]  ;;  %v693_v45 = vld [vmem:[%s7943_s2 + $0xd0] sm:$0xff]  ;;  %v522_v56 = vrot.slane %v5601_v14, 2  ;;  %s3816_s25 = scalar_lea.sflag [#allocation5], %s5547_s12 }
  0x62   : > { %v410_v19 = vsel %vm407_vm0, %v408_v15, %v409_v18  ;;  %v4238_v44 = vpack.c.bf16 %v692_v43, %v691_v42  ;;  %v694_v46 = vld [vmem:[%s7943_s2 + $0xd8] sm:$0xff]  ;;  %v695_v48 = vld [vmem:[%s7943_s2 + $0xe0] sm:$0xff]  ;;  %v696_v49 = vld [vmem:[%s7943_s2 + $0xe8] sm:$0xff] }
  0x63   : > { %4209 = vmatpush1.bf16.msra.mxu0 %v4208_v9  ;;  %882 = vmatprep.mubr.f32.mxu0 %v410_v19  ;;  %v4241_v47 = vpack.c.bf16 %v694_v46, %v693_v45  ;;  %v4244_v50 = vpack.c.bf16 %v696_v49, %v695_v48  ;;  %v697_v51 = vld [vmem:[%s7943_s2 + $0xf0] sm:$0xff]  ;;  %v698_v52 = vld [vmem:[%s7943_s2 + $0xf8] sm:$0xff]  ;;  %v699_v57 = vld [vmem:[%s7943_s2 + $0x100] sm:$0xff]  ;;  %v5721_v5 = vsel %vm520_vm1, %v521_v55, %v522_v56 }
  0x64   : > { %4210 = vmatprep.subr.bf16.mxu0 %v7952_v0  ;;  %v307_v53 = vld [vmem:[%s5588_s10 + $0x10] sm:$0x3]  ;;  %v4247_v54 = vpack.c.bf16 %v698_v52, %v697_v51  ;;  %v700_v58 = vld [vmem:[%s7943_s2 + $0x108] sm:$0xff]  ;;  %v5703_v60 = vld [vmem:[%s5588_s10 + $0x18] sm:$0xff] }
  0x65   : > { %v411_v59 = vrot.slane %v307_v53, 1  ;;  %v5706_v61 = vld [vmem:[%s5588_s10 + $0x20] sm:$0xff]  ;;  %v4250_v62 = vpack.c.bf16 %v700_v58, %v699_v57  ;;  %v413_v1 = vrot.slane %v5703_v60, 1  ;;  %v701_v3 = vld [vmem:[%s7943_s2 + $0x110] sm:$0xff]  ;;  %v702_v4 = vld [vmem:[%s7943_s2 + $0x118] sm:$0xff]  ;;  %v524_v8 = vrot.slane %v307_v53, 2 }
  0x66   : > { %v414_v2 = vrot.slane %v5706_v61, 1  ;;  %v5724_v6 = vld [vmem:[%s5588_s10 + $0x28] sm:$0x3]  ;;  %v4253_v7 = vpack.c.bf16 %v702_v4, %v701_v3  ;;  %v703_v11 = vld [vmem:[%s7943_s2 + $0x120] sm:$0xff]  ;;  %v5742_v15 = vld [vmem:[%s5588_s10 + $0x38] sm:$0xff] }
  0x67   : > { %4212 = vmatpush1.bf16.msra.mxu0 %v4211_v13  ;;  %v412_v63 = vsel %vm407_vm0, %v409_v18, %v411_v59  ;;  %v416_v10 = vrot.slane %v5724_v6, 1  ;;  %v5739_v13 = vld [vmem:[%s5588_s10 + $0x30] sm:$0xff]  ;;  %v5745_v16 = vsel %vm520_vm1, %v522_v56, %v524_v8  ;;  %v5762_v22 = vld [vmem:[%s5588_s10 + $0x40] sm:$0x3]  ;;  %v708_v27 = vld [vmem:[%s7943_s2 + $0x148] sm:$0xff] }
  0x68   : > { %4213 = vmatprep.subr.bf16.mxu0 %v7952_v0  ;;  %v5728_v9 = vsel %vm407_vm0, %v413_v1, %v414_v2  ;;  %v418_v19 = vrot.slane %v5739_v13, 1  ;;  %v705_v21 = vld [vmem:[%s7943_s2 + $0x130] sm:$0xff]  ;;  %v421_v25 = vrot.slane %v5762_v22, 1  ;;  %v5778_v28 = vld [vmem:[%s5588_s10 + $0x48] sm:$0xff]  ;;  %v531_v31 = vrot.slane %v5739_v13, 2  ;;  %v710_v37 = vld [vmem:[%s7943_s2 + $0x158] sm:$0xff] }
  0x69   : > { %v5750_v18 = vsel %vm407_vm0, %v414_v2, %v416_v10  ;;  %v423_v34 = vrot.slane %v5778_v28, 1  ;;  %v709_v36 = vld [vmem:[%s7943_s2 + $0x150] sm:$0xff]  ;;  %v711_v43 = vld [vmem:[%s7943_s2 + $0x160] sm:$0xff]  ;;  %v5825_v46 = vld [vmem:[%s5588_s10 + $0x68] sm:$0xff] }
  0x6a   : > { %v4265_v40 = vpack.c.bf16 %v710_v37, %v709_v36  ;;  %v5822_v45 = vld [vmem:[%s5588_s10 + $0x60] sm:$0xff]  ;;  %v713_v51 = vld [vmem:[%s7943_s2 + $0x170] sm:$0xff]  ;;  %v714_v52 = vld [vmem:[%s7943_s2 + $0x178] sm:$0xff] }
  0x6b   : > { %4215 = vmatpush1.bf16.msra.mxu0 %v4214_v20  ;;  %v419_v20 = vrot.slane %v5742_v15, 1  ;;  %v428_v49 = vrot.slane %v5822_v45, 1  ;;  %v5842_v53 = vld [vmem:[%s5588_s10 + $0x70] sm:$0x3]  ;;  %v715_v57 = vld [vmem:[%s7943_s2 + $0x180] sm:$0xff]  ;;  %v716_v58 = vld [vmem:[%s7943_s2 + $0x188] sm:$0xff] }
  0x6c   : > { %4216 = vmatprep.subr.bf16.mxu0 %v7952_v0  ;;  %v431_v56 = vrot.slane %v5842_v53, 1  ;;  %v5858_v59 = vld [vmem:[%s5588_s10 + $0x78] sm:$0xff]  ;;  %v717_v4 = vld [vmem:[%s7943_s2 + $0x190] sm:$0xff]  ;;  %v5878_v8 = vld [vmem:[%s5588_s10 + $0x88] sm:$0x3] }
  0x6d   : > { %v5767_v24 = vsel %vm407_vm0, %v418_v19, %v419_v20  ;;  %v5788_v33 = vsel %vm407_vm0, %v419_v20, %v421_v25  ;;  %v433_v2 = vrot.slane %v5858_v59, 1  ;;  %v720_v19 = vld [vmem:[%s7943_s2 + $0x1a8] sm:$0xff]  ;;  %v5894_v20 = vld [vmem:[%s5588_s10 + $0x90] sm:$0xff]  ;;  %v723_v37 = vld [vmem:[%s7943_s2 + $0x1c0] sm:$0xff] }
  0x6e   : > { %v438_v25 = vrot.slane %v5894_v20, 1 }
  0x6f   : > { %4218 = vmatpush1.bf16.msra.mxu0 %v4217_v23 }
  0x70   : > { %4219 = vmatprep.subr.bf16.mxu0 %v7952_v0 }
  0x73   : > { %4221 = vmatpush1.bf16.msra.mxu0 %v4220_v26  ;;  %v707_v26 = vld [vmem:[%s7943_s2 + $0x140] sm:$0xff] }
  0x74   : > { %4222 = vmatprep.subr.bf16.mxu0 %v7952_v0  ;;  %v4262_v30 = vpack.c.bf16 %v708_v27, %v707_v26  ;;  %v721_v27 = vld [vmem:[%s7943_s2 + $0x1b0] sm:$0xff] }
  0x77   : > { %4224 = vmatpush1.bf16.msra.mxu0 %v4223_v29  ;;  %v5781_v29 = vld [vmem:[%s5588_s10 + $0x50] sm:$0xff] }
  0x78   : > { %4225 = vmatprep.subr.bf16.mxu0 %v7952_v0 }
  0x7b   : > { %4227 = vmatpush1.bf16.msra.mxu0 %v4226_v32  ;;  %v7951_v32 = vrot.slane %v5742_v15, 2 }
  0x7c   : > { %4228 = vmatprep.subr.bf16.mxu0 %v7952_v0 }
  0x7d   : > { %v5805_v39 = vsel %vm520_vm1, %v531_v31, %v7951_v32  ;;  %v5914_v31 = vld [vmem:[%s5588_s10 + $0xa0] sm:$0x3] }
  0x7e   : > { %4073 = vmatprep.mubr.f32.mxu1 %v5805_v39  ;;  %v441_v36 = vrot.slane %v5914_v31, 1  ;;  %v6063_v32 = vld [vmem:[%s5588_s10 + $0x120] sm:$0xff] }
  0x7f   : > { %4230 = vmatpush1.bf16.msra.mxu0 %v4229_v35  ;;  %v424_v35 = vrot.slane %v5781_v29, 1 }
  0x80   : > { %4231 = vmatprep.subr.bf16.mxu0 %v7952_v0 }
  0x83   : > { %4233 = vmatpush1.bf16.msra.mxu0 %v4232_v38  ;;  %v5800_v38 = vld [vmem:[%s5588_s10 + $0x58] sm:$0x3] }
  0x84   : > { %4234 = vmatprep.subr.bf16.mxu0 %v7952_v0  ;;  %v426_v42 = vrot.slane %v5800_v38, 1 }
  0x86   : > { %v5830_v48 = vsel %vm407_vm0, %v424_v35, %v426_v42  ;;  %v5930_v42 = vld [vmem:[%s5588_s10 + $0xa8] sm:$0xff] }
  0x87   : > { %4236 = vmatpush1.bf16.msra.mxu0 %v4235_v41  ;;  %v5811_v41 = vsel %vm407_vm0, %v423_v34, %v424_v35 }
  0x88   : > { %4237 = vmatprep.subr.bf16.mxu0 %v7952_v0 }
  0x8b   : > { %4239 = vmatpush1.bf16.msra.mxu0 %v4238_v44  ;;  %v712_v44 = vld [vmem:[%s7943_s2 + $0x168] sm:$0xff] }
  0x8c   : > { %4240 = vmatprep.subr.bf16.mxu0 %v7952_v0 }
  0x8f   : > { %4242 = vmatpush1.bf16.msra.mxu0 %v4241_v47  ;;  %v4268_v47 = vpack.c.bf16 %v712_v44, %v711_v43  ;;  %v5933_v43 = vld [vmem:[%s5588_s10 + $0xb0] sm:$0xff] }
  0x90   : > { %4243 = vmatprep.subr.bf16.mxu0 %v7952_v0 }
  0x93   : > { %4245 = vmatpush1.bf16.msra.mxu0 %v4244_v50  ;;  %v429_v50 = vrot.slane %v5825_v46, 1 }
  0x94   : > { %4246 = vmatprep.subr.bf16.mxu0 %v7952_v0 }
  0x95   : > { %v5847_v55 = vsel %vm407_vm0, %v428_v49, %v429_v50  ;;  %v5866_v1 = vsel %vm407_vm0, %v429_v50, %v431_v56  ;;  %v443_v49 = vrot.slane %v5930_v42, 1  ;;  %v444_v50 = vrot.slane %v5933_v43, 1 }
  0x96   : > { %8103 = vst [vmem:[#allocation12_spill] sm:$0xff] %v5866_v1 }
  0x97   : > { %4248 = vmatpush1.bf16.msra.mxu0 %v4247_v54  ;;  %v4271_v54 = vpack.c.bf16 %v714_v52, %v713_v51  ;;  %v725_v51 = vld [vmem:[%s7943_s2 + $0x1d0] sm:$0xff]  ;;  %v726_v52 = vld [vmem:[%s7943_s2 + $0x1d8] sm:$0xff] }
  0x98   : > { %4249 = vmatprep.subr.bf16.mxu0 %v7952_v0  ;;  %v4289_v56 = vpack.c.bf16 %v726_v52, %v725_v51  ;;  %v6019_v52 = vld [vmem:[%s5588_s10 + $0xf0] sm:$0xff] }
  0x9a   : > { %883 = vmatmul.mubr.f32.vlgmr.msra.gmra.mrb[0].mxu0 %v5598_v12  ;;  %v704_v12 = vld [vmem:[%s7943_s2 + $0x128] sm:$0xff] }
  0x9b   : > { %4251 = vmatpush1.bf16.msra.mxu0 %v4250_v62  ;;  %887 = vmatprep.mubr.f32.mxu0 %v412_v63  ;;  %v4256_v17 = vpack.c.bf16 %v704_v12, %v703_v11  ;;  %v5861_v62 = vld [vmem:[%s5588_s10 + $0x80] sm:$0xff]  ;;  %v4274_v63 = vpack.c.bf16 %v716_v58, %v715_v57  ;;  %v436_v12 = vrot.slane %v5878_v8, 1  ;;  %v5955_v57 = vsel %vm407_vm0, %v443_v49, %v444_v50  ;;  %v6010_v49 = vld [vmem:[%s5588_s10 + $0xe8] sm:$0x3] }
  0x9c   : > { %4252 = vmatprep.subr.bf16.mxu0 %v7952_v0  ;;  %v434_v3 = vrot.slane %v5861_v62, 1  ;;  %8108 = vst [vmem:[#allocation17_spill] sm:$0xff] %v5955_v57  ;;  %v456_v51 = vrot.slane %v6010_v49, 1 }
  0x9e   : > { %888 = vmatmul.mubr.f32.gmra.mrb[2].mxu0 %v5601_v14  ;;  %v706_v14 = vld [vmem:[%s7943_s2 + $0x138] sm:$0xff]  ;;  %v5883_v11 = vsel %vm407_vm0, %v433_v2, %v434_v3  ;;  %v728_v2 = vld [vmem:[%s7943_s2 + $0x1e8] sm:$0xff] }
  0x9f   : > { %892 = vmatprep.mubr.f32.mxu0 %v5728_v9  ;;  %4254 = vmatpush1.bf16.msra.mxu0 %v4253_v7  ;;  %v4259_v23 = vpack.c.bf16 %v706_v14, %v705_v21  ;;  %v718_v7 = vld [vmem:[%s7943_s2 + $0x198] sm:$0xff]  ;;  %8104 = vst [vmem:[#allocation13_spill] sm:$0xff] %v5883_v11 }
  0xa0   : > { %4255 = vmatprep.subr.bf16.mxu0 %v7952_v0  ;;  %v4277_v10 = vpack.c.bf16 %v718_v7, %v717_v4  ;;  %v5897_v21 = vld [vmem:[%s5588_s10 + $0x98] sm:$0xff]  ;;  %v5969_v4 = vld [vmem:[%s5588_s10 + $0xc8] sm:$0xff] }
  0xa1   : > { %v439_v26 = vrot.slane %v5897_v21, 1 }
  0xa2   : > { %893 = vmatmul.mubr.f32.gmra.mrb[4].mxu0 %v5703_v60 }
  0xa3   : > { %897 = vmatprep.mubr.f32.mxu0 %v5750_v18  ;;  %4257 = vmatpush1.bf16.msra.mxu0 %v4256_v17  ;;  %v719_v17 = vld [vmem:[%s7943_s2 + $0x1a0] sm:$0xff]  ;;  %v5919_v35 = vsel %vm407_vm0, %v438_v25, %v439_v26  ;;  %v5986_v25 = vld [vmem:[%s5588_s10 + $0xd0] sm:$0x3] }
  0xa4   : > { %4258 = vmatprep.subr.bf16.mxu0 %v7952_v0  ;;  %v4280_v14 = vpack.c.bf16 %v720_v19, %v719_v17  ;;  %8106 = vst [vmem:[#allocation15_spill] sm:$0xff] %v5919_v35  ;;  %v449_v17 = vrot.slane %v5969_v4, 1  ;;  %v729_v19 = vld [vmem:[%s7943_s2 + $0x1f0] sm:$0xff] }
  0xa6   : > { %898 = vmatmul.mubr.f32.gmra.mrb[6].mxu0 %v5706_v61 }
  0xa7   : > { %902 = vmatprep.mubr.f32.mxu0 %v5767_v24  ;;  %4260 = vmatpush1.bf16.msra.mxu0 %v4259_v23  ;;  %v5902_v23 = vsel %vm407_vm0, %v434_v3, %v436_v12  ;;  %v5966_v3 = vld [vmem:[%s5588_s10 + $0xc0] sm:$0xff] }
  0xa8   : > { %4261 = vmatprep.subr.bf16.mxu0 %v7952_v0  ;;  %8105 = vst [vmem:[#allocation14_spill] sm:$0xff] %v5902_v23  ;;  %v448_v12 = vrot.slane %v5966_v3, 1 }
  0xaa   : > { %903 = vmatmul.mubr.f32.gmra.mrb[8].mxu0 %v5739_v13 }
  0xab   : > { %907 = vmatprep.mubr.f32.mxu0 %v5788_v33  ;;  %4263 = vmatpush1.bf16.msra.mxu0 %v4262_v30  ;;  %v722_v30 = vld [vmem:[%s7943_s2 + $0x1b8] sm:$0xff] }
  0xac   : > { %4264 = vmatprep.subr.bf16.mxu0 %v7952_v0  ;;  %v4283_v34 = vpack.c.bf16 %v722_v30, %v721_v27  ;;  %v5991_v27 = vsel %vm407_vm0, %v448_v12, %v449_v17  ;;  %v451_v30 = vrot.slane %v5986_v25, 1 }
  0xad   : > { %8110 = vst [vmem:[#allocation19_spill] sm:$0xff] %v5991_v27 }
  0xae   : > { %908 = vmatmul.mubr.f32.gmra.mrb[10].mxu0 %v5742_v15 }
  0xaf   : > { %912 = vmatprep.mubr.f32.mxu0 %v5811_v41  ;;  %4266 = vmatpush1.bf16.msra.mxu0 %v4265_v40  ;;  %v724_v40 = vld [vmem:[%s7943_s2 + $0x1c8] sm:$0xff] }
  0xb0   : > { %4267 = vmatprep.subr.bf16.mxu0 %v7952_v0  ;;  %v4286_v44 = vpack.c.bf16 %v724_v40, %v723_v37  ;;  %v6004_v37 = vsel %vm407_vm0, %v449_v17, %v451_v30 }
  0xb1   : > { %8111 = vst [vmem:[#allocation20_spill] sm:$0xff] %v6004_v37 }
  0xb2   : > { %913 = vmatmul.mubr.f32.gmra.mrb[12].mxu0 %v5778_v28 }
  0xb3   : > { %917 = vmatprep.mubr.f32.mxu0 %v5830_v48  ;;  %4269 = vmatpush1.bf16.msra.mxu0 %v4268_v47  ;;  %v5938_v47 = vsel %vm407_vm0, %v439_v26, %v441_v36  ;;  %v5999_v36 = vld [vmem:[%s5588_s10 + $0xe0] sm:$0xff] }
  0xb4   : > { %4270 = vmatprep.subr.bf16.mxu0 %v7952_v0  ;;  %8107 = vst [vmem:[#allocation16_spill] sm:$0xff] %v5938_v47 }
  0xb6   : > { %918 = vmatmul.mubr.f32.gmra.mrb[14].mxu0 %v5781_v29 }
  0xb7   : > { %922 = vmatprep.mubr.f32.mxu0 %v5847_v55  ;;  %4272 = vmatpush1.bf16.msra.mxu0 %v4271_v54  ;;  %v5950_v54 = vld [vmem:[%s5588_s10 + $0xb8] sm:$0x3] }
  0xb8   : > { %4273 = vmatprep.subr.bf16.mxu0 %v7952_v0  ;;  %v446_v58 = vrot.slane %v5950_v54, 1 }
  0xba   : > { %923 = vmatmul.mubr.f32.gmra.mrb[16].mxu0 %v5822_v45 }
  0xbb   : > { %927 = vmatprep.mubr.f32.mxu0 %v5866_v1  ;;  %4275 = vmatpush1.bf16.msra.mxu0 %v4274_v63  ;;  %v727_v63 = vld [vmem:[%s7943_s2 + $0x1e0] sm:$0xff]  ;;  %v8126_v1 = vmov 0.0|0.0  }
  0xbc   : > { %4276 = vmatprep.subr.bf16.mxu0 %v7952_v0  ;;  %v4292_v7 = vpack.c.bf16 %v728_v2, %v727_v63  ;;  %v458_v63 = vrot.slane %v6019_v52, 1 }
  0xbe   : > { %928 = vmatmul.mubr.f32.gmra.mrb[18].mxu0 %v5825_v46 }
  0xbf   : > { %932 = vmatprep.mubr.f32.mxu0 %v5883_v11  ;;  %4278 = vmatpush1.bf16.msra.mxu0 %v4277_v10  ;;  %v5974_v10 = vsel %vm407_vm0, %v444_v50, %v446_v58 }
  0xc0   : > { %4279 = vmatprep.subr.bf16.mxu0 %v7952_v0  ;;  %8109 = vst [vmem:[#allocation18_spill] sm:$0xff] %v5974_v10 }
  0xc2   : > { %933 = vmatmul.mubr.f32.gmra.mrb[20].mxu0 %v5858_v59 }
  0xc3   : > { %937 = vmatprep.mubr.f32.mxu0 %v5902_v23  ;;  %4281 = vmatpush1.bf16.msra.mxu0 %v4280_v14  ;;  %v730_v14 = vld [vmem:[%s7943_s2 + $0x1f8] sm:$0xff] }
  0xc4   : > { %4282 = vmatprep.subr.bf16.mxu0 %v7952_v0  ;;  %v4295_v26 = vpack.c.bf16 %v730_v14, %v729_v19  ;;  %v6041_v19 = vld [vmem:[%s5588_s10 + $0x108] sm:$0xff]  ;;  %v6044_v14 = vld [vmem:[%s5588_s10 + $0x110] sm:$0xff]  ;;  %v6142_v23 = vld [vmem:[%s5588_s10 + $0x178] sm:$0x3] }
  0xc5   : > { %v463_v30 = vrot.slane %v6041_v19, 1  ;;  %v486_v11 = vrot.slane %v6142_v23, 1 }
  0xc6   : > { %938 = vmatmul.mubr.f32.gmra.mrb[22].mxu0 %v5861_v62 }
  0xc7   : > { %942 = vmatprep.mubr.f32.mxu0 %v5919_v35  ;;  %4284 = vmatpush1.bf16.msra.mxu0 %v4283_v34  ;;  %v5996_v34 = vld [vmem:[%s5588_s10 + $0xd8] sm:$0xff]  ;;  %v6132_v35 = vld [vmem:[%s5588_s10 + $0x170] sm:$0xff] }
  0xc8   : > { %4285 = vmatprep.subr.bf16.mxu0 %v7952_v0  ;;  %v453_v40 = vrot.slane %v5996_v34, 1 }
  0xca   : > { %943 = vmatmul.mubr.f32.gmra.mrb[24].mxu0 %v5894_v20 }
  0xcb   : > { %947 = vmatprep.mubr.f32.mxu0 %v5938_v47  ;;  %4287 = vmatpush1.bf16.msra.mxu0 %v4286_v44  ;;  %v454_v44 = vrot.slane %v5999_v36, 1 }
  0xcc   : > { %4288 = vmatprep.subr.bf16.mxu0 %v7952_v0 }
  0xcd   : > { %v6015_v50 = vsel %vm407_vm0, %v453_v40, %v454_v44  ;;  %v6027_v58 = vsel %vm407_vm0, %v454_v44, %v456_v51  ;;  %v464_v40 = vrot.slane %v6044_v14, 1  ;;  %v6054_v44 = vld [vmem:[%s5588_s10 + $0x118] sm:$0x3] }
  0xce   : > { %948 = vmatmul.mubr.f32.gmra.mrb[26].mxu0 %v5897_v21  ;;  %8112 = vst [vmem:[#allocation21_spill] sm:$0xff] %v6015_v50  ;;  %8113 = vst [vmem:[#allocation22_spill] sm:$0xff] %v6027_v58 }
  0xcf   : > { %952 = vmatprep.mubr.f32.mxu0 %v5955_v57  ;;  %4290 = vmatpush1.bf16.msra.mxu0 %v4289_v56  ;;  %v6022_v56 = vld [vmem:[%s5588_s10 + $0xf8] sm:$0xff]  ;;  %v6059_v51 = vsel %vm407_vm0, %v463_v30, %v464_v40  ;;  %v6076_v30 = vld [vmem:[%s5588_s10 + $0x130] sm:$0x3] }
  0xd0   : > { %4291 = vmatprep.subr.bf16.mxu0 %v7952_v0  ;;  %v459_v2 = vrot.slane %v6022_v56, 1  ;;  %8116 = vst [vmem:[#allocation25_spill] sm:$0xff] %v6059_v51 }
  0xd2   : > { %953 = vmatmul.mubr.f32.gmra.mrb[28].mxu0 %v5930_v42  ;;  %v6037_v12 = vsel %vm407_vm0, %v458_v63, %v459_v2  ;;  %v466_v63 = vrot.slane %v6054_v44, 1 }
  0xd3   : > { %957 = vmatprep.mubr.f32.mxu0 %v5974_v10  ;;  %4293 = vmatpush1.bf16.msra.mxu0 %v4292_v7  ;;  %v6032_v7 = vld [vmem:[%s5588_s10 + $0x100] sm:$0x3]  ;;  %8114 = vst [vmem:[#allocation23_spill] sm:$0xff] %v6037_v12 }
  0xd4   : > { %4294 = vmatprep.subr.bf16.mxu0 %v7952_v0  ;;  %v461_v17 = vrot.slane %v6032_v7, 1 }
  0xd6   : > { %958 = vmatmul.mubr.f32.gmra.mrb[30].mxu0 %v5933_v43 }
  0xd7   : > { %962 = vmatprep.mubr.f32.mxu0 %v5991_v27  ;;  %4296 = vmatpush1.bf16.msra.mxu0 %v4295_v26  ;;  %v6049_v26 = vsel %vm407_vm0, %v459_v2, %v461_v17  ;;  %v6066_v2 = vld [vmem:[%s5588_s10 + $0x128] sm:$0xff]  ;;  %v6071_v17 = vsel %vm407_vm0, %v464_v40, %v466_v63  ;;  %v6088_v40 = vld [vmem:[%s5588_s10 + $0x140] sm:$0xff]  ;;  %v6107_v27 = vld [vmem:[%s5588_s10 + $0x150] sm:$0xff] }
  0xd8   : > { %4297 = vmatprep.subr.bf16.mxu0 %v7952_v0  ;;  %8115 = vst [vmem:[#allocation24_spill] sm:$0xff] %v6049_v26  ;;  %8117 = vst [vmem:[#allocation26_spill] sm:$0xff] %v6071_v17  ;;  %v468_v0 = vrot.slane %v6063_v32, 1 }
  0xda   : > { %963 = vmatmul.mubr.f32.gmra.mrb[32].mxu0 %v5966_v3 }
  0xdb   : > { %967 = vmatprep.mubr.f32.mxu0 %v6004_v37 }
  0xde   : > { %968 = vmatmul.mubr.f32.gmra.mrb[34].mxu0 %v5969_v4 }
  0xdf   : > { %972 = vmatprep.mubr.f32.mxu0 %v6015_v50  ;;  %v474_v50 = vrot.slane %v6088_v40, 1 }
  0xe2   : > { %973 = vmatmul.mubr.f32.gmra.mrb[36].mxu0 %v5996_v34 }
  0xe3   : > { %977 = vmatprep.mubr.f32.mxu0 %v6027_v58  ;;  %v6085_v58 = vld [vmem:[%s5588_s10 + $0x138] sm:$0xff] }
  0xe6   : > { %978 = vmatmul.mubr.f32.gmra.mrb[38].mxu0 %v5999_v36 }
  0xe7   : > { %982 = vmatprep.mubr.f32.mxu0 %v6037_v12 }
  0xea   : > { %983 = vmatmul.mubr.f32.gmra.mrb[40].mxu0 %v6019_v52 }
  0xeb   : > { %987 = vmatprep.mubr.f32.mxu0 %v6049_v26  ;;  %v469_v26 = vrot.slane %v6066_v2, 1 }
  0xed   : > { %v6081_v12 = vsel %vm407_vm0, %v468_v0, %v469_v26  ;;  %v6098_v0 = vld [vmem:[%s5588_s10 + $0x148] sm:$0x3] }
  0xee   : > { %988 = vmatmul.mubr.f32.gmra.mrb[42].mxu0 %v6022_v56  ;;  %8118 = vst [vmem:[#allocation27_spill] sm:$0xff] %v6081_v12 }
  0xef   : > { %992 = vmatprep.mubr.f32.mxu0 %v6059_v51  ;;  %v471_v51 = vrot.slane %v6076_v30, 1 }
  0xf1   : > { %v6093_v63 = vsel %vm407_vm0, %v469_v26, %v471_v51  ;;  %v6110_v26 = vld [vmem:[%s5588_s10 + $0x158] sm:$0xff] }
  0xf2   : > { %993 = vmatmul.mubr.f32.gmra.mrb[44].mxu0 %v6041_v19  ;;  %8119 = vst [vmem:[#allocation28_spill] sm:$0xff] %v6093_v63  ;;  %v479_v10 = vrot.slane %v6110_v26, 1 }
  0xf3   : > { %997 = vmatprep.mubr.f32.mxu0 %v6071_v17  ;;  %v473_v17 = vrot.slane %v6085_v58, 1 }
  0xf5   : > { %v6103_v37 = vsel %vm407_vm0, %v473_v17, %v474_v50  ;;  %v6120_v17 = vld [vmem:[%s5588_s10 + $0x160] sm:$0x3] }
  0xf6   : > { %998 = vmatmul.mubr.f32.gmra.mrb[46].mxu0 %v6044_v14  ;;  %8120 = vst [vmem:[#allocation29_spill] sm:$0xff] %v6103_v37  ;;  %v481_v47 = vrot.slane %v6120_v17, 1 }
  0xf7   : > { %1002 = vmatprep.mubr.f32.mxu0 %v6081_v12  ;;  %v476_v12 = vrot.slane %v6098_v0, 1 }
  0xf9   : > { %v6115_v51 = vsel %vm407_vm0, %v474_v50, %v476_v12  ;;  %v6137_v50 = vsel %vm407_vm0, %v479_v10, %v481_v47 }
  0xfa   : > { %1003 = vmatmul.mubr.f32.gmra.mrb[48].mxu0 %v6063_v32  ;;  %8121 = vst [vmem:[#allocation30_spill] sm:$0xff] %v6115_v51  ;;  %8123 = vst [vmem:[#allocation32_spill] sm:$0xff] %v6137_v50 }
  0xfb   : > { %1007 = vmatprep.mubr.f32.mxu0 %v6093_v63  ;;  %v478_v63 = vrot.slane %v6107_v27, 1 }
  0xfd   : > { %v6125_v57 = vsel %vm407_vm0, %v478_v63, %v479_v10  ;;  %v731_v10 = vld [vmem:[%s7943_s2 + $0x200] sm:$0xff] }
  0xfe   : > { %1008 = vmatmul.mubr.f32.gmra.mrb[50].mxu0 %v6066_v2  ;;  %8122 = vst [vmem:[#allocation31_spill] sm:$0xff] %v6125_v57 }
  0xff   : > { %1012 = vmatprep.mubr.f32.mxu0 %v6103_v37  ;;  %v6129_v37 = vld [vmem:[%s5588_s10 + $0x168] sm:$0xff] }
 0x100   : > { %v483_v12 = vrot.slane %v6129_v37, 1 }
 0x102   : > { %1013 = vmatmul.mubr.f32.gmra.mrb[52].mxu0 %v6085_v58 }
 0x103   : > { %1017 = vmatprep.mubr.f32.mxu0 %v6115_v51  ;;  %v484_v51 = vrot.slane %v6132_v35, 1 }
 0x105   : > { %v6147_v63 = vsel %vm407_vm0, %v483_v12, %v484_v51  ;;  %v6153_v47 = vsel %vm407_vm0, %v484_v51, %v486_v11  ;;  %v732_v12 = vld [vmem:[%s7943_s2 + $0x208] sm:$0xff]  ;;  %v733_v11 = vld [vmem:[%s7943_s2 + $0x210] sm:$0xff]  ;;  %v734_v51 = vld [vmem:[%s7943_s2 + $0x218] sm:$0xff] }
 0x106   : > { %1018 = vmatmul.mubr.f32.gmra.mrb[54].mxu0 %v6088_v40  ;;  %8124 = vst [vmem:[#allocation33_spill] sm:$0xff] %v6147_v63  ;;  %8125 = vst [vmem:[#allocation34_spill] sm:$0xff] %v6153_v47 }
 0x107   : > { %1022 = vmatprep.mubr.f32.mxu0 %v6125_v57  ;;  %v4301_v57 = vpack.c.bf16 %v734_v51, %v733_v11  ;;  %v738_v11 = vld [vmem:[%s7943_s2 + $0x238] sm:$0xff]  ;;  %v741_v51 = vld [vmem:[%s7943_s2 + $0x250] sm:$0xff] }
 0x10a   : > { %1023 = vmatmul.mubr.f32.gmra.mrb[56].mxu0 %v6107_v27 }
 0x10b   : > { %1027 = vmatprep.mubr.f32.mxu0 %v6137_v50  ;;  %v527_v50 = vrot.slane %v5706_v61, 2 }
 0x10e   : > { %1028 = vmatmul.mubr.f32.gmra.mrb[58].mxu0 %v6110_v26 }
 0x10f   : > { %1032 = vmatprep.mubr.f32.mxu0 %v6147_v63  ;;  %v4298_v63 = vpack.c.bf16 %v732_v12, %v731_v10  ;;  %v735_v10 = vld [vmem:[%s7943_s2 + $0x220] sm:$0xff]  ;;  %v736_v12 = vld [vmem:[%s7943_s2 + $0x228] sm:$0xff] }
 0x112   : > { %1033 = vmatmul.mubr.f32.gmra.mrb[60].mxu0 %v6129_v37 }
 0x113   : > { %1037 = vmatprep.mubr.f32.mxu0 %v6153_v47  ;;  %v526_v47 = vrot.slane %v5703_v60, 2 }
 0x116   : > { %1038 = vmatmul.mubr.f32.gmra.mrb[62].mxu0 %v6132_v35 }
 0x117   : > { %1107 = vmatprep.mubr.f32.mxu0 %v5703_v60  ;;  %v529_v60 = vrot.slane %v5724_v6, 2 }
 0x11a   : > { %1108 = vmatmul.mubr.f32.vlgmr.msra.gmra.mrb[0].mxu0 %v5721_v5  ;;  %v6185_v5 = vsel %vm520_vm1, %v526_v47, %v527_v50  ;;  %v534_v47 = vrot.slane %v5762_v22, 2 }
 0x11b   : > { %4299 = vmatpush1.bf16.msra.mxu0 %v4298_v63  ;;  %1112 = vmatprep.mubr.f32.mxu0 %v5706_v61  ;;  %v4304_v61 = vpack.c.bf16 %v736_v12, %v735_v10  ;;  %v737_v63 = vld [vmem:[%s7943_s2 + $0x230] sm:$0xff]  ;;  %v742_v10 = vld [vmem:[%s7943_s2 + $0x258] sm:$0xff]  ;;  %v8127_v12 = vrot.slane %v5742_v15, 2 }
 0x11c   : > { %4300 = vmatprep.subr.bf16.mxu0 %v8126_v1  ;;  %v4307_v6 = vpack.c.bf16 %v738_v11, %v737_v63  ;;  %v4313_v63 = vpack.c.bf16 %v742_v10, %v741_v51  ;;  %v743_v11 = vld [vmem:[%s7943_s2 + $0x260] sm:$0xff] }
 0x11d   : > { %v6222_v22 = vsel %vm520_vm1, %v8127_v12, %v534_v47  ;;  %v747_v10 = vld [vmem:[%s7943_s2 + $0x280] sm:$0xff]  ;;  %v748_v12 = vld [vmem:[%s7943_s2 + $0x288] sm:$0xff] }
 0x11e   : > { %1113 = vmatmul.mubr.f32.gmra.mrb[2].mxu0 %v5745_v16  ;;  %v739_v16 = vld [vmem:[%s7943_s2 + $0x240] sm:$0xff] }
 0x11f   : > { %1117 = vmatprep.mubr.f32.mxu0 %v5739_v13  ;;  %4302 = vmatpush1.bf16.msra.mxu0 %v4301_v57  ;;  %v6198_v13 = vsel %vm520_vm1, %v527_v50, %v529_v60  ;;  %v740_v57 = vld [vmem:[%s7943_s2 + $0x248] sm:$0xff]  ;;  %v536_v60 = vrot.slane %v5778_v28, 2 }
 0x120   : > { %4303 = vmatprep.subr.bf16.mxu0 %v8126_v1  ;;  %v4310_v50 = vpack.c.bf16 %v740_v57, %v739_v16  ;;  %v745_v16 = vld [vmem:[%s7943_s2 + $0x270] sm:$0xff]  ;;  %v746_v57 = vld [vmem:[%s7943_s2 + $0x278] sm:$0xff] }
 0x121   : > { %v4319_v51 = vpack.c.bf16 %v746_v57, %v745_v16  ;;  %v752_v16 = vld [vmem:[%s7943_s2 + $0x2a8] sm:$0xff] }
 0x122   : > { %1118 = vmatmul.mubr.f32.gmra.mrb[4].mxu0 %v6185_v5 }
 0x123   : > { %1122 = vmatprep.mubr.f32.mxu0 %v5742_v15  ;;  %4305 = vmatpush1.bf16.msra.mxu0 %v4304_v61  ;;  %v537_v61 = vrot.slane %v5781_v29, 2 }
 0x124   : > { %4306 = vmatprep.subr.bf16.mxu0 %v8126_v1 }
 0x125   : > { %v6236_v15 = vsel %vm520_vm1, %v536_v60, %v537_v61  ;;  %v4322_v60 = vpack.c.bf16 %v748_v12, %v747_v10  ;;  %v552_v10 = vrot.slane %v5897_v21, 2 }
 0x126   : > { %1123 = vmatmul.mubr.f32.gmra.mrb[6].mxu0 %v6198_v13 }
 0x127   : > { %1127 = vmatprep.mubr.f32.mxu0 %v5778_v28  ;;  %4308 = vmatpush1.bf16.msra.mxu0 %v4307_v6  ;;  %v744_v6 = vld [vmem:[%s7943_s2 + $0x268] sm:$0xff]  ;;  %v539_v28 = vrot.slane %v5800_v38, 2  ;;  %v541_v38 = vrot.slane %v5822_v45, 2 }
 0x128   : > { %4309 = vmatprep.subr.bf16.mxu0 %v8126_v1 }
 0x129   : > { %v6249_v47 = vsel %vm520_vm1, %v537_v61, %v539_v28  ;;  %v749_v61 = vld [vmem:[%s7943_s2 + $0x290] sm:$0xff] }
 0x12a   : > { %1128 = vmatmul.mubr.f32.gmra.mrb[8].mxu0 %v5805_v39 }
 0x12b   : > { %1132 = vmatprep.mubr.f32.mxu0 %v5781_v29  ;;  %4311 = vmatpush1.bf16.msra.mxu0 %v4310_v50  ;;  %v4316_v29 = vpack.c.bf16 %v744_v6, %v743_v11  ;;  %v542_v50 = vrot.slane %v5825_v46, 2  ;;  %v547_v6 = vrot.slane %v5861_v62, 2 }
 0x12c   : > { %4312 = vmatprep.subr.bf16.mxu0 %v8126_v1 }
 0x12e   : > { %1133 = vmatmul.mubr.f32.gmra.mrb[10].mxu0 %v6222_v22 }
 0x12f   : > { %1137 = vmatprep.mubr.f32.mxu0 %v5822_v45  ;;  %4314 = vmatpush1.bf16.msra.mxu0 %v4313_v63  ;;  %v6263_v45 = vsel %vm520_vm1, %v541_v38, %v542_v50  ;;  %v750_v63 = vld [vmem:[%s7943_s2 + $0x298] sm:$0xff]  ;;  %v753_v38 = vld [vmem:[%s7943_s2 + $0x2b0] sm:$0xff] }
 0x130   : > { %4315 = vmatprep.subr.bf16.mxu0 %v8126_v1  ;;  %v4325_v28 = vpack.c.bf16 %v750_v63, %v749_v61  ;;  %v757_v63 = vld [vmem:[%s7943_s2 + $0x2d0] sm:$0xff] }
 0x132   : > { %1138 = vmatmul.mubr.f32.gmra.mrb[12].mxu0 %v6236_v15 }
 0x133   : > { %1142 = vmatprep.mubr.f32.mxu0 %v5825_v46  ;;  %4317 = vmatpush1.bf16.msra.mxu0 %v4316_v29  ;;  %v544_v46 = vrot.slane %v5842_v53, 2  ;;  %v546_v53 = vrot.slane %v5858_v59, 2  ;;  %v751_v29 = vld [vmem:[%s7943_s2 + $0x2a0] sm:$0xff] }
 0x134   : > { %4318 = vmatprep.subr.bf16.mxu0 %v8126_v1  ;;  %v4328_v57 = vpack.c.bf16 %v752_v16, %v751_v29  ;;  %v759_v16 = vld [vmem:[%s7943_s2 + $0x2e0] sm:$0xff] }
 0x135   : > { %v6276_v11 = vsel %vm520_vm1, %v542_v50, %v544_v46  ;;  %v754_v50 = vld [vmem:[%s7943_s2 + $0x2b8] sm:$0xff]  ;;  %v755_v46 = vld [vmem:[%s7943_s2 + $0x2c0] sm:$0xff] }
 0x136   : > { %1143 = vmatmul.mubr.f32.gmra.mrb[14].mxu0 %v6249_v47  ;;  %v4331_v12 = vpack.c.bf16 %v754_v50, %v753_v38  ;;  %v761_v38 = vld [vmem:[%s7943_s2 + $0x2f0] sm:$0xff]  ;;  %v762_v50 = vld [vmem:[%s7943_s2 + $0x2f8] sm:$0xff] }
 0x137   : > { %1147 = vmatprep.mubr.f32.mxu0 %v5858_v59  ;;  %4320 = vmatpush1.bf16.msra.mxu0 %v4319_v51  ;;  %v6290_v59 = vsel %vm520_vm1, %v546_v53, %v547_v6  ;;  %v758_v53 = vld [vmem:[%s7943_s2 + $0x2d8] sm:$0xff] }
 0x138   : > { %4321 = vmatprep.subr.bf16.mxu0 %v8126_v1  ;;  %v4337_v29 = vpack.c.bf16 %v758_v53, %v757_v63 }
 0x13a   : > { %1148 = vmatmul.mubr.f32.gmra.mrb[16].mxu0 %v6263_v45 }
 0x13b   : > { %1152 = vmatprep.mubr.f32.mxu0 %v5861_v62  ;;  %4323 = vmatpush1.bf16.msra.mxu0 %v4322_v60  ;;  %v549_v62 = vrot.slane %v5878_v8, 2  ;;  %v551_v8 = vrot.slane %v5894_v20, 2  ;;  %v756_v60 = vld [vmem:[%s7943_s2 + $0x2c8] sm:$0xff] }
 0x13c   : > { %4324 = vmatprep.subr.bf16.mxu0 %v8126_v1  ;;  %v4334_v61 = vpack.c.bf16 %v756_v60, %v755_v46  ;;  %v564_v60 = vrot.slane %v5986_v25, 2 }
 0x13d   : > { %v6303_v51 = vsel %vm520_vm1, %v547_v6, %v549_v62  ;;  %v760_v62 = vld [vmem:[%s7943_s2 + $0x2e8] sm:$0xff] }
 0x13e   : > { %1153 = vmatmul.mubr.f32.gmra.mrb[18].mxu0 %v6276_v11 }
 0x13f   : > { %1157 = vmatprep.mubr.f32.mxu0 %v5894_v20  ;;  %4326 = vmatpush1.bf16.msra.mxu0 %v4325_v28  ;;  %v6317_v20 = vsel %vm520_vm1, %v551_v8, %v552_v10  ;;  %v557_v28 = vrot.slane %v5933_v43, 2 }
 0x140   : > { %4327 = vmatprep.subr.bf16.mxu0 %v8126_v1 }
 0x142   : > { %1158 = vmatmul.mubr.f32.gmra.mrb[20].mxu0 %v6290_v59 }
 0x143   : > { %1162 = vmatprep.mubr.f32.mxu0 %v5897_v21  ;;  %4329 = vmatpush1.bf16.msra.mxu0 %v4328_v57  ;;  %v554_v21 = vrot.slane %v5914_v31, 2  ;;  %v556_v31 = vrot.slane %v5930_v42, 2  ;;  %v4340_v57 = vpack.c.bf16 %v760_v62, %v759_v16  ;;  %v795_v62 = vld [vmem:[%s7943_s2 + $0x400] sm:$0xff] }
 0x144   : > { %4330 = vmatprep.subr.bf16.mxu0 %v8126_v1 }
 0x145   : > { %v6330_v6 = vsel %vm520_vm1, %v552_v10, %v554_v21  ;;  %v562_v10 = vrot.slane %v5969_v4, 2  ;;  %v567_v21 = vrot.slane %v5999_v36, 2 }
 0x146   : > { %1163 = vmatmul.mubr.f32.gmra.mrb[22].mxu0 %v6303_v51 }
 0x147   : > { %1167 = vmatprep.mubr.f32.mxu0 %v5930_v42  ;;  %4332 = vmatpush1.bf16.msra.mxu0 %v4331_v12  ;;  %v6344_v42 = vsel %vm520_vm1, %v556_v31, %v557_v28  ;;  %v4343_v12 = vpack.c.bf16 %v762_v50, %v761_v38  ;;  %v797_v38 = vld [vmem:[%s7943_s2 + $0x410] sm:$0xff]  ;;  %v798_v50 = vld [vmem:[%s7943_s2 + $0x418] sm:$0xff] }
 0x148   : > { %4333 = vmatprep.subr.bf16.mxu0 %v8126_v1 }
 0x14a   : > { %1168 = vmatmul.mubr.f32.gmra.mrb[24].mxu0 %v6317_v20 }
 0x14b   : > { %1172 = vmatprep.mubr.f32.mxu0 %v5933_v43  ;;  %4335 = vmatpush1.bf16.msra.mxu0 %v4334_v61  ;;  %v559_v43 = vrot.slane %v5950_v54, 2  ;;  %v561_v54 = vrot.slane %v5966_v3, 2  ;;  %v569_v61 = vrot.slane %v6010_v49, 2  ;;  %v574_v49 = vrot.slane %v6032_v7, 2 }
 0x14c   : > { %4336 = vmatprep.subr.bf16.mxu0 %v8126_v1  ;;  %v579_v7 = vrot.slane %v6054_v44, 2  ;;  %v584_v44 = vrot.slane %v6076_v30, 2  ;;  %v587_v30 = vrot.slane %v6088_v40, 2 }
 0x14d   : > { %v6357_v8 = vsel %vm520_vm1, %v557_v28, %v559_v43  ;;  %v6365_v46 = vsel %vm520_vm1, %v561_v54, %v562_v10  ;;  %v6385_v63 = vsel %vm520_vm1, %v567_v21, %v569_v61  ;;  %v796_v43 = vld [vmem:[%s7943_s2 + $0x408] sm:$0xff]  ;;  %v4397_v54 = vpack.c.bf16 %v798_v50, %v797_v38  ;;  %v801_v61 = vld [vmem:[%s7943_s2 + $0x430] sm:$0xff] }
 0x14e   : > { %1173 = vmatmul.mubr.f32.gmra.mrb[26].mxu0 %v6330_v6 }
 0x14f   : > { %1177 = vmatprep.mubr.f32.mxu0 %v5966_v3  ;;  %4338 = vmatpush1.bf16.msra.mxu0 %v4337_v29  ;;  %v6372_v3 = vsel %vm520_vm1, %v562_v10, %v564_v60 }
 0x150   : > { %4339 = vmatprep.subr.bf16.mxu0 %v8126_v1 }
 0x152   : > { %1178 = vmatmul.mubr.f32.gmra.mrb[28].mxu0 %v6344_v42 }
 0x153   : > { %1182 = vmatprep.mubr.f32.mxu0 %v5969_v4  ;;  %4341 = vmatpush1.bf16.msra.mxu0 %v4340_v57  ;;  %v566_v4 = vrot.slane %v5996_v34, 2  ;;  %v586_v57 = vrot.slane %v6085_v58, 2 }
 0x154   : > { %4342 = vmatprep.subr.bf16.mxu0 %v8126_v1 }
 0x155   : > { %v6379_v25 = vsel %vm520_vm1, %v566_v4, %v567_v21  ;;  %v6443_v10 = vsel %vm520_vm1, %v586_v57, %v587_v30  ;;  %v592_v21 = vrot.slane %v6110_v26, 2  ;;  %v807_v57 = vld [vmem:[%s7943_s2 + $0x460] sm:$0xff] }
 0x156   : > { %1183 = vmatmul.mubr.f32.gmra.mrb[30].mxu0 %v6357_v8 }
 0x157   : > { %1187 = vmatprep.mubr.f32.mxu0 %v5996_v34  ;;  %4344 = vmatpush1.bf16.msra.mxu0 %v4343_v12  ;;  %v571_v34 = vrot.slane %v6019_v52, 2  ;;  %v800_v12 = vld [vmem:[%s7943_s2 + $0x428] sm:$0xff] }
 0x158   : > { %4345 = vmatprep.subr.bf16.mxu0 %v8126_v1 }
 0x15a   : > { %1188 = vmatmul.mubr.f32.gmra.mrb[32].mxu0 %v6365_v46 }
 0x15b   : > { %1192 = vmatprep.mubr.f32.mxu0 %v5999_v36  ;;  %v572_v36 = vrot.slane %v6022_v56, 2 }
 0x15d   : > { %v6392_v53 = vsel %vm520_vm1, %v571_v34, %v572_v36  ;;  %v6398_v31 = vsel %vm520_vm1, %v572_v36, %v574_v49  ;;  %v802_v34 = vld [vmem:[%s7943_s2 + $0x438] sm:$0xff]  ;;  %v803_v49 = vld [vmem:[%s7943_s2 + $0x440] sm:$0xff] }
 0x15e   : > { %1193 = vmatmul.mubr.f32.gmra.mrb[34].mxu0 %v6372_v3  ;;  %v4405_v36 = vpack.c.bf16 %v802_v34, %v801_v61  ;;  %v768_v34 = vld [vmem:[%s7943_s2 + $0x328] sm:$0xff] }
 0x15f   : > { %1197 = vmatprep.mubr.f32.mxu0 %v6019_v52  ;;  %v576_v52 = vrot.slane %v6041_v19, 2 }
 0x162   : > { %1198 = vmatmul.mubr.f32.gmra.mrb[36].mxu0 %v6379_v25 }
 0x163   : > { %1202 = vmatprep.mubr.f32.mxu0 %v6022_v56  ;;  %v577_v56 = vrot.slane %v6044_v14, 2 }
 0x165   : > { %v6405_v28 = vsel %vm520_vm1, %v576_v52, %v577_v56  ;;  %v6411_v29 = vsel %vm520_vm1, %v577_v56, %v579_v7  ;;  %v804_v52 = vld [vmem:[%s7943_s2 + $0x448] sm:$0xff] }
 0x166   : > { %1203 = vmatmul.mubr.f32.gmra.mrb[38].mxu0 %v6385_v63  ;;  %v4409_v56 = vpack.c.bf16 %v804_v52, %v803_v49  ;;  %v773_v49 = vld [vmem:[%s7943_s2 + $0x350] sm:$0xff]  ;;  %v774_v52 = vld [vmem:[%s7943_s2 + $0x358] sm:$0xff] }
 0x167   : > { %1207 = vmatprep.mubr.f32.mxu0 %v6041_v19  ;;  %v581_v19 = vrot.slane %v6063_v32, 2 }
 0x16a   : > { %1208 = vmatmul.mubr.f32.gmra.mrb[40].mxu0 %v6392_v53 }
 0x16b   : > { %1212 = vmatprep.mubr.f32.mxu0 %v6044_v14  ;;  %v582_v14 = vrot.slane %v6066_v2, 2 }
 0x16d   : > { %v6418_v16 = vsel %vm520_vm1, %v581_v19, %v582_v14  ;;  %v597_v19 = vrot.slane %v6132_v35, 2 }
 0x16e   : > { %1213 = vmatmul.mubr.f32.gmra.mrb[42].mxu0 %v6398_v31 }
 0x16f   : > { %1217 = vmatprep.mubr.f32.mxu0 %v6063_v32  ;;  %v4393_v32 = vpack.c.bf16 %v796_v43, %v795_v62  ;;  %v806_v62 = vld [vmem:[%s7943_s2 + $0x458] sm:$0xff] }
 0x171   : > { %4394 = vmatprep.subr.bf16.mxu1 %v4393_v32 }
 0x172   : > { %1218 = vmatmul.mubr.f32.gmra.mrb[44].mxu0 %v6405_v28  ;;  %4396 = vmatpush3.bf16.msra.mxu1 %v4393_v32  ;;  %v6500_v32 = vld [vmem:[%s5588_s10 + $0x188] sm:$0xff] }
 0x173   : > { %1222 = vmatprep.mubr.f32.mxu0 %v6066_v2  ;;  %v6430_v2 = vsel %vm520_vm1, %v582_v14, %v584_v44  ;;  %4398 = vmatprep.subr.bf16.mxu1 %v4397_v54  ;;  %v6485_v14 = vld [vmem:[%s5588_s10 + $0x180] sm:$0xff]  ;;  %v805_v44 = vld [vmem:[%s7943_s2 + $0x450] sm:$0xff] }
 0x174   : > { %v4413_v43 = vpack.c.bf16 %v806_v62, %v805_v44  ;;  %v778_v44 = vld [vmem:[%s7943_s2 + $0x378] sm:$0xff]  ;;  %v779_v62 = vld [vmem:[%s7943_s2 + $0x380] sm:$0xff] }
 0x176   : > { %1223 = vmatmul.mubr.f32.gmra.mrb[46].mxu0 %v6411_v29  ;;  %4400 = vmatpush3.bf16.msra.mxu1 %v4397_v54  ;;  %v764_v54 = vld [vmem:[%s7943_s2 + $0x308] sm:$0xff] }
 0x177   : > { %1227 = vmatprep.mubr.f32.mxu0 %v6085_v58  ;;  %v589_v58 = vrot.slane %v6098_v0, 2  ;;  %v591_v0 = vrot.slane %v6107_v27, 2 }
 0x179   : > { %v6455_v4 = vsel %vm520_vm1, %v587_v30, %v589_v58  ;;  %v808_v30 = vld [vmem:[%s7943_s2 + $0x468] sm:$0xff]  ;;  %v809_v58 = vld [vmem:[%s7943_s2 + $0x470] sm:$0xff] }
 0x17a   : > { %1228 = vmatmul.mubr.f32.gmra.mrb[48].mxu0 %v6418_v16  ;;  %v4417_v38 = vpack.c.bf16 %v808_v30, %v807_v57  ;;  %v781_v57 = vld [vmem:[%s7943_s2 + $0x390] sm:$0xff]  ;;  %v782_v30 = vld [vmem:[%s7943_s2 + $0x398] sm:$0xff] }
 0x17b   : > { %1232 = vmatprep.mubr.f32.mxu0 %v6088_v40  ;;  %v799_v40 = vld [vmem:[%s7943_s2 + $0x420] sm:$0xff] }
 0x17c   : > { %v4401_v60 = vpack.c.bf16 %v800_v12, %v799_v40  ;;  %v810_v40 = vld [vmem:[%s7943_s2 + $0x478] sm:$0xff] }
 0x17d   : > { %v4421_v12 = vpack.c.bf16 %v810_v40, %v809_v58  ;;  %v8130_v58 = vld [vmem:[#allocation14_spill] sm:$0xff]  ;;  %v785_v40 = vld [vmem:[%s7943_s2 + $0x3b0] sm:$0xff] }
 0x17e   : > { %1233 = vmatmul.mubr.f32.gmra.mrb[50].mxu0 %v6430_v2  ;;  %4402 = vmatprep.subr.bf16.mxu1 %v4401_v60 }
 0x17f   : > { %1237 = vmatprep.mubr.f32.mxu0 %v6107_v27  ;;  %4404 = vmatpush3.bf16.msra.mxu1 %v4401_v60  ;;  %v6468_v27 = vsel %vm520_vm1, %v591_v0, %v592_v21  ;;  %v765_v0 = vld [vmem:[%s7943_s2 + $0x310] sm:$0xff] }
 0x180   : > { %4406 = vmatprep.subr.bf16.mxu1 %v4405_v36 }
 0x182   : > { %1238 = vmatmul.mubr.f32.gmra.mrb[52].mxu0 %v6443_v10 }
 0x183   : > { %1242 = vmatprep.mubr.f32.mxu0 %v6110_v26  ;;  %v594_v26 = vrot.slane %v6120_v17, 2  ;;  %4408 = vmatpush3.bf16.msra.mxu1 %v4405_v36  ;;  %v596_v17 = vrot.slane %v6129_v37, 2  ;;  %v770_v36 = vld [vmem:[%s7943_s2 + $0x338] sm:$0xff] }
 0x184   : > { %4410 = vmatprep.subr.bf16.mxu1 %v4409_v56 }
 0x185   : > { %v6480_v7 = vsel %vm520_vm1, %v592_v21, %v594_v26  ;;  %v766_v21 = vld [vmem:[%s7943_s2 + $0x318] sm:$0xff]  ;;  %v772_v26 = vld [vmem:[%s7943_s2 + $0x348] sm:$0xff] }
 0x186   : > { %1243 = vmatmul.mubr.f32.gmra.mrb[54].mxu0 %v6455_v4  ;;  %v4349_v61 = vpack.c.bf16 %v766_v21, %v765_v0  ;;  %v787_v0 = vld [vmem:[%s7943_s2 + $0x3c0] sm:$0xff]  ;;  %v788_v21 = vld [vmem:[%s7943_s2 + $0x3c8] sm:$0xff] }
 0x187   : > { %1247 = vmatprep.mubr.f32.mxu0 %v6129_v37  ;;  %4412 = vmatpush3.bf16.msra.mxu1 %v4409_v56  ;;  %v6496_v37 = vsel %vm520_vm1, %v596_v17, %v597_v19  ;;  %v775_v56 = vld [vmem:[%s7943_s2 + $0x360] sm:$0xff]  ;;  %v776_v17 = vld [vmem:[%s7943_s2 + $0x368] sm:$0xff] }
 0x188   : > { %4414 = vmatprep.subr.bf16.mxu1 %v4413_v43 }
 0x18a   : > { %1248 = vmatmul.mubr.f32.gmra.mrb[56].mxu0 %v6468_v27 }
 0x18b   : > { %1252 = vmatprep.mubr.f32.mxu0 %v6132_v35  ;;  %v599_v35 = vrot.slane %v6142_v23, 2  ;;  %4416 = vmatpush3.bf16.msra.mxu1 %v4413_v43  ;;  %v763_v23 = vld [vmem:[%s7943_s2 + $0x300] sm:$0xff]  ;;  %v780_v43 = vld [vmem:[%s7943_s2 + $0x388] sm:$0xff] }
 0x18c   : > { %4418 = vmatprep.subr.bf16.mxu1 %v4417_v38  ;;  %v4346_v60 = vpack.c.bf16 %v764_v54, %v763_v23  ;;  %v783_v23 = vld [vmem:[%s7943_s2 + $0x3a0] sm:$0xff]  ;;  %v784_v54 = vld [vmem:[%s7943_s2 + $0x3a8] sm:$0xff] }
 0x18d   : > { %v6511_v50 = vsel %vm520_vm1, %v597_v19, %v599_v35  ;;  %v777_v19 = vld [vmem:[%s7943_s2 + $0x370] sm:$0xff] }
 0x18e   : > { %1253 = vmatmul.mubr.f32.gmra.mrb[58].mxu0 %v6480_v7  ;;  %v8128_v35 = vld [vmem:[#allocation12_spill] sm:$0xff] }
 0x18f   : > { %1257 = vmatprep.mubr.f32.mxu0 %v6485_v14  ;;  %4420 = vmatpush3.bf16.msra.mxu1 %v4417_v38  ;;  %v8129_v38 = vld [vmem:[#allocation13_spill] sm:$0xff] }
 0x190   : > { %4422 = vmatprep.subr.bf16.mxu1 %v4421_v12 }
 0x192   : > { %1258 = vmatmul.mubr.f32.gmra.mrb[60].mxu0 %v6496_v37 }
 0x193   : > { %1262 = vmatprep.mubr.f32.mxu0 %v6500_v32  ;;  %4424 = vmatpush3.bf16.msra.mxu1 %v4421_v12  ;;  %v786_v12 = vld [vmem:[%s7943_s2 + $0x3b8] sm:$0xff] }
 0x194   : > { %4425 = vmatprep.subr.bf16.mxu1 %v8126_v1 }
 0x196   : > { %1263 = vmatmul.mubr.f32.gmra.mrb[62].mxu0 %v6511_v50  ;;  %4074 = vmatmul.mubr.f32.vlgmr.msra.gmra.mrb[0].mxu1 %v6222_v22 }
 0x197   : > { %1332 = vmatprep.mubr.f32.mxu0 %v6185_v5  ;;  %v767_v5 = vld [vmem:[%s7943_s2 + $0x320] sm:$0xff]  ;;  %4076 = vmatprep.mubr.f32.mxu1 %v6236_v15 }
 0x19a   : > { %1333 = vmatmul.mubr.f32.vlgmr.msra.gmra.mrb[0].mxu0 %v5728_v9  ;;  %v4352_v9 = vpack.c.bf16 %v768_v34, %v767_v5  ;;  %4077 = vmatmul.mubr.f32.gmra.mrb[2].mxu1 %v6249_v47  ;;  %v789_v5 = vld [vmem:[%s7943_s2 + $0x3d0] sm:$0xff]  ;;  %v790_v34 = vld [vmem:[%s7943_s2 + $0x3d8] sm:$0xff] }
 0x19b   : > { %4347 = vmatpush1.bf16.msra.mxu0 %v4346_v60  ;;  %1337 = vmatprep.mubr.f32.mxu0 %v6198_v13  ;;  %v769_v13 = vld [vmem:[%s7943_s2 + $0x330] sm:$0xff]  ;;  %v8131_v60 = vld [vmem:[#allocation15_spill] sm:$0xff] }
 0x19c   : > { %4348 = vmatprep.subr.bf16.mxu0 %v8126_v1  ;;  %4079 = vmatprep.mubr.f32.mxu1 %v6263_v45 }
 0x19e   : > { %1338 = vmatmul.mubr.f32.gmra.mrb[2].mxu0 %v5750_v18  ;;  %v4355_v18 = vpack.c.bf16 %v770_v36, %v769_v13  ;;  %4080 = vmatmul.mubr.f32.gmra.mrb[4].mxu1 %v6276_v11  ;;  %v791_v13 = vld [vmem:[%s7943_s2 + $0x3e0] sm:$0xff]  ;;  %v792_v36 = vld [vmem:[%s7943_s2 + $0x3e8] sm:$0xff] }
 0x19f   : > { %1342 = vmatprep.mubr.f32.mxu0 %v5805_v39  ;;  %4350 = vmatpush1.bf16.msra.mxu0 %v4349_v61  ;;  %v771_v39 = vld [vmem:[%s7943_s2 + $0x340] sm:$0xff]  ;;  %v8132_v61 = vld [vmem:[#allocation16_spill] sm:$0xff] }
 0x1a0   : > { %4351 = vmatprep.subr.bf16.mxu0 %v8126_v1  ;;  %4082 = vmatprep.mubr.f32.mxu1 %v6290_v59 }
 0x1a2   : > { %1343 = vmatmul.mubr.f32.gmra.mrb[4].mxu0 %v5767_v24  ;;  %4083 = vmatmul.mubr.f32.gmra.mrb[6].mxu1 %v6303_v51 }
 0x1a3   : > { %1347 = vmatprep.mubr.f32.mxu0 %v6222_v22  ;;  %4353 = vmatpush1.bf16.msra.mxu0 %v4352_v9  ;;  %v4358_v22 = vpack.c.bf16 %v772_v26, %v771_v39  ;;  %v8133_v9 = vld [vmem:[#allocation17_spill] sm:$0xff]  ;;  %v644_v39 = vrot.slane %v6500_v32, 2  ;;  %v6678_v26 = vld [vmem:[%s5588_s10 + $0x190] sm:$0x3] }
 0x1a4   : > { %4354 = vmatprep.subr.bf16.mxu0 %v8126_v1  ;;  %4085 = vmatprep.mubr.f32.mxu1 %v6317_v20 }
 0x1a6   : > { %1348 = vmatmul.mubr.f32.gmra.mrb[6].mxu0 %v5788_v33  ;;  %4086 = vmatmul.mubr.f32.gmra.mrb[8].mxu1 %v6330_v6 }
 0x1a7   : > { %1352 = vmatprep.mubr.f32.mxu0 %v6236_v15  ;;  %4356 = vmatpush1.bf16.msra.mxu0 %v4355_v18  ;;  %v4361_v15 = vpack.c.bf16 %v774_v52, %v773_v49  ;;  %v643_v18 = vrot.slane %v6485_v14, 2  ;;  %v646_v49 = vrot.slane %v6678_v26, 2 }
 0x1a8   : > { %4357 = vmatprep.subr.bf16.mxu0 %v8126_v1  ;;  %4088 = vmatprep.mubr.f32.mxu1 %v6344_v42 }
 0x1a9   : > { %v645_v52 = vsel %vm520_vm1, %v643_v18, %v644_v39  ;;  %v2417_v18 = vld [vmem:[#allocation6 + $0x30] sm:$0xff] }
 0x1aa   : > { %1353 = vmatmul.mubr.f32.gmra.mrb[8].mxu0 %v5811_v41  ;;  %4089 = vmatmul.mubr.f32.gmra.mrb[10].mxu1 %v6357_v8 }
 0x1ab   : > { %1357 = vmatprep.mubr.f32.mxu0 %v6249_v47  ;;  %4359 = vmatpush1.bf16.msra.mxu0 %v4358_v22  ;;  %v4364_v47 = vpack.c.bf16 %v776_v17, %v775_v56  ;;  %v4388_v22 = vpack.c.bf16 %v792_v36, %v791_v13  ;;  %v794_v56 = vld [vmem:[%s7943_s2 + $0x3f8] sm:$0xff] }
 0x1ac   : > { %4360 = vmatprep.subr.bf16.mxu0 %v8126_v1  ;;  %4091 = vmatprep.mubr.f32.mxu1 %v6365_v46  ;;  %v2416_v13 = vld [vmem:[#allocation6 + $0x28] sm:$0xff] }
 0x1ae   : > { %1358 = vmatmul.mubr.f32.gmra.mrb[10].mxu0 %v5830_v48  ;;  %4092 = vmatmul.mubr.f32.gmra.mrb[12].mxu1 %v6372_v3 }
 0x1af   : > { %1362 = vmatprep.mubr.f32.mxu0 %v6263_v45  ;;  %4362 = vmatpush1.bf16.msra.mxu0 %v4361_v15  ;;  %v4367_v45 = vpack.c.bf16 %v778_v44, %v777_v19  ;;  %v793_v15 = vld [vmem:[%s7943_s2 + $0x3f0] sm:$0xff]  ;;  %v8137_v44 = vld [vmem:[#allocation21_spill] sm:$0xff] }
 0x1b0   : > { %4363 = vmatprep.subr.bf16.mxu0 %v8126_v1  ;;  %4094 = vmatprep.mubr.f32.mxu1 %v6379_v25  ;;  %v4391_v17 = vpack.c.bf16 %v794_v56, %v793_v15  ;;  %v8136_v19 = vld [vmem:[#allocation20_spill] sm:$0xff]  ;;  %v2420_v56 = vld [vmem:[#allocation6 + $0x48] sm:$0xff] }
 0x1b1   : > { %v2419_v15 = vld [vmem:[#allocation6 + $0x40] sm:$0xff] }
 0x1b2   : > { %1363 = vmatmul.mubr.f32.gmra.mrb[12].mxu0 %v5847_v55  ;;  %4095 = vmatmul.mubr.f32.gmra.mrb[14].mxu1 %v6385_v63 }
 0x1b3   : > { %1367 = vmatprep.mubr.f32.mxu0 %v6276_v11  ;;  %4365 = vmatpush1.bf16.msra.mxu0 %v4364_v47  ;;  %v4370_v11 = vpack.c.bf16 %v780_v43, %v779_v62  ;;  %v647_v47 = vsel %vm520_vm1, %v644_v39, %v646_v49  ;;  %v8140_v62 = vld [vmem:[#allocation24_spill] sm:$0xff]  ;;  %v8141_v43 = vld [vmem:[#allocation25_spill] sm:$0xff] }
 0x1b4   : > { %4366 = vmatprep.subr.bf16.mxu0 %v8126_v1  ;;  %4097 = vmatprep.mubr.f32.mxu1 %v6392_v53  ;;  %v5178_v39 = vld [vmem:[%s5588_s10 + $0x38] sm:$0xff] }
 0x1b6   : > { %1368 = vmatmul.mubr.f32.gmra.mrb[14].mxu0 %v8128_v35  ;;  %4098 = vmatmul.mubr.f32.gmra.mrb[16].mxu1 %v6398_v31 }
 0x1b7   : > { %1372 = vmatprep.mubr.f32.mxu0 %v6290_v59  ;;  %4368 = vmatpush1.bf16.msra.mxu0 %v4367_v45  ;;  %v4373_v59 = vpack.c.bf16 %v782_v30, %v781_v57  ;;  %v8138_v45 = vld [vmem:[#allocation22_spill] sm:$0xff] }
 0x1b8   : > { %4369 = vmatprep.subr.bf16.mxu0 %v8126_v1  ;;  %4100 = vmatprep.mubr.f32.mxu1 %v6405_v28  ;;  %v8150_v57 = vld [vmem:[#allocation34_spill] sm:$0xff] }
 0x1ba   : > { %1373 = vmatmul.mubr.f32.gmra.mrb[16].mxu0 %v8129_v38  ;;  %4101 = vmatmul.mubr.f32.gmra.mrb[18].mxu1 %v6411_v29 }
 0x1bb   : > { %1377 = vmatprep.mubr.f32.mxu0 %v6303_v51  ;;  %4371 = vmatpush1.bf16.msra.mxu0 %v4370_v11  ;;  %v4376_v51 = vpack.c.bf16 %v784_v54, %v783_v23  ;;  %v6729_v11 = vld [vmem:[%s5588_s10 + $0x198] sm:$0xff] }
 0x1bc   : > { %4372 = vmatprep.subr.bf16.mxu0 %v8126_v1  ;;  %4103 = vmatprep.mubr.f32.mxu1 %v6418_v16  ;;  %v660_v30 = vrot.slane %v6729_v11, 2 }
 0x1be   : > { %1378 = vmatmul.mubr.f32.gmra.mrb[18].mxu0 %v8130_v58  ;;  %4104 = vmatmul.mubr.f32.gmra.mrb[20].mxu1 %v6430_v2 }
 0x1bf   : > { %1382 = vmatprep.mubr.f32.mxu0 %v6317_v20  ;;  %4374 = vmatpush1.bf16.msra.mxu0 %v4373_v59  ;;  %v4379_v20 = vpack.c.bf16 %v786_v12, %v785_v40  ;;  %v6742_v59 = vld [vmem:[%s5588_s10 + $0x1a8] sm:$0x3]  ;;  %v2411_v12 = vld [vmem:[#allocation6] sm:$0xff] }
 0x1c0   : > { %4375 = vmatprep.subr.bf16.mxu0 %v8126_v1  ;;  %4106 = vmatprep.mubr.f32.mxu1 %v6443_v10  ;;  %v663_v23 = vrot.slane %v6742_v59, 2 }
 0x1c2   : > { %1383 = vmatmul.mubr.f32.gmra.mrb[20].mxu0 %v8131_v60  ;;  %4107 = vmatmul.mubr.f32.gmra.mrb[22].mxu1 %v6455_v4 }
 0x1c3   : > { %1387 = vmatprep.mubr.f32.mxu0 %v6330_v6  ;;  %4377 = vmatpush1.bf16.msra.mxu0 %v4376_v51  ;;  %v4382_v6 = vpack.c.bf16 %v788_v21, %v787_v0  ;;  %v2413_v0 = vld [vmem:[#allocation6 + $0x10] sm:$0xff] }
 0x1c4   : > { %4378 = vmatprep.subr.bf16.mxu0 %v8126_v1  ;;  %4109 = vmatprep.mubr.f32.mxu1 %v6468_v27 }
 0x1c6   : > { %1388 = vmatmul.mubr.f32.gmra.mrb[22].mxu0 %v8132_v61  ;;  %4110 = vmatmul.mubr.f32.gmra.mrb[24].mxu1 %v6480_v7 }
 0x1c7   : > { %1392 = vmatprep.mubr.f32.mxu0 %v6344_v42  ;;  %4380 = vmatpush1.bf16.msra.mxu0 %v4379_v20  ;;  %v4385_v42 = vpack.c.bf16 %v790_v34, %v789_v5  ;;  %v2412_v20 = vld [vmem:[#allocation6 + $0x8] sm:$0xff]  ;;  %v5177_v34 = vld [vmem:[%s5588_s10 + $0x30] sm:$0xff] }
 0x1c8   : > { %4381 = vmatprep.subr.bf16.mxu0 %v8126_v1  ;;  %4112 = vmatprep.mubr.f32.mxu1 %v6496_v37  ;;  %v4426_v21 = vpack.c.bf16 %v2412_v20, %v2411_v12  ;;  %v5183_v12 = vld [vmem:[%s5588_s10 + $0x78] sm:$0xff]  ;;  %v2427_v20 = vld [vmem:[#allocation6 + $0x80] sm:$0xff] }
 0x1ca   : > { %1393 = vmatmul.mubr.f32.gmra.mrb[24].mxu0 %v8133_v9  ;;  %4113 = vmatmul.mubr.f32.gmra.mrb[26].mxu1 %v6511_v50 }
 0x1cb   : > { %1397 = vmatprep.mubr.f32.mxu0 %v6357_v8  ;;  %4383 = vmatpush1.bf16.msra.mxu0 %v4382_v6  ;;  %v8134_v8 = vld [vmem:[#allocation18_spill] sm:$0xff]  ;;  %v2414_v6 = vld [vmem:[#allocation6 + $0x18] sm:$0xff] }
 0x1cc   : > { %4384 = vmatprep.subr.bf16.mxu0 %v8126_v1  ;;  %4115 = vmatprep.mubr.f32.mxu1 %v645_v52  ;;  %v4429_v5 = vpack.c.bf16 %v2414_v6, %v2413_v0  ;;  %v2429_v6 = vld [vmem:[#allocation6 + $0x90] sm:$0xff] }
 0x1cd   : > { %4427 = vmatpush1.bf16.msra.mxu1 %v4426_v21  ;;  %v5184_v21 = vld [vmem:[%s5588_s10 + $0x80] sm:$0xff] }
 0x1ce   : > { %1398 = vmatmul.mubr.f32.gmra.mrb[26].mxu0 %v8134_v8  ;;  %4116 = vmatmul.mubr.f32.gmra.mrb[28].mxu1 %v647_v47 }
 0x1cf   : > { %1402 = vmatprep.mubr.f32.mxu0 %v6365_v46  ;;  %4386 = vmatpush1.bf16.msra.mxu0 %v4385_v42  ;;  %v8135_v46 = vld [vmem:[#allocation19_spill] sm:$0xff]  ;;  %v2415_v42 = vld [vmem:[#allocation6 + $0x20] sm:$0xff] }
 0x1d0   : > { %4387 = vmatprep.subr.bf16.mxu0 %v8126_v1  ;;  %4428 = vmatprep.subr.bf16.mxu1 %v8126_v1  ;;  %v4432_v36 = vpack.c.bf16 %v2416_v13, %v2415_v42  ;;  %v2431_v42 = vld [vmem:[#allocation6 + $0xa0] sm:$0xff] }
 0x1d1   : > { %4430 = vmatpush1.bf16.msra.mxu1 %v4429_v5 }
 0x1d2   : > { %1403 = vmatmul.mubr.f32.gmra.mrb[28].mxu0 %v8135_v46  ;;  %4431 = vmatprep.subr.bf16.mxu1 %v8126_v1 }
 0x1d3   : > { %1407 = vmatprep.mubr.f32.mxu0 %v6372_v3  ;;  %4389 = vmatpush1.bf16.msra.mxu0 %v4388_v22  ;;  %v8139_v3 = vld [vmem:[#allocation23_spill] sm:$0xff]  ;;  %v2540_v22 = vld [vmem:[#allocation6 + $0x408] sm:$0xff] }
 0x1d4   : > { %4390 = vmatprep.subr.bf16.mxu0 %v8126_v1 }
 0x1d5   : > { %4433 = vmatpush1.bf16.msra.mxu1 %v4432_v36  ;;  %v5186_v36 = vld [vmem:[%s5588_s10 + $0x98] sm:$0xff] }
 0x1d6   : > { %1408 = vmatmul.mubr.f32.gmra.mrb[30].mxu0 %v8136_v19  ;;  %4434 = vmatprep.subr.bf16.mxu1 %v8126_v1 }
 0x1d7   : > { %1412 = vmatprep.mubr.f32.mxu0 %v6379_v25  ;;  %4392 = vmatpush1.bf16.msra.mxu0 %v4391_v17  ;;  %v8142_v25 = vld [vmem:[#allocation26_spill] sm:$0xff]  ;;  %v4438_v17 = vpack.c.bf16 %v2420_v56, %v2419_v15  ;;  %v2542_v56 = vld [vmem:[#allocation6 + $0x418] sm:$0xff] }
 0x1d8   : > { %v2541_v15 = vld [vmem:[#allocation6 + $0x410] sm:$0xff] }
 0x1da   : > { %1413 = vmatmul.mubr.f32.gmra.mrb[32].mxu0 %v8137_v44 }
 0x1db   : > { %1417 = vmatprep.mubr.f32.mxu0 %v6385_v63  ;;  %v8143_v63 = vld [vmem:[#allocation27_spill] sm:$0xff] }
 0x1de   : > { %1418 = vmatmul.mubr.f32.gmra.mrb[34].mxu0 %v8138_v45 }
 0x1df   : > { %1422 = vmatprep.mubr.f32.mxu0 %v6392_v53  ;;  %v8144_v53 = vld [vmem:[#allocation28_spill] sm:$0xff] }
 0x1e2   : > { %1423 = vmatmul.mubr.f32.gmra.mrb[36].mxu0 %v8139_v3 }
 0x1e3   : > { %1427 = vmatprep.mubr.f32.mxu0 %v6398_v31  ;;  %v8145_v31 = vld [vmem:[#allocation29_spill] sm:$0xff] }
 0x1e6   : > { %1428 = vmatmul.mubr.f32.gmra.mrb[38].mxu0 %v8140_v62 }
 0x1e7   : > { %1432 = vmatprep.mubr.f32.mxu0 %v6405_v28  ;;  %v8146_v28 = vld [vmem:[#allocation30_spill] sm:$0xff] }
 0x1ea   : > { %1433 = vmatmul.mubr.f32.gmra.mrb[40].mxu0 %v8141_v43 }
 0x1eb   : > { %1437 = vmatprep.mubr.f32.mxu0 %v6411_v29  ;;  %v8147_v29 = vld [vmem:[#allocation31_spill] sm:$0xff] }
 0x1ee   : > { %1438 = vmatmul.mubr.f32.gmra.mrb[42].mxu0 %v8142_v25 }
 0x1ef   : > { %1442 = vmatprep.mubr.f32.mxu0 %v6418_v16  ;;  %v8148_v16 = vld [vmem:[#allocation32_spill] sm:$0xff] }
 0x1f2   : > { %1443 = vmatmul.mubr.f32.gmra.mrb[44].mxu0 %v8143_v63 }
 0x1f3   : > { %1447 = vmatprep.mubr.f32.mxu0 %v6430_v2  ;;  %v8149_v2 = vld [vmem:[#allocation33_spill] sm:$0xff] }
 0x1f6   : > { %1448 = vmatmul.mubr.f32.gmra.mrb[46].mxu0 %v8144_v53 }
 0x1f7   : > { %1452 = vmatprep.mubr.f32.mxu0 %v6443_v10  ;;  %v636_v10 = vrot.slane %v6485_v14, 1 }
 0x1fa   : > { %1453 = vmatmul.mubr.f32.gmra.mrb[48].mxu0 %v8145_v31 }
 0x1fb   : > { %1457 = vmatprep.mubr.f32.mxu0 %v6455_v4  ;;  %v637_v4 = vrot.slane %v6500_v32, 1 }
 0x1fe   : > { %1458 = vmatmul.mubr.f32.gmra.mrb[50].mxu0 %v8146_v28 }
 0x1ff   : > { %1462 = vmatprep.mubr.f32.mxu0 %v6468_v27  ;;  %v6732_v27 = vld [vmem:[%s5588_s10 + $0x1a0] sm:$0xff] }
 0x202   : > { %1463 = vmatmul.mubr.f32.gmra.mrb[52].mxu0 %v8147_v29 }
 0x203   : > { %1467 = vmatprep.mubr.f32.mxu0 %v6480_v7  ;;  %v6736_v7 = vsel %vm407_vm0, %v636_v10, %v637_v4  ;;  %v2422_v10 = vld [vmem:[#allocation6 + $0x58] sm:$0xff] }
 0x206   : > { %1468 = vmatmul.mubr.f32.gmra.mrb[54].mxu0 %v8148_v16 }
 0x207   : > { %1472 = vmatprep.mubr.f32.mxu0 %v6496_v37  ;;  %v639_v37 = vrot.slane %v6678_v26, 1  ;;  %v2539_v26 = vld [vmem:[#allocation6 + $0x400] sm:$0xff] }
 0x208   : > { %v6759_v49 = vpack.c.bf16 %v2540_v22, %v2539_v26  ;;  %v5190_v26 = vld [vmem:[%s5588_s10 + $0xc8] sm:$0xff]  ;;  %v5192_v22 = vld [vmem:[%s5588_s10 + $0xe0] sm:$0xff] }
 0x209   : > { %v6749_v40 = vsel %vm407_vm0, %v637_v4, %v639_v37  ;;  %v5181_v37 = vld [vmem:[%s5588_s10 + $0x60] sm:$0xff] }
 0x20a   : > { %1473 = vmatmul.mubr.f32.gmra.mrb[56].mxu0 %v8149_v2  ;;  %8151 = vst [vmem:[#allocation12_spill] sm:$0xff] %v6759_v49  ;;  %4618 = vmatprep.subr.bf16.mxu0 %v6759_v49 }
 0x20b   : > { %1477 = vmatprep.mubr.f32.mxu0 %v6511_v50  ;;  %v661_v50 = vrot.slane %v6732_v27, 2 }
 0x20d   : > { %v662_v54 = vsel %vm520_vm1, %v660_v30, %v661_v50  ;;  %v664_v51 = vsel %vm520_vm1, %v661_v50, %v663_v23  ;;  %v2424_v30 = vld [vmem:[#allocation6 + $0x68] sm:$0xff]  ;;  %v5182_v23 = vld [vmem:[%s5588_s10 + $0x68] sm:$0xff] }
 0x20e   : > { %1478 = vmatmul.mubr.f32.gmra.mrb[58].mxu0 %v8150_v57  ;;  %4118 = vmatprep.mubr.f32.mxu1 %v662_v54  ;;  %v2425_v54 = vld [vmem:[#allocation6 + $0x70] sm:$0xff] }
 0x20f   : > { %1482 = vmatprep.mubr.f32.mxu0 %v645_v52  ;;  %4119 = vmatmul.mubr.f32.gmra.mrb[30].mxu1 %v664_v51 }
 0x212   : > { %1483 = vmatmul.mubr.f32.gmra.mrb[60].mxu0 %v6736_v7 }
 0x213   : > { %1487 = vmatprep.mubr.f32.mxu0 %v647_v47  ;;  %v2421_v47 = vld [vmem:[#allocation6 + $0x50] sm:$0xff] }
 0x214   : > { %v4441_v4 = vpack.c.bf16 %v2422_v10, %v2421_v47  ;;  %v5363_v10 = vmov 0.0  }
 0x215   : > { %1975 = vst [vmem:[#allocation2] sm:$0xff] %v5363_v10  ;;  %1976 = vst [vmem:[#allocation2 + $0x8] sm:$0xff] %v5363_v10 }
 0x216   : > { %1488 = vmatmul.mubr.f32.gmra.mrb[62].mxu0 %v6749_v40  ;;  %1977 = vst [vmem:[#allocation2 + $0x10] sm:$0x3] %v5363_v10  ;;  %1979 = vst [vmem:[#allocation2 + $0x198] sm:$0xff] %v5363_v10 }
 0x217   : > { %1557 = vmatprep.mubr.f32.mxu0 %v5767_v24  ;;  %v2418_v24 = vld [vmem:[#allocation6 + $0x38] sm:$0xff]  ;;  %1981 = vst [vmem:[#allocation2 + $0x1a8] sm:$0x3] %v5363_v10  ;;  %1983 = vst [vmem:[#allocation2 + $0x18] sm:$0x1] %v5363_v10 }
 0x218   : > { %v4435_v52 = vpack.c.bf16 %v2418_v24, %v2417_v18  ;;  %v2434_v18 = vld [vmem:[#allocation6 + $0xb8] sm:$0xff]  ;;  %1984 = vst [vmem:[#allocation2 + $0x30] sm:$0x1] %v5363_v10  ;;  %1985 = vst [vmem:[#allocation2 + $0x48] sm:$0x1] %v5363_v10 }
 0x219   : > { %v5187_v24 = vld [vmem:[%s5588_s10 + $0xa8] sm:$0xff]  ;;  %1986 = vst [vmem:[#allocation2 + $0x60] sm:$0x1] %v5363_v10  ;;  %1987 = vst [vmem:[#allocation2 + $0x78] sm:$0x1] %v5363_v10 }
 0x21a   : > { %1558 = vmatmul.mubr.f32.vlgmr.msra.gmra.mrb[0].mxu0 %v5177_v34  ;;  %4436 = vmatpush1.bf16.msra.mxu1 %v4435_v52  ;;  %v5185_v34 = vld [vmem:[%s5588_s10 + $0x90] sm:$0xff]  ;;  %1988 = vst [vmem:[#allocation2 + $0x90] sm:$0x1] %v5363_v10  ;;  %1989 = vst [vmem:[#allocation2 + $0xa8] sm:$0x1] %v5363_v10 }
 0x21b   : > { %1562 = vmatprep.mubr.f32.mxu0 %v5788_v33  ;;  %v5179_v33 = vld [vmem:[%s5588_s10 + $0x48] sm:$0xff]  ;;  %4620 = vmatpush3.bf16.msra.mxu0 %v6759_v49  ;;  %v5196_v52 = vld [vmem:[%s5588_s10 + $0x110] sm:$0xff]  ;;  %1990 = vst [vmem:[#allocation2 + $0xc0] sm:$0x1] %v5363_v10  ;;  %1991 = vst [vmem:[#allocation2 + $0xd8] sm:$0x1] %v5363_v10 }
 0x21c   : > { %4437 = vmatprep.subr.bf16.mxu1 %v8126_v1  ;;  %1992 = vst [vmem:[#allocation2 + $0xf0] sm:$0x1] %v5363_v10  ;;  %1993 = vst [vmem:[#allocation2 + $0x108] sm:$0x1] %v5363_v10 }
 0x21d   : > { %1994 = vst [vmem:[#allocation2 + $0x120] sm:$0x1] %v5363_v10  ;;  %1995 = vst [vmem:[#allocation2 + $0x138] sm:$0x1] %v5363_v10 }
 0x21e   : > { %1563 = vmatmul.mubr.f32.gmra.mrb[2].mxu0 %v5178_v39  ;;  %4439 = vmatpush1.bf16.msra.mxu1 %v4438_v17  ;;  %v6813_v17 = vpack.c.bf16 %v2542_v56, %v2541_v15  ;;  %1996 = vst [vmem:[#allocation2 + $0x150] sm:$0x1] %v5363_v10  ;;  %1997 = vst [vmem:[#allocation2 + $0x168] sm:$0x1] %v5363_v10 }
 0x21f   : > { %1567 = vmatprep.mubr.f32.mxu0 %v5811_v41  ;;  %v5180_v41 = vld [vmem:[%s5588_s10 + $0x50] sm:$0xff]  ;;  %4440 = vmatprep.subr.bf16.mxu1 %v8126_v1  ;;  %1998 = vst [vmem:[#allocation2 + $0x180] sm:$0x1] %v5363_v10  ;;  %2001 = vst [vmem:[#allocation2 + $0x29] sm:$0x1] %v5363_v10 }
 0x220   : > { %8152 = vst [vmem:[#allocation13_spill] sm:$0xff] %v6813_v17  ;;  %2002 = vst [vmem:[#allocation2 + $0x41] sm:$0x1] %v5363_v10  ;;  %4622 = vmatprep.subr.bf16.mxu0 %v6813_v17 }
 0x221   : > { %2003 = vst [vmem:[#allocation2 + $0x59] sm:$0x1] %v5363_v10  ;;  %2004 = vst [vmem:[#allocation2 + $0x71] sm:$0x1] %v5363_v10  ;;  %4624 = vmatpush3.bf16.msra.mxu0 %v6813_v17 }
 0x222   : > { %1568 = vmatmul.mubr.f32.gmra.mrb[4].mxu0 %v5179_v33  ;;  %4442 = vmatpush1.bf16.msra.mxu1 %v4441_v4  ;;  %v2436_v33 = vld [vmem:[#allocation6 + $0xc8] sm:$0xff]  ;;  %2005 = vst [vmem:[#allocation2 + $0x89] sm:$0x1] %v5363_v10  ;;  %2006 = vst [vmem:[#allocation2 + $0xa1] sm:$0x1] %v5363_v10 }
 0x223   : > { %1572 = vmatprep.mubr.f32.mxu0 %v5830_v48  ;;  %v2423_v48 = vld [vmem:[#allocation6 + $0x60] sm:$0xff]  ;;  %4443 = vmatprep.subr.bf16.mxu1 %v8126_v1  ;;  %2007 = vst [vmem:[#allocation2 + $0xb9] sm:$0x1] %v5363_v10  ;;  %2008 = vst [vmem:[#allocation2 + $0xd1] sm:$0x1] %v5363_v10  ;;  %v2544_v4 = vld [vmem:[#allocation6 + $0x428] sm:$0xff] }
 0x224   : > { %v4444_v50 = vpack.c.bf16 %v2424_v30, %v2423_v48  ;;  %2009 = vst [vmem:[#allocation2 + $0xe9] sm:$0x1] %v5363_v10  ;;  %2010 = vst [vmem:[#allocation2 + $0x101] sm:$0x1] %v5363_v10  ;;  %v2439_v30 = vld [vmem:[#allocation6 + $0xe0] sm:$0xff] }
 0x225   : > { %2011 = vst [vmem:[#allocation2 + $0x119] sm:$0x1] %v5363_v10  ;;  %2012 = vst [vmem:[#allocation2 + $0x131] sm:$0x1] %v5363_v10 }
 0x226   : > { %1573 = vmatmul.mubr.f32.gmra.mrb[6].mxu0 %v5180_v41  ;;  %4445 = vmatpush1.bf16.msra.mxu1 %v4444_v50  ;;  %v2438_v41 = vld [vmem:[#allocation6 + $0xd8] sm:$0xff]  ;;  %2013 = vst [vmem:[#allocation2 + $0x149] sm:$0x1] %v5363_v10  ;;  %2014 = vst [vmem:[#allocation2 + $0x161] sm:$0x1] %v5363_v10  ;;  %v2440_v50 = vld [vmem:[#allocation6 + $0xe8] sm:$0xff] }
 0x227   : > { %1577 = vmatprep.mubr.f32.mxu0 %v5847_v55  ;;  %v2426_v55 = vld [vmem:[#allocation6 + $0x78] sm:$0xff]  ;;  %4446 = vmatprep.subr.bf16.mxu1 %v8126_v1  ;;  %2015 = vst [vmem:[#allocation2 + $0x179] sm:$0x1] %v5363_v10  ;;  %2016 = vst [vmem:[#allocation2 + $0x191] sm:$0x1] %v5363_v10 }
 0x228   : > { %v4447_v51 = vpack.c.bf16 %v2426_v55, %v2425_v54  ;;  %1982 = vst [vmem:[#allocation2] sm:$0x1] %v5363_v10  ;;  %1999 = vst [vmem:[#allocation2 + $0x198] sm:$0x1] %v5363_v10  ;;  %v2545_v54 = vld [vmem:[#allocation6 + $0x430] sm:$0xff]  ;;  %v2546_v55 = vld [vmem:[#allocation6 + $0x438] sm:$0xff] }
 0x229   : > { %2000 = vst [vmem:[#allocation2 + $0x11] sm:$0x1] %v5363_v10  ;;  %2017 = vst [vmem:[#allocation2 + $0x1a9] sm:$0x1] %v5363_v10 }
 0x22a   : > { %1578 = vmatmul.mubr.f32.gmra.mrb[8].mxu0 %v5181_v37  ;;  %4448 = vmatpush1.bf16.msra.mxu1 %v4447_v51  ;;  %v5199_v37 = vld [vmem:[%s5588_s10 + $0x138] sm:$0xff]  ;;  %v5200_v51 = vld [vmem:[%s5588_s10 + $0x140] sm:$0xff] }
 0x22b   : > { %1582 = vmatprep.mubr.f32.mxu0 %v8128_v35  ;;  %v2428_v35 = vld [vmem:[#allocation6 + $0x88] sm:$0xff]  ;;  %4449 = vmatprep.subr.bf16.mxu1 %v8126_v1 }
 0x22c   : > { %v4450_v0 = vpack.c.bf16 %v2428_v35, %v2427_v20  ;;  %v6874_v20 = vpack.c.bf16 %v2546_v55, %v2545_v54  ;;  %v2441_v35 = vld [vmem:[#allocation6 + $0xf0] sm:$0xff] }
 0x22e   : > { %1583 = vmatmul.mubr.f32.gmra.mrb[10].mxu0 %v5182_v23  ;;  %4451 = vmatpush1.bf16.msra.mxu1 %v4450_v0  ;;  %v4468_v23 = vpack.c.bf16 %v2440_v50, %v2439_v30  ;;  %8154 = vst [vmem:[#allocation15_spill] sm:$0xff] %v6874_v20  ;;  %v2442_v0 = vld [vmem:[#allocation6 + $0xf8] sm:$0xff]  ;;  %v2448_v30 = vld [vmem:[#allocation6 + $0x128] sm:$0xff] }
 0x22f   : > { %1587 = vmatprep.mubr.f32.mxu0 %v8129_v38  ;;  %v2430_v38 = vld [vmem:[#allocation6 + $0x98] sm:$0xff]  ;;  %4452 = vmatprep.subr.bf16.mxu1 %v8126_v1 }
 0x230   : > { %v4453_v5 = vpack.c.bf16 %v2430_v38, %v2429_v6  ;;  %v2051_v6 = vld [vmem:[#allocation2] sm:$0xff] }
 0x231   : > { %v2153_v38 = vrot.slane %v2051_v6, 1 }
 0x232   : > { %1588 = vmatmul.mubr.f32.gmra.mrb[12].mxu0 %v5183_v12  ;;  %4454 = vmatpush1.bf16.msra.mxu1 %v4453_v5  ;;  %v2154_v5 = vrot.slane %v5363_v10, 1 }
 0x233   : > { %1592 = vmatprep.mubr.f32.mxu0 %v8130_v58  ;;  %v2432_v58 = vld [vmem:[#allocation6 + $0xa8] sm:$0xff]  ;;  %4455 = vmatprep.subr.bf16.mxu1 %v8126_v1 }
 0x234   : > { %v4456_v13 = vpack.c.bf16 %v2432_v58, %v2431_v42  ;;  %v2548_v42 = vld [vmem:[#allocation6 + $0x448] sm:$0xff]  ;;  %v5201_v58 = vld [vmem:[%s5588_s10 + $0x150] sm:$0xff] }
 0x236   : > { %1593 = vmatmul.mubr.f32.gmra.mrb[14].mxu0 %v5184_v21  ;;  %4457 = vmatpush1.bf16.msra.mxu1 %v4456_v13  ;;  %v4471_v21 = vpack.c.bf16 %v2442_v0, %v2441_v35  ;;  %v2155_v13 = vsel %vm407_vm0, %v2153_v38, %v2154_v5 }
 0x237   : > { %1597 = vmatprep.mubr.f32.mxu0 %v8131_v60  ;;  %v2433_v60 = vld [vmem:[#allocation6 + $0xb0] sm:$0xff]  ;;  %4458 = vmatprep.subr.bf16.mxu1 %v8126_v1 }
 0x238   : > { %v4459_v39 = vpack.c.bf16 %v2434_v18, %v2433_v60  ;;  %2626 = vmatprep.mubr.f32.mxu1 %v2155_v13  ;;  %v2549_v18 = vld [vmem:[#allocation6 + $0x450] sm:$0xff] }
 0x23a   : > { %1598 = vmatmul.mubr.f32.gmra.mrb[16].mxu0 %v5185_v34  ;;  %4460 = vmatpush1.bf16.msra.mxu1 %v4459_v39  ;;  %v2547_v34 = vld [vmem:[#allocation6 + $0x440] sm:$0xff]  ;;  %v2550_v39 = vld [vmem:[#allocation6 + $0x458] sm:$0xff] }
 0x23b   : > { %1602 = vmatprep.mubr.f32.mxu0 %v8132_v61  ;;  %v5188_v61 = vld [vmem:[%s5588_s10 + $0xb0] sm:$0xff]  ;;  %4461 = vmatprep.subr.bf16.mxu1 %v8126_v1 }
 0x23e   : > { %1603 = vmatmul.mubr.f32.gmra.mrb[18].mxu0 %v5186_v36  ;;  %v2053_v36 = vld [vmem:[#allocation2 + $0x10] sm:$0x3] }
 0x23f   : > { %1607 = vmatprep.mubr.f32.mxu0 %v8133_v9  ;;  %v5189_v9 = vld [vmem:[%s5588_s10 + $0xc0] sm:$0xff]  ;;  %v2156_v60 = vrot.slane %v2053_v36, 1 }
 0x242   : > { %1608 = vmatmul.mubr.f32.gmra.mrb[20].mxu0 %v5187_v24  ;;  %v5202_v24 = vld [vmem:[%s5588_s10 + $0x158] sm:$0xff] }
 0x243   : > { %1612 = vmatprep.mubr.f32.mxu0 %v8134_v8  ;;  %v5191_v8 = vld [vmem:[%s5588_s10 + $0xd8] sm:$0xff] }
 0x246   : > { %1613 = vmatmul.mubr.f32.gmra.mrb[22].mxu0 %v5188_v61 }
 0x247   : > { %1617 = vmatprep.mubr.f32.mxu0 %v8135_v46  ;;  %v5193_v46 = vld [vmem:[%s5588_s10 + $0xf0] sm:$0xff] }
 0x24a   : > { %1618 = vmatmul.mubr.f32.gmra.mrb[24].mxu0 %v5189_v9  ;;  %v2157_v9 = vsel %vm407_vm0, %v2154_v5, %v2156_v60 }
 0x24b   : > { %1622 = vmatprep.mubr.f32.mxu0 %v8136_v19  ;;  %v5194_v19 = vld [vmem:[%s5588_s10 + $0xf8] sm:$0xff] }
 0x24e   : > { %1623 = vmatmul.mubr.f32.gmra.mrb[26].mxu0 %v5190_v26  ;;  %v6894_v26 = vpack.c.bf16 %v2550_v39, %v2549_v18  ;;  %v2457_v18 = vld [vmem:[#allocation6 + $0x170] sm:$0xff]  ;;  %v2458_v39 = vld [vmem:[#allocation6 + $0x178] sm:$0xff] }
 0x24f   : > { %1627 = vmatprep.mubr.f32.mxu0 %v8137_v44  ;;  %v5195_v44 = vld [vmem:[%s5588_s10 + $0x108] sm:$0xff] }
 0x250   : > { %8156 = vst [vmem:[#allocation17_spill] sm:$0xff] %v6894_v26 }
 0x252   : > { %1628 = vmatmul.mubr.f32.gmra.mrb[28].mxu0 %v5191_v8  ;;  %v2443_v8 = vld [vmem:[#allocation6 + $0x100] sm:$0xff] }
 0x253   : > { %1632 = vmatprep.mubr.f32.mxu0 %v8138_v45  ;;  %v5197_v45 = vld [vmem:[%s5588_s10 + $0x120] sm:$0xff] }
 0x256   : > { %1633 = vmatmul.mubr.f32.gmra.mrb[30].mxu0 %v5192_v22  ;;  %v2444_v22 = vld [vmem:[#allocation6 + $0x108] sm:$0xff] }
 0x257   : > { %1637 = vmatprep.mubr.f32.mxu0 %v8139_v3  ;;  %v2435_v3 = vld [vmem:[#allocation6 + $0xc0] sm:$0xff] }
 0x25a   : > { %1638 = vmatmul.mubr.f32.gmra.mrb[32].mxu0 %v5193_v46  ;;  %v4474_v46 = vpack.c.bf16 %v2444_v22, %v2443_v8  ;;  %v2459_v22 = vld [vmem:[#allocation6 + $0x180] sm:$0xff] }
 0x25b   : > { %1642 = vmatprep.mubr.f32.mxu0 %v8140_v62  ;;  %v4462_v62 = vpack.c.bf16 %v2436_v33, %v2435_v3  ;;  %v2554_v3 = vld [vmem:[#allocation6 + $0x478] sm:$0xff]  ;;  %v5204_v33 = vld [vmem:[%s5588_s10 + $0x170] sm:$0xff] }
 0x25d   : > { %4463 = vmatpush1.bf16.msra.mxu1 %v4462_v62 }
 0x25e   : > { %1643 = vmatmul.mubr.f32.gmra.mrb[34].mxu0 %v5194_v19  ;;  %4464 = vmatprep.subr.bf16.mxu1 %v8126_v1  ;;  %v2551_v19 = vld [vmem:[#allocation6 + $0x460] sm:$0xff] }
 0x25f   : > { %1647 = vmatprep.mubr.f32.mxu0 %v8141_v43  ;;  %v5198_v43 = vld [vmem:[%s5588_s10 + $0x128] sm:$0xff] }
 0x262   : > { %1648 = vmatmul.mubr.f32.gmra.mrb[36].mxu0 %v5195_v44  ;;  %v2552_v44 = vld [vmem:[#allocation6 + $0x468] sm:$0xff] }
 0x263   : > { %1652 = vmatprep.mubr.f32.mxu0 %v8142_v25  ;;  %v2437_v25 = vld [vmem:[#allocation6 + $0xd0] sm:$0xff] }
 0x264   : > { %v4465_v47 = vpack.c.bf16 %v2438_v41, %v2437_v25  ;;  %v2445_v25 = vld [vmem:[#allocation6 + $0x110] sm:$0xff]  ;;  %v2446_v41 = vld [vmem:[#allocation6 + $0x118] sm:$0xff] }
 0x266   : > { %1653 = vmatmul.mubr.f32.gmra.mrb[38].mxu0 %v5196_v52  ;;  %4466 = vmatpush1.bf16.msra.mxu1 %v4465_v47  ;;  %v5203_v52 = vld [vmem:[%s5588_s10 + $0x168] sm:$0xff]  ;;  %v4477_v47 = vpack.c.bf16 %v2446_v41, %v2445_v25  ;;  %v2463_v25 = vld [vmem:[#allocation6 + $0x1a0] sm:$0xff]  ;;  %v2464_v41 = vld [vmem:[#allocation6 + $0x1a8] sm:$0xff] }
 0x267   : > { %1657 = vmatprep.mubr.f32.mxu0 %v8143_v63  ;;  %4467 = vmatprep.subr.bf16.mxu1 %v8126_v1 }
 0x269   : > { %v6816_v63 = vpop.f32.mrb[0].mxu1 }
 0x26a   : > { %1658 = vmatmul.mubr.f32.gmra.mrb[40].mxu0 %v5197_v45  ;;  %4469 = vmatpush1.bf16.msra.mxu1 %v4468_v23  ;;  %v6903_v45 = vpack.c.bf16 %v2552_v44, %v2551_v19 }
 0x26b   : > { %1662 = vmatprep.mubr.f32.mxu0 %v8144_v53  ;;  %v6855_v53 = vpop.f32.mrb[1].mxu1  ;;  %4470 = vmatprep.subr.bf16.mxu1 %v8126_v1 }
 0x26c   : > { %8157 = vst [vmem:[#allocation18_spill] sm:$0xff] %v6903_v45 }
 0x26d   : > { %v6871_v12 = vpop.f32.mrb[2].mxu1 }
 0x26e   : > { %1663 = vmatmul.mubr.f32.gmra.mrb[42].mxu0 %v5198_v43  ;;  %4472 = vmatpush1.bf16.msra.mxu1 %v4471_v21  ;;  %v654_v43 = vrot.slane %v6732_v27, 1  ;;  %v2453_v21 = vld [vmem:[#allocation6 + $0x150] sm:$0xff] }
 0x26f   : > { %1667 = vmatprep.mubr.f32.mxu0 %v8145_v31  ;;  %v2543_v31 = vld [vmem:[#allocation6 + $0x420] sm:$0xff]  ;;  %4473 = vmatprep.subr.bf16.mxu1 %v8126_v1 }
 0x270   : > { %v6865_v48 = vpack.c.bf16 %v2544_v4, %v2543_v31 }
 0x271   : > { %2627 = vmatmul.mubr.f32.vlgmr.msra.gmra.mrb[32].mxu1 %v2051_v6  ;;  %v2454_v6 = vld [vmem:[#allocation6 + $0x158] sm:$0xff] }
 0x272   : > { %1668 = vmatmul.mubr.f32.gmra.mrb[44].mxu0 %v5199_v37  ;;  %8153 = vst [vmem:[#allocation14_spill] sm:$0xff] %v6865_v48  ;;  %4626 = vmatprep.subr.bf16.mxu0 %v6865_v48  ;;  %v2447_v37 = vld [vmem:[#allocation6 + $0x120] sm:$0xff]  ;;  %v4489_v5 = vpack.c.bf16 %v2454_v6, %v2453_v21  ;;  %v2469_v21 = vld [vmem:[#allocation6 + $0x1d0] sm:$0xff]  ;;  %v2470_v6 = vld [vmem:[#allocation6 + $0x1d8] sm:$0xff] }
 0x273   : > { %1672 = vmatprep.mubr.f32.mxu0 %v8146_v28  ;;  %4628 = vmatpush3.bf16.msra.mxu0 %v6865_v48  ;;  %v6877_v28 = vpop.f32.mrb[3].mxu1 }
 0x274   : > { %4630 = vmatprep.subr.bf16.mxu0 %v6874_v20  ;;  %v6891_v61 = vpop.f32.mrb[4].mxu1  ;;  %2631 = vmatprep.mubr.f32.mxu1 %v2157_v9  ;;  %v4495_v9 = vpack.c.bf16 %v2458_v39, %v2457_v18 }
 0x275   : > { %2632 = vmatmul.mubr.f32.gmra.mrb[34].mxu1 %v5363_v10  ;;  %v656_v10 = vrot.slane %v6742_v59, 1 }
 0x276   : > { %1673 = vmatmul.mubr.f32.gmra.mrb[46].mxu0 %v5200_v51  ;;  %4475 = vmatpush1.bf16.msra.mxu1 %v4474_v46  ;;  %v2451_v51 = vld [vmem:[#allocation6 + $0x140] sm:$0xff]  ;;  %v2460_v46 = vld [vmem:[#allocation6 + $0x188] sm:$0xff] }
 0x277   : > { %1677 = vmatprep.mubr.f32.mxu0 %v8147_v29  ;;  %4632 = vmatpush3.bf16.msra.mxu0 %v6874_v20  ;;  %v6885_v29 = vpack.c.bf16 %v2548_v42, %v2547_v34  ;;  %v657_v4 = vsel %vm407_vm0, %v654_v43, %v656_v10  ;;  %v2455_v42 = vld [vmem:[#allocation6 + $0x160] sm:$0xff]  ;;  %v4498_v44 = vpack.c.bf16 %v2460_v46, %v2459_v22  ;;  %v2472_v46 = vld [vmem:[#allocation6 + $0x1e8] sm:$0xff] }
 0x278   : > { %4476 = vmatprep.subr.bf16.mxu1 %v8126_v1  ;;  %v2471_v22 = vld [vmem:[#allocation6 + $0x1e0] sm:$0xff] }
 0x279   : > { %8155 = vst [vmem:[#allocation16_spill] sm:$0xff] %v6885_v29  ;;  %4634 = vmatprep.subr.bf16.mxu0 %v6885_v29 }
 0x27a   : > { %1678 = vmatmul.mubr.f32.gmra.mrb[48].mxu0 %v5201_v58  ;;  %4478 = vmatpush1.bf16.msra.mxu1 %v4477_v47  ;;  %v2456_v58 = vld [vmem:[#allocation6 + $0x168] sm:$0xff] }
 0x27b   : > { %1682 = vmatprep.mubr.f32.mxu0 %v8148_v16  ;;  %4636 = vmatpush3.bf16.msra.mxu0 %v6885_v29  ;;  %v6897_v16 = vpop.f32.mrb[5].mxu1  ;;  %v4492_v36 = vpack.c.bf16 %v2456_v58, %v2455_v42  ;;  %v4513_v42 = vpack.c.bf16 %v2470_v6, %v2469_v21  ;;  %v6992_v58 = vld [vmem:[%s7944_s3] ss:$0 sm:$0xff] }
 0x27c   : > { %4638 = vmatprep.subr.bf16.mxu0 %v6894_v26  ;;  %v6910_v62 = vpop.f32.mrb[6].mxu1  ;;  %4479 = vmatprep.subr.bf16.mxu1 %v8126_v1 }
 0x27d   : > { %v6915_v56 = vpop.f32.mrb[7].mxu1 }
 0x27e   : > { %1683 = vmatmul.mubr.f32.gmra.mrb[50].mxu0 %v5202_v24  ;;  %v6927_v31 = vpop.f32.mrb[8].mxu1 }
 0x27f   : > { %1687 = vmatprep.mubr.f32.mxu0 %v8149_v2  ;;  %4640 = vmatpush3.bf16.msra.mxu0 %v6894_v26  ;;  %v2553_v2 = vld [vmem:[#allocation6 + $0x470] sm:$0xff]  ;;  %v6930_v50 = vpop.f32.mrb[9].mxu1 }
 0x280   : > { %4642 = vmatprep.subr.bf16.mxu0 %v6903_v45  ;;  %v6912_v15 = vpack.c.bf16 %v2554_v3, %v2553_v2  ;;  %v6935_v59 = vpop.f32.mrb[10].mxu1  ;;  %v2461_v2 = vld [vmem:[#allocation6 + $0x190] sm:$0xff]  ;;  %v2462_v3 = vld [vmem:[#allocation6 + $0x198] sm:$0xff] }
 0x281   : > { %v6937_v23 = vpop.f32.mrb[11].mxu1 }
 0x282   : > { %1688 = vmatmul.mubr.f32.gmra.mrb[52].mxu0 %v5203_v52  ;;  %8158 = vst [vmem:[#allocation19_spill] sm:$0xff] %v6912_v15  ;;  %v6940_v55 = vpop.f32.mrb[12].mxu1 }
 0x283   : > { %1692 = vmatprep.mubr.f32.mxu0 %v8150_v57  ;;  %4644 = vmatpush3.bf16.msra.mxu0 %v6903_v45  ;;  %v653_v57 = vrot.slane %v6729_v11, 1  ;;  %v6942_v35 = vpop.f32.mrb[13].mxu1 }
 0x284   : > { %4646 = vmatprep.subr.bf16.mxu0 %v6912_v15 }
 0x286   : > { %1693 = vmatmul.mubr.f32.gmra.mrb[54].mxu0 %v5204_v33 }
 0x287   : > { %1697 = vmatprep.mubr.f32.mxu0 %v6736_v7  ;;  %4648 = vmatpush3.bf16.msra.mxu0 %v6912_v15  ;;  %v655_v7 = vsel %vm407_vm0, %v653_v57, %v654_v43  ;;  %v4501_v57 = vpack.c.bf16 %v2462_v3, %v2461_v2  ;;  %v4516_v2 = vpack.c.bf16 %v2472_v46, %v2471_v22 }
 0x28a   : > { %1698 = vmatmul.mubr.f32.gmra.mrb[56].mxu0 %v6485_v14  ;;  %v4480_v14 = vpack.c.bf16 %v2448_v30, %v2447_v37  ;;  %v2466_v37 = vld [vmem:[#allocation6 + $0x1b8] sm:$0xff] }
 0x28b   : > { %1702 = vmatprep.mubr.f32.mxu0 %v6749_v40  ;;  %v2450_v40 = vld [vmem:[#allocation6 + $0x138] sm:$0xff] }
 0x28c   : > { %4481 = vmatpush1.bf16.msra.mxu1 %v4480_v14 }
 0x28d   : > { %4482 = vmatprep.subr.bf16.mxu1 %v8126_v1 }
 0x28e   : > { %1703 = vmatmul.mubr.f32.gmra.mrb[58].mxu0 %v6500_v32  ;;  %v2449_v32 = vld [vmem:[#allocation6 + $0x130] sm:$0xff] }
 0x28f   : > { %1707 = vmatprep.mubr.f32.mxu0 %v655_v7  ;;  %v4483_v54 = vpack.c.bf16 %v2450_v40, %v2449_v32  ;;  %v4504_v7 = vpack.c.bf16 %v2464_v41, %v2463_v25  ;;  %v2467_v40 = vld [vmem:[#allocation6 + $0x1c0] sm:$0xff] }
 0x291   : > { %4484 = vmatpush1.bf16.msra.mxu1 %v4483_v54  ;;  %v2468_v54 = vld [vmem:[#allocation6 + $0x1c8] sm:$0xff] }
 0x292   : > { %1708 = vmatmul.mubr.f32.gmra.mrb[60].mxu0 %v6729_v11  ;;  %4485 = vmatprep.subr.bf16.mxu1 %v8126_v1  ;;  %v2452_v11 = vld [vmem:[#allocation6 + $0x148] sm:$0xff] }
 0x293   : > { %1712 = vmatprep.mubr.f32.mxu0 %v657_v4  ;;  %v4486_v0 = vpack.c.bf16 %v2452_v11, %v2451_v51  ;;  %v2465_v4 = vld [vmem:[#allocation6 + $0x1b0] sm:$0xff]  ;;  %v4510_v11 = vpack.c.bf16 %v2468_v54, %v2467_v40 }
 0x294   : > { %v4507_v14 = vpack.c.bf16 %v2466_v37, %v2465_v4  ;;  %v2473_v4 = vld [vmem:[#allocation6 + $0x1f0] sm:$0xff]  ;;  %v2474_v37 = vld [vmem:[#allocation6 + $0x1f8] sm:$0xff] }
 0x295   : > { %4487 = vmatpush1.bf16.msra.mxu1 %v4486_v0  ;;  %v4519_v54 = vpack.c.bf16 %v2474_v37, %v2473_v4 }
 0x296   : > { %1713 = vmatmul.mubr.f32.gmra.mrb[62].mxu0 %v6732_v27  ;;  %4488 = vmatprep.subr.bf16.mxu1 %v8126_v1  ;;  %v6945_v27 = vpop.f32.mrb[14].mxu1 }
 0x297   : > { %v6947_v38 = vpop.f32.mrb[15].mxu1 }
 0x298   : > { %v6950_v34 = vpop.f32.mrb[16].mxu1 }
 0x299   : > { %4490 = vmatpush1.bf16.msra.mxu1 %v4489_v5  ;;  %v6952_v13 = vpop.f32.mrb[17].mxu1 }
 0x29a   : > { %4491 = vmatprep.subr.bf16.mxu1 %v8126_v1  ;;  %v6955_v60 = vpop.f32.mrb[18].mxu1 }
 0x29b   : > { %v6957_v24 = vpop.f32.mrb[19].mxu1 }
 0x29c   : > { %v6960_v8 = vpop.f32.mrb[20].mxu1 }
 0x29d   : > { %4493 = vmatpush1.bf16.msra.mxu1 %v4492_v36  ;;  %v6962_v19 = vpop.f32.mrb[21].mxu1 }
 0x29e   : > { %4494 = vmatprep.subr.bf16.mxu1 %v8126_v1  ;;  %v6965_v52 = vpop.f32.mrb[22].mxu1 }
 0x29f   : > { %v6967_v33 = vpop.f32.mrb[23].mxu1 }
 0x2a0   : > { %v6970_v43 = vpop.f32.mrb[24].mxu1 }
 0x2a1   : > { %4496 = vmatpush1.bf16.msra.mxu1 %v4495_v9  ;;  %v6972_v47 = vpop.f32.mrb[25].mxu1 }
 0x2a2   : > { %4497 = vmatprep.subr.bf16.mxu1 %v8126_v1  ;;  %v6975_v10 = vpop.f32.mrb[26].mxu1 }
 0x2a3   : > { %v6977_v30 = vpop.f32.mrb[27].mxu1 }
 0x2a4   : > { %v6980_v32 = vpop.f32.mrb[28].mxu1 }
 0x2a5   : > { %4499 = vmatpush1.bf16.msra.mxu1 %v4498_v44  ;;  %v6982_v51 = vpop.f32.mrb[29].mxu1 }
 0x2a6   : > { %4500 = vmatprep.subr.bf16.mxu1 %v8126_v1 }
 0x2a9   : > { %4502 = vmatpush1.bf16.msra.mxu1 %v4501_v57 }
 0x2aa   : > { %4503 = vmatprep.subr.bf16.mxu1 %v8126_v1 }
 0x2ad   : > { %4505 = vmatpush1.bf16.msra.mxu1 %v4504_v7 }
 0x2ae   : > { %4506 = vmatprep.subr.bf16.mxu1 %v8126_v1 }
 0x2b1   : > { %4508 = vmatpush1.bf16.msra.mxu1 %v4507_v14 }
 0x2b2   : > { %4509 = vmatprep.subr.bf16.mxu1 %v8126_v1 }
 0x2b5   : > { %4511 = vmatpush1.bf16.msra.mxu1 %v4510_v11 }
 0x2b6   : > { %4512 = vmatprep.subr.bf16.mxu1 %v8126_v1 }
 0x2b9   : > { %4514 = vmatpush1.bf16.msra.mxu1 %v4513_v42 }
 0x2ba   : > { %4515 = vmatprep.subr.bf16.mxu1 %v8126_v1 }
 0x2bd   : > { %4517 = vmatpush1.bf16.msra.mxu1 %v4516_v2 }
 0x2be   : > { %4518 = vmatprep.subr.bf16.mxu1 %v8126_v1 }
 0x2c1   : > { %4520 = vmatpush1.bf16.msra.mxu1 %v4519_v54 }
 0x2c2   : > { %4521 = vmatprep.subr.bf16.mxu1 %v8126_v1 }
 0x2e2   : > { %v6985_v0 = vpop.f32.mrb[30].mxu1 }
 0x2e3   : > { %v6987_v5 = vpop.f32.mrb[31].mxu1 }
 0x2ed   : > { %v1559_v36 = vpop.f32.mrb[0].mxu0 }
 0x2ee   : > { %v4665_v18 = vadd.f32 %v6992_v58, %v1559_v36  ;;  %v1561_v39 = vpop.f32.mrb[1].mxu0 }
 0x2f0   : > { %v1785_v9 = vadd.f32 %v4665_v18, %v6855_v53 }
 0x2f1   : > { %v1564_v44 = vpop.f32.mrb[2].mxu0 }
 0x2f2   : > { %v1943_v3 = vmax.f32 %v1785_v9, 0.0  ;;  %v4666_v57 = vadd.f32 %v6992_v58, %v1564_v44  ;;  %v1566_v25 = vpop.f32.mrb[3].mxu0 }
 0x2f4   : > { %2019 = vst [vmem:[#allocation2 + $0x19] sm:$0xff] %v1943_v3  ;;  %v1790_v41 = vadd.f32 %v4666_v57, %v6816_v63 }
 0x2f5   : > { %v1569_v7 = vpop.f32.mrb[4].mxu0 }
 0x2f6   : > { %v1944_v14 = vmax.f32 %v1790_v41, 0.0  ;;  %v4667_v53 = vadd.f32 %v6992_v58, %v1569_v7  ;;  %v1571_v40 = vpop.f32.mrb[5].mxu0 }
 0x2f8   : > { %2020 = vst [vmem:[#allocation2 + $0x21] sm:$0xff] %v1944_v14  ;;  %v1795_v11 = vadd.f32 %v4667_v53, %v6877_v28 }
 0x2f9   : > { %v1574_v21 = vpop.f32.mrb[6].mxu0 }
 0x2fa   : > { %v1945_v6 = vmax.f32 %v1795_v11, 0.0  ;;  %v4668_v63 = vadd.f32 %v6992_v58, %v1574_v21  ;;  %v1576_v42 = vpop.f32.mrb[7].mxu0 }
 0x2fb   : > { %v7005_v39 = vld [vmem:[#allocation2 + $0x18] sm:$0xff] }
 0x2fc   : > { %2021 = vst [vmem:[#allocation2 + $0x31] sm:$0xff] %v1945_v6  ;;  %v1800_v36 = vadd.f32 %v4668_v63, %v6871_v12  ;;  %v2158_v3 = vrot.slane %v7005_v39, 1 }
 0x2fd   : > { %v1579_v18 = vpop.f32.mrb[8].mxu0 }
 0x2fe   : > { %v1946_v9 = vmax.f32 %v1800_v36, 0.0  ;;  %v4669_v22 = vadd.f32 %v6992_v58, %v1579_v18  ;;  %v1581_v46 = vpop.f32.mrb[9].mxu0 }
 0x2ff   : > { %v7008_v44 = vld [vmem:[#allocation2 + $0x20] sm:$0xff]  ;;  %v7010_v28 = vld [vmem:[#allocation2 + $0x28] sm:$0x3] }
 0x300   : > { %2022 = vst [vmem:[#allocation2 + $0x39] sm:$0xff] %v1946_v9  ;;  %v1805_v2 = vadd.f32 %v4669_v22, %v6897_v16  ;;  %v2159_v57 = vrot.slane %v7008_v44, 1  ;;  %v2161_v12 = vrot.slane %v7010_v28, 1 }
 0x301   : > { %v1584_v25 = vpop.f32.mrb[10].mxu0 }
 0x302   : > { %v1947_v41 = vmax.f32 %v1805_v2, 0.0  ;;  %v4670_v7 = vadd.f32 %v6992_v58, %v1584_v25  ;;  %v1586_v4 = vpop.f32.mrb[11].mxu0  ;;  %v7018_v37 = vsel %vm407_vm0, %v2158_v3, %v2159_v57  ;;  %v7024_v16 = vsel %vm407_vm0, %v2159_v57, %v2161_v12 }
 0x303   : > { %8159 = vst [vmem:[#allocation20_spill] sm:$0xff] %v7018_v37  ;;  %2636 = vmatprep.mubr.f32.mxu1 %v7018_v37  ;;  %8160 = vst [vmem:[#allocation21_spill] sm:$0xff] %v7024_v16  ;;  %v7026_v53 = vld [vmem:[#allocation2 + $0x30] sm:$0xff] }
 0x304   : > { %2023 = vst [vmem:[#allocation2 + $0x49] sm:$0xff] %v1947_v41  ;;  %v1810_v14 = vadd.f32 %v4670_v7, %v6891_v61  ;;  %2637 = vmatmul.mubr.f32.gmra.mrb[36].mxu1 %v7005_v39  ;;  %v2163_v63 = vrot.slane %v7026_v53, 1  ;;  %v2275_v61 = vrot.slane %v7026_v53, 2 }
 0x305   : > { %v1589_v40 = vpop.f32.mrb[12].mxu0  ;;  %2641 = vmatprep.mubr.f32.mxu1 %v7024_v16 }
 0x306   : > { %v1948_v54 = vmax.f32 %v1810_v14, 0.0  ;;  %v4671_v11 = vadd.f32 %v6992_v58, %v1589_v40  ;;  %v1591_v21 = vpop.f32.mrb[13].mxu0 }
 0x307   : > { %v7030_v6 = vld [vmem:[#allocation2 + $0x38] sm:$0xff]  ;;  %v2059_v42 = vld [vmem:[#allocation2 + $0x40] sm:$0x3] }
 0x308   : > { %2024 = vst [vmem:[#allocation2 + $0x51] sm:$0xff] %v1948_v54  ;;  %v1815_v36 = vadd.f32 %v4671_v11, %v6915_v56  ;;  %2642 = vmatmul.mubr.f32.gmra.mrb[38].mxu1 %v7008_v44  ;;  %v2164_v18 = vrot.slane %v7030_v6, 1  ;;  %v2276_v9 = vrot.slane %v7030_v6, 2  ;;  %v2278_v22 = vrot.slane %v2059_v42, 2 }
 0x309   : > { %v1594_v46 = vpop.f32.mrb[14].mxu0  ;;  %v2166_v2 = vrot.slane %v2059_v42, 1 }
 0x30a   : > { %v1949_v3 = vmax.f32 %v1815_v36, 0.0  ;;  %v4672_v57 = vadd.f32 %v6992_v58, %v1594_v46  ;;  %v1596_v12 = vpop.f32.mrb[15].mxu0  ;;  %v7040_v25 = vsel %vm407_vm0, %v2163_v63, %v2164_v18  ;;  %v7043_v41 = vsel %vm520_vm1, %v2275_v61, %v2276_v9 }
 0x30b   : > { %8161 = vst [vmem:[#allocation22_spill] sm:$0xff] %v7040_v25  ;;  %2646 = vmatprep.mubr.f32.mxu1 %v7040_v25  ;;  %4153 = vmatprep.mubr.f32.mxu0 %v7043_v41  ;;  %v7048_v56 = vsel %vm520_vm1, %v2276_v9, %v2278_v22  ;;  %v7054_v4 = vsel %vm407_vm0, %v2164_v18, %v2166_v2  ;;  %v7056_v14 = vld [vmem:[#allocation2 + $0x48] sm:$0xff] }
 0x30c   : > { %2025 = vst [vmem:[#allocation2 + $0x61] sm:$0xff] %v1949_v3  ;;  %v1820_v7 = vadd.f32 %v4672_v57, %v6910_v62  ;;  %2647 = vmatmul.mubr.f32.gmra.mrb[40].mxu1 %v7026_v53  ;;  %4154 = vmatmul.mubr.f32.vlgmr.msra.gmra.mrb[64].mxu0 %v7048_v56  ;;  %8162 = vst [vmem:[#allocation23_spill] sm:$0xff] %v7054_v4  ;;  %v2168_v62 = vrot.slane %v7056_v14, 1  ;;  %v2280_v61 = vrot.slane %v7056_v14, 2 }
 0x30d   : > { %v1599_v40 = vpop.f32.mrb[16].mxu0  ;;  %2651 = vmatprep.mubr.f32.mxu1 %v7054_v4 }
 0x30e   : > { %v1950_v54 = vmax.f32 %v1820_v7, 0.0  ;;  %v4673_v11 = vadd.f32 %v6992_v58, %v1599_v40  ;;  %v1601_v21 = vpop.f32.mrb[17].mxu0 }
 0x30f   : > { %v7060_v63 = vld [vmem:[#allocation2 + $0x50] sm:$0xff]  ;;  %v2062_v42 = vld [vmem:[#allocation2 + $0x58] sm:$0x3] }
 0x310   : > { %2026 = vst [vmem:[#allocation2 + $0x69] sm:$0xff] %v1950_v54  ;;  %v1825_v36 = vadd.f32 %v4673_v11, %v6930_v50  ;;  %2652 = vmatmul.mubr.f32.gmra.mrb[42].mxu1 %v7030_v6  ;;  %v2169_v18 = vrot.slane %v7060_v63, 1  ;;  %v2281_v9 = vrot.slane %v7060_v63, 2  ;;  %v2283_v22 = vrot.slane %v2062_v42, 2 }
 0x311   : > { %v1604_v46 = vpop.f32.mrb[18].mxu0  ;;  %v2171_v2 = vrot.slane %v2062_v42, 1 }
 0x312   : > { %v1951_v3 = vmax.f32 %v1825_v36, 0.0  ;;  %v4674_v57 = vadd.f32 %v6992_v58, %v1604_v46  ;;  %v1606_v12 = vpop.f32.mrb[19].mxu0  ;;  %v7070_v7 = vsel %vm407_vm0, %v2168_v62, %v2169_v18  ;;  %v7073_v40 = vsel %vm520_vm1, %v2280_v61, %v2281_v9 }
 0x313   : > { %8163 = vst [vmem:[#allocation24_spill] sm:$0xff] %v7070_v7  ;;  %2656 = vmatprep.mubr.f32.mxu1 %v7070_v7  ;;  %4156 = vmatprep.mubr.f32.mxu0 %v7073_v40  ;;  %v7078_v50 = vsel %vm520_vm1, %v2281_v9, %v2283_v22  ;;  %v7084_v11 = vsel %vm407_vm0, %v2169_v18, %v2171_v2  ;;  %v7086_v21 = vld [vmem:[#allocation2 + $0x60] sm:$0xff] }
 0x314   : > { %2027 = vst [vmem:[#allocation2 + $0x79] sm:$0xff] %v1951_v3  ;;  %v1830_v54 = vadd.f32 %v4674_v57, %v6927_v31  ;;  %2657 = vmatmul.mubr.f32.gmra.mrb[44].mxu1 %v7056_v14  ;;  %4157 = vmatmul.mubr.f32.gmra.mrb[66].mxu0 %v7078_v50  ;;  %8164 = vst [vmem:[#allocation25_spill] sm:$0xff] %v7084_v11  ;;  %v2173_v31 = vrot.slane %v7086_v21, 1  ;;  %v2285_v22 = vrot.slane %v7086_v21, 2 }
 0x315   : > { %v1609_v62 = vpop.f32.mrb[20].mxu0  ;;  %2661 = vmatprep.mubr.f32.mxu1 %v7084_v11 }
 0x316   : > { %v1952_v61 = vmax.f32 %v1830_v54, 0.0  ;;  %v4675_v42 = vadd.f32 %v6992_v58, %v1609_v62  ;;  %v1611_v36 = vpop.f32.mrb[21].mxu0 }
 0x317   : > { %v7090_v9 = vld [vmem:[#allocation2 + $0x68] sm:$0xff]  ;;  %v2065_v46 = vld [vmem:[#allocation2 + $0x70] sm:$0x3] }
 0x318   : > { %2028 = vst [vmem:[#allocation2 + $0x81] sm:$0xff] %v1952_v61  ;;  %v1835_v18 = vadd.f32 %v4675_v42, %v6937_v23  ;;  %2662 = vmatmul.mubr.f32.gmra.mrb[46].mxu1 %v7060_v63  ;;  %v2174_v2 = vrot.slane %v7090_v9, 1  ;;  %v2286_v3 = vrot.slane %v7090_v9, 2  ;;  %v2288_v57 = vrot.slane %v2065_v46, 2 }
 0x319   : > { %v1614_v12 = vpop.f32.mrb[22].mxu0  ;;  %v2176_v54 = vrot.slane %v2065_v46, 1 }
 0x31a   : > { %v1953_v62 = vmax.f32 %v1835_v18, 0.0  ;;  %v4676_v36 = vadd.f32 %v6992_v58, %v1614_v12  ;;  %v1616_v15 = vpop.f32.mrb[23].mxu0  ;;  %v7100_v45 = vsel %vm407_vm0, %v2173_v31, %v2174_v2  ;;  %v7103_v61 = vsel %vm520_vm1, %v2285_v22, %v2286_v3 }
 0x31b   : > { %8165 = vst [vmem:[#allocation26_spill] sm:$0xff] %v7100_v45  ;;  %2666 = vmatprep.mubr.f32.mxu1 %v7100_v45  ;;  %4159 = vmatprep.mubr.f32.mxu0 %v7103_v61  ;;  %v7108_v23 = vsel %vm520_vm1, %v2286_v3, %v2288_v57  ;;  %v7114_v15 = vsel %vm407_vm0, %v2174_v2, %v2176_v54  ;;  %v7116_v31 = vld [vmem:[#allocation2 + $0x78] sm:$0xff] }
 0x31c   : > { %2029 = vst [vmem:[#allocation2 + $0x91] sm:$0xff] %v1953_v62  ;;  %v1840_v42 = vadd.f32 %v4676_v36, %v6935_v59  ;;  %2667 = vmatmul.mubr.f32.gmra.mrb[48].mxu1 %v7086_v21  ;;  %4160 = vmatmul.mubr.f32.gmra.mrb[68].mxu0 %v7108_v23  ;;  %8166 = vst [vmem:[#allocation27_spill] sm:$0xff] %v7114_v15  ;;  %v2178_v59 = vrot.slane %v7116_v31, 1  ;;  %v2290_v12 = vrot.slane %v7116_v31, 2 }
 0x31d   : > { %v1619_v22 = vpop.f32.mrb[24].mxu0  ;;  %2671 = vmatprep.mubr.f32.mxu1 %v7114_v15 }
 0x31e   : > { %v1954_v46 = vmax.f32 %v1840_v42, 0.0  ;;  %v4677_v18 = vadd.f32 %v6992_v58, %v1619_v22  ;;  %v1621_v3 = vpop.f32.mrb[25].mxu0 }
 0x31f   : > { %v7120_v57 = vld [vmem:[#allocation2 + $0x80] sm:$0xff]  ;;  %v2068_v62 = vld [vmem:[#allocation2 + $0x88] sm:$0x3] }
 0x320   : > { %2030 = vst [vmem:[#allocation2 + $0x99] sm:$0xff] %v1954_v46  ;;  %v1845_v2 = vadd.f32 %v4677_v18, %v6942_v35  ;;  %2672 = vmatmul.mubr.f32.gmra.mrb[50].mxu1 %v7090_v9  ;;  %v2179_v54 = vrot.slane %v7120_v57, 1  ;;  %v2291_v36 = vrot.slane %v7120_v57, 2  ;;  %v2293_v42 = vrot.slane %v2068_v62, 2 }
 0x321   : > { %v1624_v26 = vpop.f32.mrb[26].mxu0  ;;  %v2181_v22 = vrot.slane %v2068_v62, 1 }
 0x322   : > { %v1955_v3 = vmax.f32 %v1845_v2, 0.0  ;;  %v4678_v29 = vadd.f32 %v6992_v58, %v1624_v26  ;;  %v1626_v20 = vpop.f32.mrb[27].mxu0  ;;  %v7130_v48 = vsel %vm407_vm0, %v2178_v59, %v2179_v54  ;;  %v7133_v46 = vsel %vm520_vm1, %v2290_v12, %v2291_v36 }
 0x323   : > { %8167 = vst [vmem:[#allocation28_spill] sm:$0xff] %v7130_v48  ;;  %2676 = vmatprep.mubr.f32.mxu1 %v7130_v48  ;;  %4162 = vmatprep.mubr.f32.mxu0 %v7133_v46  ;;  %v7138_v35 = vsel %vm520_vm1, %v2291_v36, %v2293_v42  ;;  %v7144_v20 = vsel %vm407_vm0, %v2179_v54, %v2181_v22  ;;  %v7146_v26 = vld [vmem:[#allocation2 + $0x90] sm:$0xff] }
 0x324   : > { %2031 = vst [vmem:[#allocation2 + $0xa9] sm:$0xff] %v1955_v3  ;;  %v1850_v18 = vadd.f32 %v4678_v29, %v6940_v55  ;;  %2677 = vmatmul.mubr.f32.gmra.mrb[52].mxu1 %v7116_v31  ;;  %4163 = vmatmul.mubr.f32.gmra.mrb[70].mxu0 %v7138_v35  ;;  %8168 = vst [vmem:[#allocation29_spill] sm:$0xff] %v7144_v20  ;;  %v2183_v29 = vrot.slane %v7146_v26, 1  ;;  %v2295_v55 = vrot.slane %v7146_v26, 2 }
 0x325   : > { %v1629_v59 = vpop.f32.mrb[28].mxu0  ;;  %2681 = vmatprep.mubr.f32.mxu1 %v7144_v20 }
 0x326   : > { %v1956_v12 = vmax.f32 %v1850_v18, 0.0  ;;  %v4679_v62 = vadd.f32 %v6992_v58, %v1629_v59  ;;  %v1631_v2 = vpop.f32.mrb[29].mxu0 }
 0x327   : > { %v7150_v36 = vld [vmem:[#allocation2 + $0x98] sm:$0xff]  ;;  %v2071_v42 = vld [vmem:[#allocation2 + $0xa0] sm:$0x3] }
 0x328   : > { %2032 = vst [vmem:[#allocation2 + $0xb1] sm:$0xff] %v1956_v12  ;;  %v1855_v54 = vadd.f32 %v4679_v62, %v6947_v38  ;;  %2682 = vmatmul.mubr.f32.gmra.mrb[54].mxu1 %v7120_v57  ;;  %v2184_v22 = vrot.slane %v7150_v36, 1  ;;  %v2296_v3 = vrot.slane %v7150_v36, 2  ;;  %v2298_v18 = vrot.slane %v2071_v42, 2 }
 0x329   : > { %v1634_v17 = vpop.f32.mrb[30].mxu0  ;;  %v2186_v59 = vrot.slane %v2071_v42, 1 }
 0x32a   : > { %v1957_v2 = vmax.f32 %v1855_v54, 0.0  ;;  %v4680_v49 = vadd.f32 %v6992_v58, %v1634_v17  ;;  %v1636_v20 = vpop.f32.mrb[31].mxu0  ;;  %v7160_v48 = vsel %vm407_vm0, %v2183_v29, %v2184_v22  ;;  %v7163_v12 = vsel %vm520_vm1, %v2295_v55, %v2296_v3 }
 0x32b   : > { %8169 = vst [vmem:[#allocation30_spill] sm:$0xff] %v7160_v48  ;;  %2686 = vmatprep.mubr.f32.mxu1 %v7160_v48  ;;  %4165 = vmatprep.mubr.f32.mxu0 %v7163_v12  ;;  %v7168_v38 = vsel %vm520_vm1, %v2296_v3, %v2298_v18  ;;  %v7174_v17 = vsel %vm407_vm0, %v2184_v22, %v2186_v59  ;;  %v7176_v20 = vld [vmem:[#allocation2 + $0xa8] sm:$0xff] }
 0x32c   : > { %2033 = vst [vmem:[#allocation2 + $0xc1] sm:$0xff] %v1957_v2  ;;  %v1860_v62 = vadd.f32 %v4680_v49, %v6945_v27  ;;  %2687 = vmatmul.mubr.f32.gmra.mrb[56].mxu1 %v7146_v26  ;;  %4166 = vmatmul.mubr.f32.gmra.mrb[72].mxu0 %v7168_v38  ;;  %8170 = vst [vmem:[#allocation31_spill] sm:$0xff] %v7174_v17  ;;  %v2188_v49 = vrot.slane %v7176_v20, 1  ;;  %v2300_v27 = vrot.slane %v7176_v20, 2 }
 0x32d   : > { %v1639_v29 = vpop.f32.mrb[32].mxu0  ;;  %2691 = vmatprep.mubr.f32.mxu1 %v7174_v17 }
 0x32e   : > { %v1958_v55 = vmax.f32 %v1860_v62, 0.0  ;;  %v4681_v42 = vadd.f32 %v6992_v58, %v1639_v29  ;;  %v1641_v54 = vpop.f32.mrb[33].mxu0 }
 0x32f   : > { %v7180_v3 = vld [vmem:[#allocation2 + $0xb0] sm:$0xff]  ;;  %v2074_v18 = vld [vmem:[#allocation2 + $0xb8] sm:$0x3] }
 0x330   : > { %2034 = vst [vmem:[#allocation2 + $0xc9] sm:$0xff] %v1958_v55  ;;  %v1865_v22 = vadd.f32 %v4681_v42, %v6952_v13  ;;  %2692 = vmatmul.mubr.f32.gmra.mrb[58].mxu1 %v7150_v36  ;;  %v2189_v59 = vrot.slane %v7180_v3, 1  ;;  %v2301_v2 = vrot.slane %v7180_v3, 2  ;;  %v2303_v62 = vrot.slane %v2074_v18, 2 }
 0x331   : > { %v1644_v17 = vpop.f32.mrb[34].mxu0  ;;  %v2191_v29 = vrot.slane %v2074_v18, 1 }
 0x332   : > { %v1959_v54 = vmax.f32 %v1865_v22, 0.0  ;;  %v4682_v48 = vadd.f32 %v6992_v58, %v1644_v17  ;;  %v1646_v15 = vpop.f32.mrb[35].mxu0  ;;  %v7190_v45 = vsel %vm407_vm0, %v2188_v49, %v2189_v59  ;;  %v7193_v55 = vsel %vm520_vm1, %v2300_v27, %v2301_v2 }
 0x333   : > { %8171 = vst [vmem:[#allocation32_spill] sm:$0xff] %v7190_v45  ;;  %2696 = vmatprep.mubr.f32.mxu1 %v7190_v45  ;;  %4168 = vmatprep.mubr.f32.mxu0 %v7193_v55  ;;  %v7198_v13 = vsel %vm520_vm1, %v2301_v2, %v2303_v62  ;;  %v7204_v15 = vsel %vm407_vm0, %v2189_v59, %v2191_v29  ;;  %v7206_v17 = vld [vmem:[#allocation2 + $0xc0] sm:$0xff] }
 0x334   : > { %2035 = vst [vmem:[#allocation2 + $0xd9] sm:$0xff] %v1959_v54  ;;  %v1870_v42 = vadd.f32 %v4682_v48, %v6950_v34  ;;  %2697 = vmatmul.mubr.f32.gmra.mrb[60].mxu1 %v7176_v20  ;;  %4169 = vmatmul.mubr.f32.gmra.mrb[74].mxu0 %v7198_v13  ;;  %8172 = vst [vmem:[#allocation33_spill] sm:$0xff] %v7204_v15  ;;  %v2193_v48 = vrot.slane %v7206_v17, 1  ;;  %v2305_v34 = vrot.slane %v7206_v17, 2 }
 0x335   : > { %v1649_v49 = vpop.f32.mrb[36].mxu0  ;;  %2701 = vmatprep.mubr.f32.mxu1 %v7204_v15 }
 0x336   : > { %v1960_v27 = vmax.f32 %v1870_v42, 0.0  ;;  %v4683_v18 = vadd.f32 %v6992_v58, %v1649_v49  ;;  %v1651_v22 = vpop.f32.mrb[37].mxu0 }
 0x337   : > { %v7210_v2 = vld [vmem:[#allocation2 + $0xc8] sm:$0xff]  ;;  %v2077_v62 = vld [vmem:[#allocation2 + $0xd0] sm:$0x3] }
 0x338   : > { %2036 = vst [vmem:[#allocation2 + $0xe1] sm:$0xff] %v1960_v27  ;;  %v1875_v59 = vadd.f32 %v4683_v18, %v6957_v24  ;;  %2702 = vmatmul.mubr.f32.gmra.mrb[62].mxu1 %v7180_v3  ;;  %v2194_v29 = vrot.slane %v7210_v2, 1  ;;  %v2306_v54 = vrot.slane %v7210_v2, 2  ;;  %v2308_v42 = vrot.slane %v2077_v62, 2 }
 0x339   : > { %v1654_v15 = vpop.f32.mrb[38].mxu0  ;;  %v2196_v49 = vrot.slane %v2077_v62, 1 }
 0x33a   : > { %v1961_v22 = vmax.f32 %v1875_v59, 0.0  ;;  %v4684_v45 = vadd.f32 %v6992_v58, %v1654_v15  ;;  %v1656_v11 = vpop.f32.mrb[39].mxu0  ;;  %v7220_v7 = vsel %vm407_vm0, %v2193_v48, %v2194_v29  ;;  %v7223_v27 = vsel %vm520_vm1, %v2305_v34, %v2306_v54 }
 0x33b   : > { %8173 = vst [vmem:[#allocation34_spill] sm:$0xff] %v7220_v7  ;;  %2706 = vmatprep.mubr.f32.mxu1 %v7220_v7  ;;  %4171 = vmatprep.mubr.f32.mxu0 %v7223_v27  ;;  %v7228_v24 = vsel %vm520_vm1, %v2306_v54, %v2308_v42  ;;  %v7234_v11 = vsel %vm407_vm0, %v2194_v29, %v2196_v49  ;;  %v7236_v15 = vld [vmem:[#allocation2 + $0xd8] sm:$0xff] }
 0x33c   : > { %2037 = vst [vmem:[#allocation2 + $0xf1] sm:$0xff] %v1961_v22  ;;  %v1880_v18 = vadd.f32 %v4684_v45, %v6955_v60  ;;  %2707 = vmatmul.mubr.f32.gmra.mrb[64].mxu1 %v7206_v17  ;;  %4172 = vmatmul.mubr.f32.gmra.mrb[76].mxu0 %v7228_v24  ;;  %8174 = vst [vmem:[#allocation35_spill] sm:$0xff] %v7234_v11  ;;  %v2198_v45 = vrot.slane %v7236_v15, 1  ;;  %v2310_v60 = vrot.slane %v7236_v15, 2 }
 0x33d   : > { %v1659_v48 = vpop.f32.mrb[40].mxu0  ;;  %2711 = vmatprep.mubr.f32.mxu1 %v7234_v11 }
 0x33e   : > { %v1962_v34 = vmax.f32 %v1880_v18, 0.0  ;;  %v4685_v62 = vadd.f32 %v6992_v58, %v1659_v48  ;;  %v1661_v59 = vpop.f32.mrb[41].mxu0 }
 0x33f   : > { %v7240_v54 = vld [vmem:[#allocation2 + $0xe0] sm:$0xff]  ;;  %v2080_v42 = vld [vmem:[#allocation2 + $0xe8] sm:$0x3] }
 0x340   : > { %2038 = vst [vmem:[#allocation2 + $0xf9] sm:$0xff] %v1962_v34  ;;  %v1885_v29 = vadd.f32 %v4685_v62, %v6962_v19  ;;  %2712 = vmatmul.mubr.f32.gmra.mrb[66].mxu1 %v7210_v2  ;;  %v2199_v49 = vrot.slane %v7240_v54, 1  ;;  %v2311_v22 = vrot.slane %v7240_v54, 2  ;;  %v2313_v18 = vrot.slane %v2080_v42, 2 }
 0x341   : > { %v1664_v11 = vpop.f32.mrb[42].mxu0  ;;  %v2201_v48 = vrot.slane %v2080_v42, 1 }
 0x342   : > { %v1963_v59 = vmax.f32 %v1885_v29, 0.0  ;;  %v4686_v7 = vadd.f32 %v6992_v58, %v1664_v11  ;;  %v1666_v4 = vpop.f32.mrb[43].mxu0  ;;  %v7250_v25 = vsel %vm407_vm0, %v2198_v45, %v2199_v49  ;;  %v7253_v34 = vsel %vm520_vm1, %v2310_v60, %v2311_v22 }
 0x343   : > { %8175 = vst [vmem:[#allocation36_spill] sm:$0xff] %v7250_v25  ;;  %2716 = vmatprep.mubr.f32.mxu1 %v7250_v25  ;;  %4174 = vmatprep.mubr.f32.mxu0 %v7253_v34  ;;  %v7258_v19 = vsel %vm520_vm1, %v2311_v22, %v2313_v18  ;;  %v7264_v4 = vsel %vm407_vm0, %v2199_v49, %v2201_v48  ;;  %v7266_v11 = vld [vmem:[#allocation2 + $0xf0] sm:$0xff] }
 0x344   : > { %2039 = vst [vmem:[#allocation2 + $0x109] sm:$0xff] %v1963_v59  ;;  %v1890_v62 = vadd.f32 %v4686_v7, %v6960_v8  ;;  %2717 = vmatmul.mubr.f32.gmra.mrb[68].mxu1 %v7236_v15  ;;  %4175 = vmatmul.mubr.f32.gmra.mrb[78].mxu0 %v7258_v19  ;;  %8176 = vst [vmem:[#allocation37_spill] sm:$0xff] %v7264_v4  ;;  %v2203_v8 = vrot.slane %v7266_v11, 1  ;;  %v2315_v7 = vrot.slane %v7266_v11, 2 }
 0x345   : > { %v1669_v45 = vpop.f32.mrb[44].mxu0  ;;  %2721 = vmatprep.mubr.f32.mxu1 %v7264_v4 }
 0x346   : > { %v1964_v60 = vmax.f32 %v1890_v62, 0.0  ;;  %v4687_v42 = vadd.f32 %v6992_v58, %v1669_v45  ;;  %v1671_v29 = vpop.f32.mrb[45].mxu0 }
 0x347   : > { %v7270_v22 = vld [vmem:[#allocation2 + $0xf8] sm:$0xff]  ;;  %v2083_v18 = vld [vmem:[#allocation2 + $0x100] sm:$0x3] }
 0x348   : > { %2040 = vst [vmem:[#allocation2 + $0x111] sm:$0xff] %v1964_v60  ;;  %v1895_v49 = vadd.f32 %v4687_v42, %v6967_v33  ;;  %2722 = vmatmul.mubr.f32.gmra.mrb[70].mxu1 %v7240_v54  ;;  %v2204_v48 = vrot.slane %v7270_v22, 1  ;;  %v2316_v59 = vrot.slane %v7270_v22, 2  ;;  %v2318_v62 = vrot.slane %v2083_v18, 2 }
 0x349   : > { %v1674_v4 = vpop.f32.mrb[46].mxu0  ;;  %v2206_v45 = vrot.slane %v2083_v18, 1 }
 0x34a   : > { %v1965_v29 = vmax.f32 %v1895_v49, 0.0  ;;  %v4688_v25 = vadd.f32 %v6992_v58, %v1674_v4  ;;  %v1676_v16 = vpop.f32.mrb[47].mxu0  ;;  %v7280_v37 = vsel %vm407_vm0, %v2203_v8, %v2204_v48  ;;  %v7283_v60 = vsel %vm520_vm1, %v2315_v7, %v2316_v59 }
 0x34b   : > { %8177 = vst [vmem:[#allocation38_spill] sm:$0xff] %v7280_v37  ;;  %8178 = vst [vmem:[#allocation39_spill] sm:$0xff] %v7283_v60  ;;  %2726 = vmatprep.mubr.f32.mxu1 %v7280_v37  ;;  %4177 = vmatprep.mubr.f32.mxu0 %v7283_v60  ;;  %v7288_v33 = vsel %vm520_vm1, %v2316_v59, %v2318_v62  ;;  %v7294_v16 = vsel %vm407_vm0, %v2204_v48, %v2206_v45  ;;  %v7296_v4 = vld [vmem:[#allocation2 + $0x108] sm:$0xff] }
 0x34c   : > { %8179 = vst [vmem:[#allocation40_spill] sm:$0xff] %v7288_v33  ;;  %2041 = vst [vmem:[#allocation2 + $0x121] sm:$0xff] %v1965_v29  ;;  %v1900_v42 = vadd.f32 %v4688_v25, %v6965_v52  ;;  %2727 = vmatmul.mubr.f32.gmra.mrb[72].mxu1 %v7266_v11  ;;  %4178 = vmatmul.mubr.f32.gmra.mrb[80].mxu0 %v7288_v33  ;;  %v2208_v52 = vrot.slane %v7296_v4, 1  ;;  %v2320_v25 = vrot.slane %v7296_v4, 2 }
 0x34d   : > { %8180 = vst [vmem:[#allocation41_spill] sm:$0xff] %v7294_v16  ;;  %v1679_v8 = vpop.f32.mrb[48].mxu0  ;;  %2731 = vmatprep.mubr.f32.mxu1 %v7294_v16 }
 0x34e   : > { %v1966_v7 = vmax.f32 %v1900_v42, 0.0  ;;  %v4689_v18 = vadd.f32 %v6992_v58, %v1679_v8  ;;  %v1681_v49 = vpop.f32.mrb[49].mxu0 }
 0x34f   : > { %v7300_v59 = vld [vmem:[#allocation2 + $0x110] sm:$0xff]  ;;  %v2086_v62 = vld [vmem:[#allocation2 + $0x118] sm:$0x3] }
 0x350   : > { %2042 = vst [vmem:[#allocation2 + $0x129] sm:$0xff] %v1966_v7  ;;  %v1905_v48 = vadd.f32 %v4689_v18, %v6972_v47  ;;  %2732 = vmatmul.mubr.f32.gmra.mrb[74].mxu1 %v7270_v22  ;;  %v2209_v45 = vrot.slane %v7300_v59, 1  ;;  %v2321_v29 = vrot.slane %v7300_v59, 2  ;;  %v2323_v42 = vrot.slane %v2086_v62, 2 }
 0x351   : > { %v1684_v16 = vpop.f32.mrb[50].mxu0  ;;  %v2211_v8 = vrot.slane %v2086_v62, 1 }
 0x352   : > { %v1967_v49 = vmax.f32 %v1905_v48, 0.0  ;;  %v4690_v37 = vadd.f32 %v6992_v58, %v1684_v16  ;;  %v1686_v33 = vpop.f32.mrb[51].mxu0  ;;  %v7310_v60 = vsel %vm407_vm0, %v2208_v52, %v2209_v45  ;;  %v7313_v7 = vsel %vm520_vm1, %v2320_v25, %v2321_v29 }
 0x353   : > { %8181 = vst [vmem:[#allocation42_spill] sm:$0xff] %v7310_v60  ;;  %8182 = vst [vmem:[#allocation43_spill] sm:$0xff] %v7313_v7  ;;  %2736 = vmatprep.mubr.f32.mxu1 %v7310_v60  ;;  %4180 = vmatprep.mubr.f32.mxu0 %v7313_v7  ;;  %v7318_v47 = vsel %vm520_vm1, %v2321_v29, %v2323_v42  ;;  %v7324_v33 = vsel %vm407_vm0, %v2209_v45, %v2211_v8  ;;  %v7326_v16 = vld [vmem:[#allocation2 + $0x120] sm:$0xff] }
 0x354   : > { %8183 = vst [vmem:[#allocation44_spill] sm:$0xff] %v7318_v47  ;;  %2043 = vst [vmem:[#allocation2 + $0x139] sm:$0xff] %v1967_v49  ;;  %v1910_v18 = vadd.f32 %v4690_v37, %v6970_v43  ;;  %2737 = vmatmul.mubr.f32.gmra.mrb[76].mxu1 %v7296_v4  ;;  %4181 = vmatmul.mubr.f32.gmra.mrb[82].mxu0 %v7318_v47  ;;  %v2213_v43 = vrot.slane %v7326_v16, 1  ;;  %v2325_v37 = vrot.slane %v7326_v16, 2 }
 0x355   : > { %8184 = vst [vmem:[#allocation45_spill] sm:$0xff] %v7324_v33  ;;  %v1689_v52 = vpop.f32.mrb[52].mxu0  ;;  %2741 = vmatprep.mubr.f32.mxu1 %v7324_v33 }
 0x356   : > { %v1968_v25 = vmax.f32 %v1910_v18, 0.0  ;;  %v4691_v62 = vadd.f32 %v6992_v58, %v1689_v52  ;;  %v1691_v48 = vpop.f32.mrb[53].mxu0 }
 0x357   : > { %v7330_v29 = vld [vmem:[#allocation2 + $0x128] sm:$0xff]  ;;  %v2089_v42 = vld [vmem:[#allocation2 + $0x130] sm:$0x3] }
 0x358   : > { %2044 = vst [vmem:[#allocation2 + $0x141] sm:$0xff] %v1968_v25  ;;  %v1915_v45 = vadd.f32 %v4691_v62, %v6977_v30  ;;  %2742 = vmatmul.mubr.f32.gmra.mrb[78].mxu1 %v7300_v59  ;;  %v2214_v8 = vrot.slane %v7330_v29, 1  ;;  %v2326_v49 = vrot.slane %v7330_v29, 2  ;;  %v2328_v18 = vrot.slane %v2089_v42, 2 }
 0x359   : > { %v1694_v33 = vpop.f32.mrb[54].mxu0  ;;  %v2216_v52 = vrot.slane %v2089_v42, 1 }
 0x35a   : > { %v1969_v48 = vmax.f32 %v1915_v45, 0.0  ;;  %v4692_v60 = vadd.f32 %v6992_v58, %v1694_v33  ;;  %v1696_v47 = vpop.f32.mrb[55].mxu0  ;;  %v7340_v7 = vsel %vm407_vm0, %v2213_v43, %v2214_v8  ;;  %v7343_v25 = vsel %vm520_vm1, %v2325_v37, %v2326_v49 }
 0x35b   : > { %8185 = vst [vmem:[#allocation46_spill] sm:$0xff] %v7340_v7  ;;  %8186 = vst [vmem:[#allocation47_spill] sm:$0xff] %v7343_v25  ;;  %2746 = vmatprep.mubr.f32.mxu1 %v7340_v7  ;;  %4183 = vmatprep.mubr.f32.mxu0 %v7343_v25  ;;  %v7348_v30 = vsel %vm520_vm1, %v2326_v49, %v2328_v18  ;;  %v7354_v47 = vsel %vm407_vm0, %v2214_v8, %v2216_v52  ;;  %v7356_v33 = vld [vmem:[#allocation2 + $0x138] sm:$0xff] }
 0x35c   : > { %8187 = vst [vmem:[#allocation48_spill] sm:$0xff] %v7348_v30  ;;  %2045 = vst [vmem:[#allocation2 + $0x151] sm:$0xff] %v1969_v48  ;;  %v1920_v62 = vadd.f32 %v4692_v60, %v6975_v10  ;;  %2747 = vmatmul.mubr.f32.gmra.mrb[80].mxu1 %v7326_v16  ;;  %4184 = vmatmul.mubr.f32.gmra.mrb[84].mxu0 %v7348_v30  ;;  %v2218_v10 = vrot.slane %v7356_v33, 1  ;;  %v2330_v60 = vrot.slane %v7356_v33, 2 }
 0x35d   : > { %8188 = vst [vmem:[#allocation49_spill] sm:$0xff] %v7354_v47  ;;  %v1699_v43 = vpop.f32.mrb[56].mxu0  ;;  %2751 = vmatprep.mubr.f32.mxu1 %v7354_v47 }
 0x35e   : > { %v1970_v37 = vmax.f32 %v1920_v62, 0.0  ;;  %v4693_v42 = vadd.f32 %v6992_v58, %v1699_v43  ;;  %v1701_v45 = vpop.f32.mrb[57].mxu0 }
 0x35f   : > { %v7360_v49 = vld [vmem:[#allocation2 + $0x140] sm:$0xff]  ;;  %v2092_v18 = vld [vmem:[#allocation2 + $0x148] sm:$0x3] }
 0x360   : > { %2046 = vst [vmem:[#allocation2 + $0x159] sm:$0xff] %v1970_v37  ;;  %v1925_v8 = vadd.f32 %v4693_v42, %v6982_v51  ;;  %2752 = vmatmul.mubr.f32.gmra.mrb[82].mxu1 %v7330_v29  ;;  %v2219_v52 = vrot.slane %v7360_v49, 1  ;;  %v2331_v48 = vrot.slane %v7360_v49, 2  ;;  %v2333_v62 = vrot.slane %v2092_v18, 2 }
 0x361   : > { %v1704_v47 = vpop.f32.mrb[58].mxu0  ;;  %v2221_v43 = vrot.slane %v2092_v18, 1 }
 0x362   : > { %v1971_v45 = vmax.f32 %v1925_v8, 0.0  ;;  %v4694_v7 = vadd.f32 %v6992_v58, %v1704_v47  ;;  %v1706_v30 = vpop.f32.mrb[59].mxu0  ;;  %v7370_v25 = vsel %vm407_vm0, %v2218_v10, %v2219_v52  ;;  %v7373_v37 = vsel %vm520_vm1, %v2330_v60, %v2331_v48 }
 0x363   : > { %8189 = vst [vmem:[#allocation50_spill] sm:$0xff] %v7370_v25  ;;  %2756 = vmatprep.mubr.f32.mxu1 %v7370_v25  ;;  %4186 = vmatprep.mubr.f32.mxu0 %v7373_v37  ;;  %v7378_v51 = vsel %vm520_vm1, %v2331_v48, %v2333_v62  ;;  %v7384_v30 = vsel %vm407_vm0, %v2219_v52, %v2221_v43  ;;  %v7387_v10 = vld [vmem:[#allocation2 + $0x150] sm:$0xff]  ;;  %v2478_v25 = vld [vmem:[#allocation6 + $0x218] sm:$0xff] }
 0x364   : > { %2047 = vst [vmem:[#allocation2 + $0x169] sm:$0xff] %v1971_v45  ;;  %v1930_v42 = vadd.f32 %v4694_v7, %v6980_v32  ;;  %2757 = vmatmul.mubr.f32.gmra.mrb[84].mxu1 %v7356_v33  ;;  %4187 = vmatmul.mubr.f32.gmra.mrb[86].mxu0 %v7378_v51  ;;  %8190 = vst [vmem:[#allocation51_spill] sm:$0xff] %v7384_v30  ;;  %v2223_v7 = vrot.slane %v7387_v10, 1 }
 0x365   : > { %v1709_v47 = vpop.f32.mrb[60].mxu0  ;;  %2761 = vmatprep.mubr.f32.mxu1 %v7384_v30 }
 0x366   : > { %v1972_v60 = vmax.f32 %v1930_v42, 0.0  ;;  %v4695_v18 = vadd.f32 %v6992_v58, %v1709_v47  ;;  %v1711_v8 = vpop.f32.mrb[61].mxu0 }
 0x367   : > { %v7390_v48 = vld [vmem:[#allocation2 + $0x158] sm:$0xff]  ;;  %v7392_v62 = vld [vmem:[#allocation2 + $0x160] sm:$0x3] }
 0x368   : > { %8191 = vst [vmem:[#allocation52_spill] sm:$0xff] %v7392_v62  ;;  %2048 = vst [vmem:[#allocation2 + $0x171] sm:$0xff] %v1972_v60  ;;  %v1935_v32 = vadd.f32 %v4695_v18, %v6987_v5  ;;  %2762 = vmatmul.mubr.f32.gmra.mrb[86].mxu1 %v7360_v49  ;;  %v2224_v52 = vrot.slane %v7390_v48, 1  ;;  %v2226_v43 = vrot.slane %v7392_v62, 1  ;;  %v2271_v62 = vrot.slane %v7008_v44, 2 }
 0x369   : > { %v1714_v45 = vpop.f32.mrb[62].mxu0 }
 0x36a   : > { %v1973_v42 = vmax.f32 %v1935_v32, 0.0  ;;  %v4696_v47 = vadd.f32 %v6992_v58, %v1714_v45  ;;  %v1716_v8 = vpop.f32.mrb[63].mxu0  ;;  %v7401_v30 = vsel %vm407_vm0, %v2223_v7, %v2224_v52  ;;  %v7407_v60 = vsel %vm407_vm0, %v2224_v52, %v2226_v43 }
 0x36b   : > { %8192 = vst [vmem:[#allocation53_spill] sm:$0xff] %v7401_v30  ;;  %2766 = vmatprep.mubr.f32.mxu1 %v7401_v30  ;;  %8193 = vst [vmem:[#allocation54_spill] sm:$0xff] %v7407_v60  ;;  %v7410_v18 = vld [vmem:[#allocation2 + $0x168] sm:$0xff]  ;;  %v2476_v30 = vld [vmem:[#allocation6 + $0x208] sm:$0xff] }
 0x36c   : > { %2049 = vst [vmem:[#allocation2 + $0x181] sm:$0xff] %v1973_v42  ;;  %v1940_v5 = vadd.f32 %v4696_v47, %v6985_v0  ;;  %2767 = vmatmul.mubr.f32.gmra.mrb[88].mxu1 %v7387_v10  ;;  %v2228_v7 = vrot.slane %v7410_v18, 1  ;;  %v5205_v47 = vld [vmem:[#allocation2] sm:$0xff] }
 0x36d   : > { %2771 = vmatprep.mubr.f32.mxu1 %v7407_v60  ;;  %v2265_v8 = vrot.slane %v5205_v47, 2  ;;  %v2475_v60 = vld [vmem:[#allocation6 + $0x200] sm:$0xff] }
 0x36e   : > { %v1974_v32 = vmax.f32 %v1940_v5, 0.0  ;;  %v7429_v5 = vld [vmem:[#allocation2 + $0x8] sm:$0xff] }
 0x36f   : > { %v7412_v58 = vld [vmem:[#allocation2 + $0x170] sm:$0xff]  ;;  %v7414_v45 = vld [vmem:[#allocation2 + $0x178] sm:$0x3]  ;;  %8198 = vst [vmem:[#allocation59_spill] sm:$0xff] %v7429_v5 }
 0x370   : > { %8194 = vst [vmem:[#allocation55_spill] sm:$0xff] %v7412_v58  ;;  %8195 = vst [vmem:[#allocation56_spill] sm:$0xff] %v7414_v45  ;;  %2772 = vmatmul.mubr.f32.gmra.mrb[90].mxu1 %v7390_v48  ;;  %v2229_v0 = vrot.slane %v7412_v58, 1  ;;  %v2231_v42 = vrot.slane %v7414_v45, 1  ;;  %v2479_v45 = vld [vmem:[#allocation6 + $0x220] sm:$0xff] }
 0x371   : > { %2050 = vst [vmem:[#allocation2 + $0x189] sm:$0xff] %v1974_v32  ;;  %v7432_v32 = vrot.slane %v7429_v5, 2 }
 0x372   : > { %v7421_v52 = vsel %vm407_vm0, %v2228_v7, %v2229_v0  ;;  %v7426_v43 = vsel %vm407_vm0, %v2229_v0, %v2231_v42  ;;  %v4522_v0 = vpack.c.bf16 %v2476_v30, %v2475_v60  ;;  %v5207_v42 = vld [vmem:[#allocation2 + $0x10] sm:$0x3]  ;;  %v2270_v30 = vrot.slane %v7005_v39, 2 }
 0x373   : > { %8196 = vst [vmem:[#allocation57_spill] sm:$0xff] %v7421_v52  ;;  %2776 = vmatprep.mubr.f32.mxu1 %v7421_v52  ;;  %8197 = vst [vmem:[#allocation58_spill] sm:$0xff] %v7426_v43  ;;  %v2267_v7 = vsel %vm520_vm1, %v2265_v8, %v7432_v32  ;;  %v2268_v52 = vrot.slane %v5207_v42, 2  ;;  %v2481_v8 = vld [vmem:[#allocation6 + $0x230] sm:$0xff]  ;;  %v2490_v42 = vld [vmem:[#allocation6 + $0x278] sm:$0xff] }
 0x374   : > { %2777 = vmatmul.mubr.f32.gmra.mrb[92].mxu1 %v7410_v18 }
 0x375   : > { %2781 = vmatprep.mubr.f32.mxu1 %v7426_v43  ;;  %v2477_v43 = vld [vmem:[#allocation6 + $0x210] sm:$0xff]  ;;  %v2269_v47 = vsel %vm520_vm1, %v7432_v32, %v2268_v52  ;;  %v7447_v52 = vsel %vm520_vm1, %v2270_v30, %v2271_v62  ;;  %v2492_v30 = vld [vmem:[#allocation6 + $0x288] sm:$0xff] }
 0x376   : > { %v4525_v5 = vpack.c.bf16 %v2478_v25, %v2477_v43  ;;  %v2273_v25 = vrot.slane %v7010_v28, 2  ;;  %v2485_v28 = vld [vmem:[#allocation6 + $0x250] sm:$0xff]  ;;  %v2486_v43 = vld [vmem:[#allocation6 + $0x258] sm:$0xff] }
 0x378   : > { %2782 = vmatmul.mubr.f32.gmra.mrb[94].mxu1 %v7412_v58  ;;  %v2480_v58 = vld [vmem:[#allocation6 + $0x228] sm:$0xff] }
 0x379   : > { %2851 = vmatprep.mubr.f32.mxu1 %v7005_v39  ;;  %v4528_v60 = vpack.c.bf16 %v2480_v58, %v2479_v45  ;;  %v2483_v39 = vld [vmem:[#allocation6 + $0x240] sm:$0xff]  ;;  %v7454_v58 = vsel %vm520_vm1, %v2271_v62, %v2273_v25  ;;  %v2496_v25 = vld [vmem:[#allocation6 + $0x2a8] sm:$0xff] }
 0x37a   : > { %v2487_v62 = vld [vmem:[#allocation6 + $0x260] sm:$0xff] }
 0x37c   : > { %2852 = vmatmul.mubr.f32.vlgmr.msra.gmra.mrb[32].mxu1 %v2267_v7  ;;  %v2482_v7 = vld [vmem:[#allocation6 + $0x238] sm:$0xff] }
 0x37d   : > { %2856 = vmatprep.mubr.f32.mxu1 %v7008_v44  ;;  %4523 = vmatpush1.bf16.msra.mxu1 %v4522_v0  ;;  %v4531_v44 = vpack.c.bf16 %v2482_v7, %v2481_v8  ;;  %v2489_v0 = vld [vmem:[#allocation6 + $0x270] sm:$0xff]  ;;  %v2494_v8 = vld [vmem:[#allocation6 + $0x298] sm:$0xff]  ;;  %v2495_v7 = vld [vmem:[#allocation6 + $0x2a0] sm:$0xff] }
 0x37e   : > { %4524 = vmatprep.subr.bf16.mxu1 %v8126_v1 }
 0x380   : > { %2857 = vmatmul.mubr.f32.gmra.mrb[34].mxu1 %v2269_v47  ;;  %v2491_v47 = vld [vmem:[#allocation6 + $0x280] sm:$0xff] }
 0x381   : > { %2861 = vmatprep.mubr.f32.mxu1 %v7026_v53  ;;  %4526 = vmatpush1.bf16.msra.mxu1 %v4525_v5  ;;  %v2484_v53 = vld [vmem:[#allocation6 + $0x248] sm:$0xff] }
 0x382   : > { %4527 = vmatprep.subr.bf16.mxu1 %v8126_v1  ;;  %v4534_v45 = vpack.c.bf16 %v2484_v53, %v2483_v39  ;;  %v2488_v5 = vld [vmem:[#allocation6 + $0x268] sm:$0xff]  ;;  %v2498_v39 = vld [vmem:[#allocation6 + $0x2b8] sm:$0xff]  ;;  %v2499_v53 = vld [vmem:[#allocation6 + $0x2c0] sm:$0xff] }
 0x384   : > { %2862 = vmatmul.mubr.f32.gmra.mrb[36].mxu1 %v7447_v52 }
 0x385   : > { %2866 = vmatprep.mubr.f32.mxu1 %v7030_v6  ;;  %4529 = vmatpush1.bf16.msra.mxu1 %v4528_v60  ;;  %v4537_v6 = vpack.c.bf16 %v2486_v43, %v2485_v28  ;;  %v2493_v60 = vld [vmem:[#allocation6 + $0x290] sm:$0xff]  ;;  %v2502_v43 = vld [vmem:[#allocation6 + $0x2d8] sm:$0xff] }
 0x386   : > { %4530 = vmatprep.subr.bf16.mxu1 %v8126_v1  ;;  %v2501_v28 = vld [vmem:[#allocation6 + $0x2d0] sm:$0xff] }
 0x388   : > { %2867 = vmatmul.mubr.f32.gmra.mrb[38].mxu1 %v7454_v58 }
 0x389   : > { %2871 = vmatprep.mubr.f32.mxu1 %v7056_v14  ;;  %4532 = vmatpush1.bf16.msra.mxu1 %v4531_v44  ;;  %v4540_v14 = vpack.c.bf16 %v2488_v5, %v2487_v62  ;;  %v2497_v44 = vld [vmem:[#allocation6 + $0x2b0] sm:$0xff]  ;;  %v2504_v62 = vld [vmem:[#allocation6 + $0x2e8] sm:$0xff] }
 0x38a   : > { %4533 = vmatprep.subr.bf16.mxu1 %v8126_v1  ;;  %v2505_v5 = vld [vmem:[#allocation6 + $0x2f0] sm:$0xff] }
 0x38c   : > { %2872 = vmatmul.mubr.f32.gmra.mrb[40].mxu1 %v7043_v41 }
 0x38d   : > { %2876 = vmatprep.mubr.f32.mxu1 %v7060_v63  ;;  %4535 = vmatpush1.bf16.msra.mxu1 %v4534_v45  ;;  %v4543_v63 = vpack.c.bf16 %v2490_v42, %v2489_v0  ;;  %v2500_v45 = vld [vmem:[#allocation6 + $0x2c8] sm:$0xff]  ;;  %v2336_v42 = vrot.slane %v7390_v48, 2 }
 0x38e   : > { %4536 = vmatprep.subr.bf16.mxu1 %v8126_v1 }
 0x390   : > { %2877 = vmatmul.mubr.f32.gmra.mrb[42].mxu1 %v7048_v56 }
 0x391   : > { %2881 = vmatprep.mubr.f32.mxu1 %v7086_v21  ;;  %4538 = vmatpush1.bf16.msra.mxu1 %v4537_v6  ;;  %v4546_v21 = vpack.c.bf16 %v2492_v30, %v2491_v47  ;;  %v2503_v6 = vld [vmem:[#allocation6 + $0x2e0] sm:$0xff]  ;;  %v2335_v47 = vrot.slane %v7387_v10, 2 }
 0x392   : > { %4539 = vmatprep.subr.bf16.mxu1 %v8126_v1 }
 0x393   : > { %v7530_v30 = vsel %vm520_vm1, %v2335_v47, %v2336_v42  ;;  %v2511_v47 = vld [vmem:[#allocation6 + $0x320] sm:$0xff] }
 0x394   : > { %2882 = vmatmul.mubr.f32.gmra.mrb[44].mxu1 %v7073_v40 }
 0x395   : > { %2886 = vmatprep.mubr.f32.mxu1 %v7090_v9  ;;  %4541 = vmatpush1.bf16.msra.mxu1 %v4540_v14  ;;  %v4549_v9 = vpack.c.bf16 %v2494_v8, %v2493_v60  ;;  %v2506_v14 = vld [vmem:[#allocation6 + $0x2f8] sm:$0xff] }
 0x396   : > { %4542 = vmatprep.subr.bf16.mxu1 %v8126_v1  ;;  %v8206_v8 = vld [vmem:[#allocation55_spill] sm:$0xff] }
 0x398   : > { %2887 = vmatmul.mubr.f32.gmra.mrb[46].mxu1 %v7078_v50 }
 0x399   : > { %2891 = vmatprep.mubr.f32.mxu1 %v7116_v31  ;;  %4544 = vmatpush1.bf16.msra.mxu1 %v4543_v63  ;;  %v4552_v31 = vpack.c.bf16 %v2496_v25, %v2495_v7  ;;  %v2341_v25 = vrot.slane %v8206_v8, 2 }
 0x39a   : > { %4545 = vmatprep.subr.bf16.mxu1 %v8126_v1 }
 0x39c   : > { %2892 = vmatmul.mubr.f32.gmra.mrb[48].mxu1 %v7103_v61 }
 0x39d   : > { %2896 = vmatprep.mubr.f32.mxu1 %v7120_v57  ;;  %4547 = vmatpush1.bf16.msra.mxu1 %v4546_v21  ;;  %v4555_v57 = vpack.c.bf16 %v2498_v39, %v2497_v44  ;;  %v8205_v21 = vld [vmem:[#allocation52_spill] sm:$0xff]  ;;  %v7544_v44 = vld [vmem:[#allocation2 + $0x180] sm:$0xff]  ;;  %v2340_v39 = vrot.slane %v7410_v18, 2 }
 0x39e   : > { %4548 = vmatprep.subr.bf16.mxu1 %v8126_v1  ;;  %v2338_v60 = vrot.slane %v8205_v21, 2  ;;  %v2512_v21 = vld [vmem:[#allocation6 + $0x328] sm:$0xff] }
 0x3a0   : > { %2897 = vmatmul.mubr.f32.gmra.mrb[50].mxu1 %v7108_v23  ;;  %v7538_v7 = vsel %vm520_vm1, %v2336_v42, %v2338_v60 }
 0x3a1   : > { %2901 = vmatprep.mubr.f32.mxu1 %v7146_v26  ;;  %4550 = vmatpush1.bf16.msra.mxu1 %v4549_v9  ;;  %v4558_v26 = vpack.c.bf16 %v2500_v45, %v2499_v53  ;;  %v8207_v53 = vld [vmem:[#allocation56_spill] sm:$0xff] }
 0x3a2   : > { %4551 = vmatprep.subr.bf16.mxu1 %v8126_v1  ;;  %v2343_v45 = vrot.slane %v8207_v53, 2  ;;  %v2513_v53 = vld [vmem:[#allocation6 + $0x330] sm:$0xff] }
 0x3a4   : > { %2902 = vmatmul.mubr.f32.gmra.mrb[52].mxu1 %v7133_v46 }
 0x3a5   : > { %2906 = vmatprep.mubr.f32.mxu1 %v7150_v36  ;;  %4553 = vmatpush1.bf16.msra.mxu1 %v4552_v31  ;;  %v4561_v36 = vpack.c.bf16 %v2502_v43, %v2501_v28  ;;  %v2507_v28 = vld [vmem:[#allocation6 + $0x300] sm:$0xff]  ;;  %v2508_v43 = vld [vmem:[#allocation6 + $0x308] sm:$0xff] }
 0x3a6   : > { %4554 = vmatprep.subr.bf16.mxu1 %v8126_v1 }
 0x3a8   : > { %2907 = vmatmul.mubr.f32.gmra.mrb[54].mxu1 %v7138_v35 }
 0x3a9   : > { %2911 = vmatprep.mubr.f32.mxu1 %v7176_v20  ;;  %4556 = vmatpush1.bf16.msra.mxu1 %v4555_v57  ;;  %v4564_v20 = vpack.c.bf16 %v2504_v62, %v2503_v6  ;;  %v7549_v57 = vsel %vm520_vm1, %v2340_v39, %v2341_v25  ;;  %v7559_v6 = vsel %vm520_vm1, %v2341_v25, %v2343_v45  ;;  %v8210_v25 = vld [vmem:[#allocation21_spill] sm:$0xff]  ;;  %v8211_v45 = vld [vmem:[#allocation22_spill] sm:$0xff] }
 0x3aa   : > { %4557 = vmatprep.subr.bf16.mxu1 %v8126_v1 }
 0x3ac   : > { %2912 = vmatmul.mubr.f32.gmra.mrb[56].mxu1 %v7163_v12 }
 0x3ad   : > { %2916 = vmatprep.mubr.f32.mxu1 %v7180_v3  ;;  %4559 = vmatpush1.bf16.msra.mxu1 %v4558_v26  ;;  %v4567_v3 = vpack.c.bf16 %v2506_v14, %v2505_v5  ;;  %v7553_v26 = vld [vmem:[#allocation2 + $0x188] sm:$0xff]  ;;  %v2509_v5 = vld [vmem:[#allocation6 + $0x310] sm:$0xff] }
 0x3ae   : > { %4560 = vmatprep.subr.bf16.mxu1 %v8126_v1  ;;  %v2510_v14 = vld [vmem:[#allocation6 + $0x318] sm:$0xff] }
 0x3af   : > { %v4573_v42 = vpack.c.bf16 %v2510_v14, %v2509_v5  ;;  %v8213_v14 = vld [vmem:[#allocation23_spill] sm:$0xff] }
 0x3b0   : > { %2917 = vmatmul.mubr.f32.gmra.mrb[58].mxu1 %v7168_v38 }
 0x3b1   : > { %2921 = vmatprep.mubr.f32.mxu1 %v7206_v17  ;;  %4562 = vmatpush1.bf16.msra.mxu1 %v4561_v36  ;;  %v8199_v17 = vld [vmem:[#allocation39_spill] sm:$0xff] }
 0x3b2   : > { %4563 = vmatprep.subr.bf16.mxu1 %v8126_v1 }
 0x3b4   : > { %2922 = vmatmul.mubr.f32.gmra.mrb[60].mxu1 %v7193_v55 }
 0x3b5   : > { %2926 = vmatprep.mubr.f32.mxu1 %v7210_v2  ;;  %4565 = vmatpush1.bf16.msra.mxu1 %v4564_v20  ;;  %v8200_v2 = vld [vmem:[#allocation40_spill] sm:$0xff]  ;;  %v4570_v20 = vpack.c.bf16 %v2508_v43, %v2507_v28 }
 0x3b6   : > { %4566 = vmatprep.subr.bf16.mxu1 %v8126_v1  ;;  %v2515_v43 = vld [vmem:[#allocation6 + $0x340] sm:$0xff] }
 0x3b8   : > { %2927 = vmatmul.mubr.f32.gmra.mrb[62].mxu1 %v7198_v13 }
 0x3b9   : > { %2931 = vmatprep.mubr.f32.mxu1 %v7236_v15  ;;  %4568 = vmatpush1.bf16.msra.mxu1 %v4567_v3  ;;  %v8201_v15 = vld [vmem:[#allocation43_spill] sm:$0xff]  ;;  %v8208_v3 = vld [vmem:[#allocation20_spill] sm:$0xff] }
 0x3ba   : > { %4569 = vmatprep.subr.bf16.mxu1 %v8126_v1 }
 0x3bc   : > { %2932 = vmatmul.mubr.f32.gmra.mrb[64].mxu1 %v7223_v27 }
 0x3bd   : > { %2936 = vmatprep.mubr.f32.mxu1 %v7240_v54  ;;  %v8202_v54 = vld [vmem:[#allocation44_spill] sm:$0xff] }
 0x3c0   : > { %2937 = vmatmul.mubr.f32.gmra.mrb[66].mxu1 %v7228_v24 }
 0x3c1   : > { %2941 = vmatprep.mubr.f32.mxu1 %v7266_v11  ;;  %v8203_v11 = vld [vmem:[#allocation47_spill] sm:$0xff] }
 0x3c4   : > { %2942 = vmatmul.mubr.f32.gmra.mrb[68].mxu1 %v7253_v34 }
 0x3c5   : > { %2946 = vmatprep.mubr.f32.mxu1 %v7270_v22 }
 0x3c8   : > { %2947 = vmatmul.mubr.f32.gmra.mrb[70].mxu1 %v7258_v19 }
 0x3c9   : > { %2951 = vmatprep.mubr.f32.mxu1 %v7296_v4  ;;  %v8204_v4 = vld [vmem:[#allocation48_spill] sm:$0xff] }
 0x3cc   : > { %2952 = vmatmul.mubr.f32.gmra.mrb[72].mxu1 %v8199_v17 }
 0x3cd   : > { %2956 = vmatprep.mubr.f32.mxu1 %v7300_v59 }
 0x3d0   : > { %2957 = vmatmul.mubr.f32.gmra.mrb[74].mxu1 %v8200_v2 }
 0x3d1   : > { %2961 = vmatprep.mubr.f32.mxu1 %v7326_v16 }
 0x3d4   : > { %2962 = vmatmul.mubr.f32.gmra.mrb[76].mxu1 %v8201_v15 }
 0x3d5   : > { %2966 = vmatprep.mubr.f32.mxu1 %v7330_v29 }
 0x3d8   : > { %2967 = vmatmul.mubr.f32.gmra.mrb[78].mxu1 %v8202_v54 }
 0x3d9   : > { %2971 = vmatprep.mubr.f32.mxu1 %v7356_v33 }
 0x3dc   : > { %2972 = vmatmul.mubr.f32.gmra.mrb[80].mxu1 %v8203_v11 }
 0x3dd   : > { %2976 = vmatprep.mubr.f32.mxu1 %v7360_v49 }
 0x3df   : > { %v7513_v22 = vpop.f32.mrb[64].mxu0 }
 0x3e0   : > { %2977 = vmatmul.mubr.f32.gmra.mrb[82].mxu1 %v8204_v4  ;;  %v7516_v59 = vpop.f32.mrb[65].mxu0 }
 0x3e1   : > { %2981 = vmatprep.mubr.f32.mxu1 %v7387_v10 }
 0x3e4   : > { %2982 = vmatmul.mubr.f32.gmra.mrb[84].mxu1 %v7373_v37 }
 0x3e5   : > { %2986 = vmatprep.mubr.f32.mxu1 %v7390_v48 }
 0x3e7   : > { %v7521_v0 = vpop.f32.mrb[66].mxu0 }
 0x3e8   : > { %2987 = vmatmul.mubr.f32.gmra.mrb[86].mxu1 %v7378_v51  ;;  %v7525_v63 = vpop.f32.mrb[67].mxu0 }
 0x3e9   : > { %2991 = vmatprep.mubr.f32.mxu1 %v7410_v18 }
 0x3ec   : > { %2992 = vmatmul.mubr.f32.gmra.mrb[88].mxu1 %v7530_v30 }
 0x3ed   : > { %2996 = vmatprep.mubr.f32.mxu1 %v8206_v8 }
 0x3ef   : > { %v7535_v9 = vpop.f32.mrb[68].mxu0 }
 0x3f0   : > { %2997 = vmatmul.mubr.f32.gmra.mrb[90].mxu1 %v7538_v7  ;;  %v7542_v31 = vpop.f32.mrb[69].mxu0 }
 0x3f1   : > { %3001 = vmatprep.mubr.f32.mxu1 %v7544_v44 }
 0x3f4   : > { %3002 = vmatmul.mubr.f32.gmra.mrb[92].mxu1 %v7549_v57 }
 0x3f5   : > { %3006 = vmatprep.mubr.f32.mxu1 %v7553_v26 }
 0x3f7   : > { %v7556_v36 = vpop.f32.mrb[70].mxu0 }
 0x3f8   : > { %3007 = vmatmul.mubr.f32.gmra.mrb[94].mxu1 %v7559_v6  ;;  %v7562_v62 = vpop.f32.mrb[71].mxu0 }
 0x3f9   : > { %3076 = vmatprep.mubr.f32.mxu1 %v7447_v52  ;;  %v4576_v52 = vpack.c.bf16 %v2512_v21, %v2511_v47  ;;  %v8215_v47 = vld [vmem:[#allocation24_spill] sm:$0xff] }
 0x3fc   : > { %3077 = vmatmul.mubr.f32.vlgmr.msra.gmra.mrb[32].mxu1 %v8208_v3 }
 0x3fd   : > { %3081 = vmatprep.mubr.f32.mxu1 %v7454_v58  ;;  %4571 = vmatpush1.bf16.msra.mxu1 %v4570_v20  ;;  %v2514_v58 = vld [vmem:[#allocation6 + $0x338] sm:$0xff]  ;;  %v2516_v20 = vld [vmem:[#allocation6 + $0x348] sm:$0xff] }
 0x3fe   : > { %4572 = vmatprep.subr.bf16.mxu1 %v8126_v1  ;;  %v4579_v28 = vpack.c.bf16 %v2514_v58, %v2513_v53  ;;  %v4582_v3 = vpack.c.bf16 %v2516_v20, %v2515_v43  ;;  %v8217_v58 = vld [vmem:[#allocation25_spill] sm:$0xff]  ;;  %v2521_v43 = vld [vmem:[#allocation6 + $0x370] sm:$0xff] }
 0x3ff   : > { %v7568_v60 = vpop.f32.mrb[72].mxu0  ;;  %v8219_v20 = vld [vmem:[#allocation26_spill] sm:$0xff] }
 0x400   : > { %8209 = vst [vmem:[#allocation39_spill] sm:$0xff] %v7568_v60  ;;  %3082 = vmatmul.mubr.f32.gmra.mrb[34].mxu1 %v8210_v25  ;;  %v7571_v39 = vpop.f32.mrb[73].mxu0  ;;  %v2519_v25 = vld [vmem:[#allocation6 + $0x360] sm:$0xff] }
 0x401   : > { %3086 = vmatprep.mubr.f32.mxu1 %v7043_v41  ;;  %4574 = vmatpush1.bf16.msra.mxu1 %v4573_v42  ;;  %v2517_v42 = vld [vmem:[#allocation6 + $0x350] sm:$0xff] }
 0x402   : > { %4575 = vmatprep.subr.bf16.mxu1 %v8126_v1 }
 0x404   : > { %3087 = vmatmul.mubr.f32.gmra.mrb[36].mxu1 %v8211_v45 }
 0x405   : > { %3091 = vmatprep.mubr.f32.mxu1 %v7048_v56  ;;  %4577 = vmatpush1.bf16.msra.mxu1 %v4576_v52  ;;  %v2518_v56 = vld [vmem:[#allocation6 + $0x358] sm:$0xff]  ;;  %v2520_v52 = vld [vmem:[#allocation6 + $0x368] sm:$0xff] }
 0x406   : > { %4578 = vmatprep.subr.bf16.mxu1 %v8126_v1  ;;  %v4585_v21 = vpack.c.bf16 %v2518_v56, %v2517_v42  ;;  %v2523_v42 = vld [vmem:[#allocation6 + $0x380] sm:$0xff]  ;;  %v2524_v56 = vld [vmem:[#allocation6 + $0x388] sm:$0xff] }
 0x407   : > { %v7578_v5 = vpop.f32.mrb[74].mxu0 }
 0x408   : > { %8212 = vst [vmem:[#allocation40_spill] sm:$0xff] %v7578_v5  ;;  %3092 = vmatmul.mubr.f32.gmra.mrb[38].mxu1 %v8213_v14  ;;  %v7581_v41 = vpop.f32.mrb[75].mxu0 }
 0x409   : > { %8214 = vst [vmem:[#allocation43_spill] sm:$0xff] %v7581_v41  ;;  %3096 = vmatprep.mubr.f32.mxu1 %v7073_v40  ;;  %4580 = vmatpush1.bf16.msra.mxu1 %v4579_v28  ;;  %v4588_v28 = vpack.c.bf16 %v2520_v52, %v2519_v25  ;;  %v2525_v25 = vld [vmem:[#allocation6 + $0x390] sm:$0xff]  ;;  %v8223_v52 = vld [vmem:[#allocation28_spill] sm:$0xff] }
 0x40a   : > { %4581 = vmatprep.subr.bf16.mxu1 %v8126_v1 }
 0x40c   : > { %3097 = vmatmul.mubr.f32.gmra.mrb[40].mxu1 %v8215_v47 }
 0x40d   : > { %3101 = vmatprep.mubr.f32.mxu1 %v7078_v50  ;;  %4583 = vmatpush1.bf16.msra.mxu1 %v4582_v3  ;;  %v2522_v50 = vld [vmem:[#allocation6 + $0x378] sm:$0xff] }
 0x40e   : > { %4584 = vmatprep.subr.bf16.mxu1 %v8126_v1  ;;  %v4591_v3 = vpack.c.bf16 %v2522_v50, %v2521_v43  ;;  %v2527_v43 = vld [vmem:[#allocation6 + $0x3a0] sm:$0xff]  ;;  %v2528_v50 = vld [vmem:[#allocation6 + $0x3a8] sm:$0xff] }
 0x40f   : > { %v7588_v53 = vpop.f32.mrb[76].mxu0 }
 0x410   : > { %8216 = vst [vmem:[#allocation44_spill] sm:$0xff] %v7588_v53  ;;  %3102 = vmatmul.mubr.f32.gmra.mrb[42].mxu1 %v8217_v58  ;;  %v7591_v40 = vpop.f32.mrb[77].mxu0 }
 0x411   : > { %8218 = vst [vmem:[#allocation47_spill] sm:$0xff] %v7591_v40  ;;  %3106 = vmatprep.mubr.f32.mxu1 %v7103_v61  ;;  %4586 = vmatpush1.bf16.msra.mxu1 %v4585_v21  ;;  %v8221_v40 = vld [vmem:[#allocation27_spill] sm:$0xff]  ;;  %v4594_v21 = vpack.c.bf16 %v2524_v56, %v2523_v42  ;;  %v2529_v42 = vld [vmem:[#allocation6 + $0x3b0] sm:$0xff] }
 0x412   : > { %4587 = vmatprep.subr.bf16.mxu1 %v8126_v1  ;;  %v8227_v56 = vld [vmem:[#allocation30_spill] sm:$0xff] }
 0x414   : > { %3107 = vmatmul.mubr.f32.gmra.mrb[44].mxu1 %v8219_v20 }
 0x415   : > { %3111 = vmatprep.mubr.f32.mxu1 %v7108_v23  ;;  %4589 = vmatpush1.bf16.msra.mxu1 %v4588_v28  ;;  %v2526_v23 = vld [vmem:[#allocation6 + $0x398] sm:$0xff] }
 0x416   : > { %4590 = vmatprep.subr.bf16.mxu1 %v8126_v1  ;;  %v4597_v28 = vpack.c.bf16 %v2526_v23, %v2525_v25  ;;  %v2531_v25 = vld [vmem:[#allocation6 + $0x3c0] sm:$0xff]  ;;  %v2532_v23 = vld [vmem:[#allocation6 + $0x3c8] sm:$0xff] }
 0x417   : > { %v7598_v53 = vpop.f32.mrb[78].mxu0 }
 0x418   : > { %8220 = vst [vmem:[#allocation48_spill] sm:$0xff] %v7598_v53  ;;  %3112 = vmatmul.mubr.f32.gmra.mrb[46].mxu1 %v8221_v40  ;;  %v7601_v61 = vpop.f32.mrb[79].mxu0 }
 0x419   : > { %8222 = vst [vmem:[#allocation52_spill] sm:$0xff] %v7601_v61  ;;  %3116 = vmatprep.mubr.f32.mxu1 %v7133_v46  ;;  %4592 = vmatpush1.bf16.msra.mxu1 %v4591_v3  ;;  %v8225_v61 = vld [vmem:[#allocation29_spill] sm:$0xff]  ;;  %v4600_v3 = vpack.c.bf16 %v2528_v50, %v2527_v43  ;;  %v2533_v43 = vld [vmem:[#allocation6 + $0x3d0] sm:$0xff]  ;;  %v8231_v50 = vld [vmem:[#allocation32_spill] sm:$0xff] }
 0x41a   : > { %4593 = vmatprep.subr.bf16.mxu1 %v8126_v1 }
 0x41c   : > { %3117 = vmatmul.mubr.f32.gmra.mrb[48].mxu1 %v8223_v52 }
 0x41d   : > { %3121 = vmatprep.mubr.f32.mxu1 %v7138_v35  ;;  %4595 = vmatpush1.bf16.msra.mxu1 %v4594_v21  ;;  %v2530_v35 = vld [vmem:[#allocation6 + $0x3b8] sm:$0xff] }
 0x41e   : > { %4596 = vmatprep.subr.bf16.mxu1 %v8126_v1  ;;  %v4603_v21 = vpack.c.bf16 %v2530_v35, %v2529_v42  ;;  %v2535_v42 = vld [vmem:[#allocation6 + $0x3e0] sm:$0xff]  ;;  %v2536_v35 = vld [vmem:[#allocation6 + $0x3e8] sm:$0xff] }
 0x41f   : > { %v7608_v53 = vpop.f32.mrb[80].mxu0 }
 0x420   : > { %8224 = vst [vmem:[#allocation55_spill] sm:$0xff] %v7608_v53  ;;  %3122 = vmatmul.mubr.f32.gmra.mrb[50].mxu1 %v8225_v61  ;;  %v7611_v46 = vpop.f32.mrb[81].mxu0 }
 0x421   : > { %8226 = vst [vmem:[#allocation56_spill] sm:$0xff] %v7611_v46  ;;  %3126 = vmatprep.mubr.f32.mxu1 %v7163_v12  ;;  %4598 = vmatpush1.bf16.msra.mxu1 %v4597_v28  ;;  %v8229_v46 = vld [vmem:[#allocation31_spill] sm:$0xff]  ;;  %v4606_v28 = vpack.c.bf16 %v2532_v23, %v2531_v25  ;;  %v2537_v25 = vld [vmem:[#allocation6 + $0x3f0] sm:$0xff] }
 0x422   : > { %4599 = vmatprep.subr.bf16.mxu1 %v8126_v1  ;;  %v8235_v23 = vld [vmem:[#allocation34_spill] sm:$0xff] }
 0x424   : > { %3127 = vmatmul.mubr.f32.gmra.mrb[52].mxu1 %v8227_v56 }
 0x425   : > { %3131 = vmatprep.mubr.f32.mxu1 %v7168_v38  ;;  %4601 = vmatpush1.bf16.msra.mxu1 %v4600_v3  ;;  %v2534_v38 = vld [vmem:[#allocation6 + $0x3d8] sm:$0xff] }
 0x426   : > { %4602 = vmatprep.subr.bf16.mxu1 %v8126_v1  ;;  %v4609_v3 = vpack.c.bf16 %v2534_v38, %v2533_v43  ;;  %v8237_v38 = vld [vmem:[#allocation35_spill] sm:$0xff] }
 0x427   : > { %v7618_v53 = vpop.f32.mrb[82].mxu0 }
 0x428   : > { %8228 = vst [vmem:[#allocation20_spill] sm:$0xff] %v7618_v53  ;;  %3132 = vmatmul.mubr.f32.gmra.mrb[54].mxu1 %v8229_v46  ;;  %v7621_v12 = vpop.f32.mrb[83].mxu0 }
 0x429   : > { %8230 = vst [vmem:[#allocation21_spill] sm:$0xff] %v7621_v12  ;;  %3136 = vmatprep.mubr.f32.mxu1 %v7193_v55  ;;  %4604 = vmatpush1.bf16.msra.mxu1 %v4603_v21  ;;  %v8233_v12 = vld [vmem:[#allocation33_spill] sm:$0xff]  ;;  %v4612_v21 = vpack.c.bf16 %v2536_v35, %v2535_v42 }
 0x42a   : > { %4605 = vmatprep.subr.bf16.mxu1 %v8126_v1  ;;  %v8243_v42 = vld [vmem:[#allocation41_spill] sm:$0xff] }
 0x42b   : > { %v8245_v35 = vld [vmem:[#allocation45_spill] sm:$0xff] }
 0x42c   : > { %3137 = vmatmul.mubr.f32.gmra.mrb[56].mxu1 %v8231_v50 }
 0x42d   : > { %3141 = vmatprep.mubr.f32.mxu1 %v7198_v13  ;;  %4607 = vmatpush1.bf16.msra.mxu1 %v4606_v28  ;;  %v2538_v13 = vld [vmem:[#allocation6 + $0x3f8] sm:$0xff] }
 0x42e   : > { %4608 = vmatprep.subr.bf16.mxu1 %v8126_v1  ;;  %v4615_v28 = vpack.c.bf16 %v2538_v13, %v2537_v25  ;;  %v2381_v25 = vrot.slane %v7553_v26, 1  ;;  %v8253_v13 = vld [vmem:[#allocation58_spill] sm:$0xff] }
 0x42f   : > { %v7628_v53 = vpop.f32.mrb[84].mxu0 }
 0x430   : > { %8232 = vst [vmem:[#allocation22_spill] sm:$0xff] %v7628_v53  ;;  %3142 = vmatmul.mubr.f32.gmra.mrb[58].mxu1 %v8233_v12  ;;  %v7631_v55 = vpop.f32.mrb[85].mxu0 }
 0x431   : > { %8234 = vst [vmem:[#allocation23_spill] sm:$0xff] %v7631_v55  ;;  %3146 = vmatprep.mubr.f32.mxu1 %v7223_v27  ;;  %4610 = vmatpush1.bf16.msra.mxu1 %v4609_v3  ;;  %v8239_v27 = vld [vmem:[#allocation12_spill] sm:$0xff] }
 0x432   : > { %4611 = vmatprep.subr.bf16.mxu1 %v8126_v1  ;;  %v8240_v3 = vld [vmem:[#allocation36_spill] sm:$0xff] }
 0x434   : > { %3147 = vmatmul.mubr.f32.gmra.mrb[60].mxu1 %v8235_v23 }
 0x435   : > { %3151 = vmatprep.mubr.f32.mxu1 %v7228_v24  ;;  %4613 = vmatpush1.bf16.msra.mxu1 %v4612_v21  ;;  %v8241_v24 = vld [vmem:[#allocation37_spill] sm:$0xff]  ;;  %v2101_v21 = vld [vmem:[#allocation2 + $0x190] sm:$0x3] }
 0x436   : > { %4614 = vmatprep.subr.bf16.mxu1 %v8126_v1  ;;  %v8242_v1 = vld [vmem:[#allocation38_spill] sm:$0xff]  ;;  %v2383_v5 = vrot.slane %v2101_v21, 1 }
 0x437   : > { %v7638_v43 = vpop.f32.mrb[86].mxu0 }
 0x438   : > { %8236 = vst [vmem:[#allocation24_spill] sm:$0xff] %v7638_v43  ;;  %3152 = vmatmul.mubr.f32.gmra.mrb[62].mxu1 %v8237_v38  ;;  %v7641_v53 = vpop.f32.mrb[87].mxu0  ;;  %v2390_v43 = vrot.slane %v2101_v21, 2  ;;  %v7689_v60 = vsel %vm407_vm0, %v2381_v25, %v2383_v5  ;;  %v5209_v21 = vld [vmem:[#allocation2 + $0x38] sm:$0xff]  ;;  %v8255_v5 = vld [vmem:[#allocation14_spill] sm:$0xff] }
 0x439   : > { %8238 = vst [vmem:[#allocation25_spill] sm:$0xff] %v7641_v53  ;;  %3156 = vmatprep.mubr.f32.mxu1 %v7253_v34  ;;  %4616 = vmatpush1.bf16.msra.mxu1 %v4615_v28  ;;  %v8244_v34 = vld [vmem:[#allocation42_spill] sm:$0xff]  ;;  %v2380_v53 = vrot.slane %v7544_v44, 1 }
 0x43a   : > { %4649 = vmatprep.subr.bf16.mxu1 %v8239_v27 }
 0x43b   : > { %v7681_v55 = vsel %vm407_vm0, %v2380_v53, %v2381_v25  ;;  %v8254_v53 = vld [vmem:[#allocation13_spill] sm:$0xff]  ;;  %v8259_v25 = vld [vmem:[#allocation18_spill] sm:$0xff] }
 0x43c   : > { %3157 = vmatmul.mubr.f32.gmra.mrb[64].mxu1 %v8240_v3 }
 0x43d   : > { %3161 = vmatprep.mubr.f32.mxu1 %v7258_v19  ;;  %v8246_v19 = vld [vmem:[#allocation46_spill] sm:$0xff] }
 0x440   : > { %3162 = vmatmul.mubr.f32.gmra.mrb[66].mxu1 %v8241_v24 }
 0x441   : > { %3166 = vmatprep.mubr.f32.mxu1 %v8199_v17  ;;  %v8247_v17 = vld [vmem:[#allocation49_spill] sm:$0xff] }
 0x444   : > { %3167 = vmatmul.mubr.f32.gmra.mrb[68].mxu1 %v8242_v1 }
 0x445   : > { %3171 = vmatprep.mubr.f32.mxu1 %v8200_v2  ;;  %v8248_v2 = vld [vmem:[#allocation50_spill] sm:$0xff] }
 0x448   : > { %3172 = vmatmul.mubr.f32.gmra.mrb[70].mxu1 %v8243_v42 }
 0x449   : > { %3176 = vmatprep.mubr.f32.mxu1 %v8201_v15  ;;  %v8249_v15 = vld [vmem:[#allocation51_spill] sm:$0xff] }
 0x44c   : > { %3177 = vmatmul.mubr.f32.gmra.mrb[72].mxu1 %v8244_v34 }
 0x44d   : > { %3181 = vmatprep.mubr.f32.mxu1 %v8202_v54  ;;  %v8250_v54 = vld [vmem:[#allocation53_spill] sm:$0xff] }
 0x450   : > { %3182 = vmatmul.mubr.f32.gmra.mrb[74].mxu1 %v8245_v35 }
 0x451   : > { %3186 = vmatprep.mubr.f32.mxu1 %v8203_v11  ;;  %v8251_v11 = vld [vmem:[#allocation54_spill] sm:$0xff] }
 0x454   : > { %3187 = vmatmul.mubr.f32.gmra.mrb[76].mxu1 %v8246_v19 }
 0x455   : > { %3191 = vmatprep.mubr.f32.mxu1 %v8204_v4  ;;  %v8252_v4 = vld [vmem:[#allocation57_spill] sm:$0xff] }
 0x458   : > { %3192 = vmatmul.mubr.f32.gmra.mrb[78].mxu1 %v8247_v17 }
 0x459   : > { %3196 = vmatprep.mubr.f32.mxu1 %v7373_v37  ;;  %v2388_v37 = vrot.slane %v7553_v26, 2 }
 0x45b   : > { %v7685_v41 = vsel %vm520_vm1, %v2388_v37, %v2390_v43  ;;  %v5210_v43 = vld [vmem:[#allocation2 + $0x48] sm:$0xff] }
 0x45c   : > { %3197 = vmatmul.mubr.f32.gmra.mrb[80].mxu1 %v8248_v2 }
 0x45d   : > { %3201 = vmatprep.mubr.f32.mxu1 %v7378_v51  ;;  %v2387_v51 = vrot.slane %v7544_v44, 2 }
 0x45f   : > { %v7676_v28 = vsel %vm520_vm1, %v2387_v51, %v2388_v37  ;;  %v5208_v51 = vld [vmem:[#allocation2 + $0x30] sm:$0xff]  ;;  %v8258_v37 = vld [vmem:[#allocation17_spill] sm:$0xff] }
 0x460   : > { %3202 = vmatmul.mubr.f32.gmra.mrb[82].mxu1 %v8249_v15 }
 0x461   : > { %3206 = vmatprep.mubr.f32.mxu1 %v7530_v30 }
 0x464   : > { %3207 = vmatmul.mubr.f32.gmra.mrb[84].mxu1 %v8250_v54 }
 0x465   : > { %3211 = vmatprep.mubr.f32.mxu1 %v7538_v7 }
 0x468   : > { %3212 = vmatmul.mubr.f32.gmra.mrb[86].mxu1 %v8251_v11 }
 0x469   : > { %3216 = vmatprep.mubr.f32.mxu1 %v7549_v57 }
 0x46c   : > { %3217 = vmatmul.mubr.f32.gmra.mrb[88].mxu1 %v8252_v4 }
 0x46d   : > { %3221 = vmatprep.mubr.f32.mxu1 %v7559_v6 }
 0x470   : > { %3222 = vmatmul.mubr.f32.gmra.mrb[90].mxu1 %v8253_v13 }
 0x471   : > { %3226 = vmatprep.mubr.f32.mxu1 %v7676_v28 }
 0x474   : > { %3227 = vmatmul.mubr.f32.gmra.mrb[92].mxu1 %v7681_v55 }
 0x475   : > { %3231 = vmatprep.mubr.f32.mxu1 %v7685_v41 }
 0x478   : > { %3232 = vmatmul.mubr.f32.gmra.mrb[94].mxu1 %v7689_v60 }
 0x479   : > { %3301 = vmatprep.mubr.f32.mxu1 %v8211_v45  ;;  %v8256_v45 = vld [vmem:[#allocation15_spill] sm:$0xff] }
 0x47c   : > { %3302 = vmatmul.mubr.f32.vlgmr.msra.gmra.mrb[32].mxu1 %v5208_v51  ;;  %v8260_v51 = vld [vmem:[#allocation19_spill] sm:$0xff] }
 0x47d   : > { %3306 = vmatprep.mubr.f32.mxu1 %v8213_v14  ;;  %4657 = vmatpush3.bf16.msra.mxu1 %v8239_v27  ;;  %v5211_v14 = vld [vmem:[#allocation2 + $0x50] sm:$0xff] }
 0x47e   : > { %4650 = vmatprep.subr.bf16.mxu1 %v8254_v53  ;;  %v8257_v27 = vld [vmem:[#allocation16_spill] sm:$0xff] }
 0x480   : > { %3307 = vmatmul.mubr.f32.gmra.mrb[34].mxu1 %v5209_v21  ;;  %v5218_v21 = vld [vmem:[#allocation2 + $0xa8] sm:$0xff] }
 0x481   : > { %3311 = vmatprep.mubr.f32.mxu1 %v8215_v47  ;;  %4658 = vmatpush3.bf16.msra.mxu1 %v8254_v53  ;;  %v5212_v47 = vld [vmem:[#allocation2 + $0x60] sm:$0xff]  ;;  %v5216_v53 = vld [vmem:[#allocation2 + $0x90] sm:$0xff] }
 0x482   : > { %4651 = vmatprep.subr.bf16.mxu1 %v8255_v5 }
 0x484   : > { %3312 = vmatmul.mubr.f32.gmra.mrb[36].mxu1 %v5210_v43 }
 0x485   : > { %3316 = vmatprep.mubr.f32.mxu1 %v8217_v58  ;;  %4659 = vmatpush3.bf16.msra.mxu1 %v8255_v5  ;;  %v5213_v58 = vld [vmem:[#allocation2 + $0x68] sm:$0xff]  ;;  %v5220_v5 = vld [vmem:[#allocation2 + $0xc0] sm:$0xff] }
 0x486   : > { %4652 = vmatprep.subr.bf16.mxu1 %v8256_v45 }
 0x488   : > { %3317 = vmatmul.mubr.f32.gmra.mrb[38].mxu1 %v5211_v14  ;;  %v3690_v14 = vld [vmem:[%s5553_s11 + $0x18] sm:$0xff] }
 0x489   : > { %3321 = vmatprep.mubr.f32.mxu1 %v8219_v20  ;;  %4660 = vmatpush3.bf16.msra.mxu1 %v8256_v45  ;;  %v5214_v20 = vld [vmem:[#allocation2 + $0x78] sm:$0xff] }
 0x48a   : > { %4653 = vmatprep.subr.bf16.mxu1 %v8257_v27 }
 0x48c   : > { %3322 = vmatmul.mubr.f32.gmra.mrb[40].mxu1 %v5212_v47 }
 0x48d   : > { %3326 = vmatprep.mubr.f32.mxu1 %v8221_v40  ;;  %4661 = vmatpush3.bf16.msra.mxu1 %v8257_v27  ;;  %v5215_v40 = vld [vmem:[#allocation2 + $0x80] sm:$0xff] }
 0x48e   : > { %4654 = vmatprep.subr.bf16.mxu1 %v8258_v37 }
 0x490   : > { %3327 = vmatmul.mubr.f32.gmra.mrb[42].mxu1 %v5213_v58 }
 0x491   : > { %3331 = vmatprep.mubr.f32.mxu1 %v8223_v52  ;;  %4662 = vmatpush3.bf16.msra.mxu1 %v8258_v37  ;;  %v5217_v52 = vld [vmem:[#allocation2 + $0x98] sm:$0xff] }
 0x492   : > { %4655 = vmatprep.subr.bf16.mxu1 %v8259_v25 }
 0x494   : > { %3332 = vmatmul.mubr.f32.gmra.mrb[44].mxu1 %v5214_v20 }
 0x495   : > { %3336 = vmatprep.mubr.f32.mxu1 %v8225_v61  ;;  %4663 = vmatpush3.bf16.msra.mxu1 %v8259_v25  ;;  %v5219_v61 = vld [vmem:[#allocation2 + $0xb0] sm:$0xff] }
 0x496   : > { %4656 = vmatprep.subr.bf16.mxu1 %v8260_v51 }
 0x498   : > { %3337 = vmatmul.mubr.f32.gmra.mrb[46].mxu1 %v5215_v40 }
 0x499   : > { %3341 = vmatprep.mubr.f32.mxu1 %v8227_v56  ;;  %4664 = vmatpush3.bf16.msra.mxu1 %v8260_v51  ;;  %v5221_v56 = vld [vmem:[#allocation2 + $0xc8] sm:$0xff] }
 0x49c   : > { %3342 = vmatmul.mubr.f32.gmra.mrb[48].mxu1 %v5216_v53 }
 0x49d   : > { %3346 = vmatprep.mubr.f32.mxu1 %v8229_v46  ;;  %v5222_v46 = vld [vmem:[#allocation2 + $0xd8] sm:$0xff] }
 0x4a0   : > { %3347 = vmatmul.mubr.f32.gmra.mrb[50].mxu1 %v5217_v52 }
 0x4a1   : > { %3351 = vmatprep.mubr.f32.mxu1 %v8231_v50  ;;  %v5223_v50 = vld [vmem:[#allocation2 + $0xe0] sm:$0xff] }
 0x4a4   : > { %3352 = vmatmul.mubr.f32.gmra.mrb[52].mxu1 %v5218_v21 }
 0x4a5   : > { %3356 = vmatprep.mubr.f32.mxu1 %v8233_v12  ;;  %v5224_v12 = vld [vmem:[#allocation2 + $0xf0] sm:$0xff] }
 0x4a8   : > { %3357 = vmatmul.mubr.f32.gmra.mrb[54].mxu1 %v5219_v61 }
 0x4a9   : > { %3361 = vmatprep.mubr.f32.mxu1 %v8235_v23  ;;  %v5225_v23 = vld [vmem:[#allocation2 + $0xf8] sm:$0xff] }
 0x4ac   : > { %3362 = vmatmul.mubr.f32.gmra.mrb[56].mxu1 %v5220_v5 }
 0x4ad   : > { %3366 = vmatprep.mubr.f32.mxu1 %v8237_v38  ;;  %v5226_v38 = vld [vmem:[#allocation2 + $0x108] sm:$0xff] }
 0x4b0   : > { %3367 = vmatmul.mubr.f32.gmra.mrb[58].mxu1 %v5221_v56 }
 0x4b1   : > { %3371 = vmatprep.mubr.f32.mxu1 %v8240_v3  ;;  %v5227_v3 = vld [vmem:[#allocation2 + $0x110] sm:$0xff] }
 0x4b4   : > { %3372 = vmatmul.mubr.f32.gmra.mrb[60].mxu1 %v5222_v46 }
 0x4b5   : > { %3376 = vmatprep.mubr.f32.mxu1 %v8241_v24  ;;  %v2104_v24 = vld [vmem:[#allocation2 + $0x1a8] sm:$0x3] }
 0x4b8   : > { %3377 = vmatmul.mubr.f32.gmra.mrb[62].mxu1 %v5223_v50 }
 0x4b9   : > { %3381 = vmatprep.mubr.f32.mxu1 %v8242_v1 }
 0x4bc   : > { %3382 = vmatmul.mubr.f32.gmra.mrb[64].mxu1 %v5224_v12 }
 0x4bd   : > { %3386 = vmatprep.mubr.f32.mxu1 %v8243_v42 }
 0x4c0   : > { %3387 = vmatmul.mubr.f32.gmra.mrb[66].mxu1 %v5225_v23 }
 0x4c1   : > { %3391 = vmatprep.mubr.f32.mxu1 %v8244_v34 }
 0x4c4   : > { %3392 = vmatmul.mubr.f32.gmra.mrb[68].mxu1 %v5226_v38 }
 0x4c5   : > { %3396 = vmatprep.mubr.f32.mxu1 %v8245_v35  ;;  %v3688_v35 = vld [vmem:[%s5553_s11 + $0x8] sm:$0xff] }
 0x4c8   : > { %3397 = vmatmul.mubr.f32.gmra.mrb[70].mxu1 %v5227_v3 }
 0x4c9   : > { %3401 = vmatprep.mubr.f32.mxu1 %v8246_v19 }
 0x4cc   : > { %3402 = vmatmul.mubr.f32.gmra.mrb[72].mxu1 %v7326_v16  ;;  %v2102_v16 = vld [vmem:[#allocation2 + $0x198] sm:$0xff] }
 0x4cd   : > { %3406 = vmatprep.mubr.f32.mxu1 %v8247_v17 }
 0x4d0   : > { %3407 = vmatmul.mubr.f32.gmra.mrb[74].mxu1 %v7330_v29  ;;  %v2397_v29 = vrot.slane %v2102_v16, 1 }
 0x4d1   : > { %3411 = vmatprep.mubr.f32.mxu1 %v8248_v2 }
 0x4d4   : > { %3412 = vmatmul.mubr.f32.gmra.mrb[76].mxu1 %v7356_v33  ;;  %v8261_v33 = vld [vmem:[#allocation59_spill] sm:$0xff] }
 0x4d5   : > { %3416 = vmatprep.mubr.f32.mxu1 %v8249_v15 }
 0x4d8   : > { %3417 = vmatmul.mubr.f32.gmra.mrb[78].mxu1 %v7360_v49  ;;  %v2398_v49 = vrot.slane %v8261_v33, 1 }
 0x4d9   : > { %3421 = vmatprep.mubr.f32.mxu1 %v8250_v54 }
 0x4dc   : > { %3422 = vmatmul.mubr.f32.gmra.mrb[80].mxu1 %v7387_v10  ;;  %v2399_v10 = vsel %vm407_vm0, %v2397_v29, %v2398_v49 }
 0x4dd   : > { %3426 = vmatprep.mubr.f32.mxu1 %v8251_v11  ;;  %v3689_v11 = vld [vmem:[%s5553_s11 + $0x10] sm:$0xff] }
 0x4e0   : > { %3427 = vmatmul.mubr.f32.gmra.mrb[82].mxu1 %v7390_v48  ;;  %v2400_v48 = vrot.slane %v2104_v24, 1 }
 0x4e1   : > { %3431 = vmatprep.mubr.f32.mxu1 %v8252_v4 }
 0x4e4   : > { %3432 = vmatmul.mubr.f32.gmra.mrb[84].mxu1 %v7410_v18  ;;  %v2401_v18 = vsel %vm407_vm0, %v2398_v49, %v2400_v48 }
 0x4e5   : > { %3436 = vmatprep.mubr.f32.mxu1 %v8253_v13 }
 0x4e8   : > { %3437 = vmatmul.mubr.f32.gmra.mrb[86].mxu1 %v8206_v8  ;;  %v2404_v8 = vrot.slane %v2102_v16, 2 }
 0x4e9   : > { %3441 = vmatprep.mubr.f32.mxu1 %v7681_v55  ;;  %v3687_v55 = vld [vmem:[%s5553_s11] sm:$0xff] }
 0x4ec   : > { %3442 = vmatmul.mubr.f32.gmra.mrb[88].mxu1 %v7544_v44  ;;  %v2407_v44 = vrot.slane %v2104_v24, 2 }
 0x4ed   : > { %3446 = vmatprep.mubr.f32.mxu1 %v7689_v60 }
 0x4f0   : > { %3447 = vmatmul.mubr.f32.gmra.mrb[90].mxu1 %v7553_v26  ;;  %v2406_v26 = vsel %vm520_vm1, %v2404_v8, %v7432_v32 }
 0x4f1   : > { %3451 = vmatprep.mubr.f32.mxu1 %v2399_v10 }
 0x4f4   : > { %3452 = vmatmul.mubr.f32.gmra.mrb[92].mxu1 %v2102_v16 }
 0x4f5   : > { %3456 = vmatprep.mubr.f32.mxu1 %v2401_v18 }
 0x4f8   : > { %3457 = vmatmul.mubr.f32.gmra.mrb[94].mxu1 %v8261_v33 }
 0x4f9   : > { %4189 = vmatprep.mubr.f32.mxu1 %v7530_v30  ;;  %v2408_v30 = vsel %vm520_vm1, %v7432_v32, %v2407_v44 }
 0x4fc   : > { %4190 = vmatmul.mubr.f32.vlgmr.msra.gmra.mrb[96].mxu1 %v7538_v7  ;;  %v7764_v7 = vld [vmem:[%s7946_s5] ss:$0 sm:$0xff] }
 0x4fd   : > { %4192 = vmatprep.mubr.f32.mxu1 %v7549_v57 }
 0x500   : > { %4193 = vmatmul.mubr.f32.gmra.mrb[98].mxu1 %v7559_v6 }
 0x501   : > { %4195 = vmatprep.mubr.f32.mxu1 %v7676_v28 }
 0x504   : > { %4196 = vmatmul.mubr.f32.gmra.mrb[100].mxu1 %v7685_v41 }
 0x505   : > { %4198 = vmatprep.mubr.f32.mxu1 %v2406_v26 }
 0x508   : > { %4199 = vmatmul.mubr.f32.gmra.mrb[102].mxu1 %v2408_v30 }
 0x54f   : > { %v3303_v57 = vpop.f32.mrb[32].mxu1 }
 0x550   : > { %v4697_v6 = vadd.f32 %v7764_v7, %v3303_v57  ;;  %v3305_v60 = vpop.f32.mrb[33].mxu1 }
 0x552   : > { %v3529_v1 = vadd.f32 %v4697_v6, %v7516_v59 }
 0x553   : > { %v3308_v41 = vpop.f32.mrb[34].mxu1 }
 0x554   : > { %v3719_v42 = vadd.f32 %v3687_v55, %v3529_v1  ;;  %v4698_v34 = vadd.f32 %v7764_v7, %v3308_v41  ;;  %v3310_v32 = vpop.f32.mrb[35].mxu1  ;;  %v8262_v41 = vld [vmem:[#allocation39_spill] sm:$0xff] }
 0x556   : > { %v3751_v19 = vmax.f32 %v3719_v42, 0.0  ;;  %v3534_v17 = vadd.f32 %v4698_v34, %v7513_v22 }
 0x557   : > { %v3313_v2 = vpop.f32.mrb[36].mxu1 }
 0x558   : > { %3783 = vst [vmem:[%s7774_s16] sm:$0xff] %v3751_v19  ;;  %v3720_v15 = vadd.f32 %v3688_v35, %v3534_v17  ;;  %v4699_v59 = vadd.f32 %v7764_v7, %v3313_v2  ;;  %v3315_v54 = vpop.f32.mrb[37].mxu1  ;;  %v8263_v2 = vld [vmem:[#allocation43_spill] sm:$0xff] }
 0x55a   : > { %v3752_v4 = vmax.f32 %v3720_v15, 0.0  ;;  %v3539_v13 = vadd.f32 %v4699_v59, %v7525_v63  ;;  %v3691_v63 = vld [vmem:[%s5553_s11 + $0x20] sm:$0xff] }
 0x55b   : > { %v3318_v28 = vpop.f32.mrb[38].mxu1 }
 0x55c   : > { %3784 = vst [vmem:[%s7774_s16 + $0x8] sm:$0xff] %v3752_v4  ;;  %v3721_v22 = vadd.f32 %v3689_v11, %v3539_v13  ;;  %v4700_v43 = vadd.f32 %v7764_v7, %v3318_v28  ;;  %v3320_v45 = vpop.f32.mrb[39].mxu1  ;;  %v3698_v13 = vld [vmem:[%s5553_s11 + $0x58] sm:$0xff] }
 0x55e   : > { %v3753_v27 = vmax.f32 %v3721_v22, 0.0  ;;  %v3544_v47 = vadd.f32 %v4700_v43, %v7521_v0  ;;  %v3692_v0 = vld [vmem:[%s5553_s11 + $0x28] sm:$0xff]  ;;  %v8264_v22 = vld [vmem:[#allocation40_spill] sm:$0xff] }
 0x55f   : > { %v3323_v37 = vpop.f32.mrb[40].mxu1 }
 0x560   : > { %3785 = vst [vmem:[%s7774_s16 + $0x10] sm:$0xff] %v3753_v27  ;;  %v3722_v58 = vadd.f32 %v3690_v14, %v3544_v47  ;;  %v4701_v25 = vadd.f32 %v7764_v7, %v3323_v37  ;;  %v3325_v20 = vpop.f32.mrb[41].mxu1  ;;  %v3699_v37 = vld [vmem:[%s5553_s11 + $0x60] sm:$0xff] }
 0x562   : > { %v3754_v51 = vmax.f32 %v3722_v58, 0.0  ;;  %v3549_v40 = vadd.f32 %v4701_v25, %v7542_v31  ;;  %v3693_v31 = vld [vmem:[%s5553_s11 + $0x30] sm:$0xff]  ;;  %v8265_v25 = vld [vmem:[#allocation47_spill] sm:$0xff] }
 0x563   : > { %v3328_v53 = vpop.f32.mrb[42].mxu1 }
 0x564   : > { %3786 = vst [vmem:[%s7774_s16 + $0x18] sm:$0xff] %v3754_v51  ;;  %v3723_v52 = vadd.f32 %v3691_v63, %v3549_v40  ;;  %v4702_v21 = vadd.f32 %v7764_v7, %v3328_v53  ;;  %v3330_v61 = vpop.f32.mrb[43].mxu1 }
 0x565   : > { %v8266_v61 = vld [vmem:[#allocation44_spill] sm:$0xff] }
 0x566   : > { %v3755_v5 = vmax.f32 %v3723_v52, 0.0  ;;  %v3554_v56 = vadd.f32 %v4702_v21, %v7535_v9  ;;  %v3694_v9 = vld [vmem:[%s5553_s11 + $0x38] sm:$0xff]  ;;  %v3700_v52 = vld [vmem:[%s5553_s11 + $0x68] sm:$0xff] }
 0x567   : > { %v3333_v46 = vpop.f32.mrb[44].mxu1 }
 0x568   : > { %3787 = vst [vmem:[%s7774_s16 + $0x20] sm:$0xff] %v3755_v5  ;;  %v3724_v50 = vadd.f32 %v3692_v0, %v3554_v56  ;;  %v4703_v12 = vadd.f32 %v7764_v7, %v3333_v46  ;;  %v3335_v23 = vpop.f32.mrb[45].mxu1 }
 0x56a   : > { %v3756_v38 = vmax.f32 %v3724_v50, 0.0  ;;  %v3559_v3 = vadd.f32 %v4703_v12, %v7562_v62  ;;  %v3695_v62 = vld [vmem:[%s5553_s11 + $0x40] sm:$0xff]  ;;  %v3701_v12 = vld [vmem:[%s5553_s11 + $0x70] sm:$0xff] }
 0x56b   : > { %v3338_v16 = vpop.f32.mrb[46].mxu1 }
 0x56c   : > { %3788 = vst [vmem:[%s7774_s16 + $0x28] sm:$0xff] %v3756_v38  ;;  %v3725_v29 = vadd.f32 %v3693_v31, %v3559_v3  ;;  %v4704_v33 = vadd.f32 %v7764_v7, %v3338_v16  ;;  %v3340_v49 = vpop.f32.mrb[47].mxu1  ;;  %v8267_v31 = vld [vmem:[#allocation52_spill] sm:$0xff] }
 0x56d   : > { %v3702_v49 = vld [vmem:[%s5553_s11 + $0x78] sm:$0xff] }
 0x56e   : > { %v3757_v24 = vmax.f32 %v3725_v29, 0.0  ;;  %v3564_v10 = vadd.f32 %v4704_v33, %v7556_v36  ;;  %v3696_v36 = vld [vmem:[%s5553_s11 + $0x48] sm:$0xff] }
 0x56f   : > { %v3343_v48 = vpop.f32.mrb[48].mxu1 }
 0x570   : > { %3789 = vst [vmem:[%s7774_s16 + $0x30] sm:$0xff] %v3757_v24  ;;  %v3726_v18 = vadd.f32 %v3694_v9, %v3564_v10  ;;  %v4705_v8 = vadd.f32 %v7764_v7, %v3343_v48  ;;  %v3345_v44 = vpop.f32.mrb[49].mxu1  ;;  %v8268_v24 = vld [vmem:[#allocation48_spill] sm:$0xff] }
 0x572   : > { %v3758_v26 = vmax.f32 %v3726_v18, 0.0  ;;  %v3569_v30 = vadd.f32 %v4705_v8, %v7571_v39  ;;  %v3697_v39 = vld [vmem:[%s5553_s11 + $0x50] sm:$0xff] }
 0x573   : > { %v3348_v57 = vpop.f32.mrb[50].mxu1 }
 0x574   : > { %3790 = vst [vmem:[%s7774_s16 + $0x38] sm:$0xff] %v3758_v26  ;;  %v3727_v6 = vadd.f32 %v3695_v62, %v3569_v30  ;;  %v4706_v60 = vadd.f32 %v7764_v7, %v3348_v57  ;;  %v3350_v55 = vpop.f32.mrb[51].mxu1  ;;  %v3703_v62 = vld [vmem:[%s5553_s11 + $0x80] sm:$0xff] }
 0x575   : > { %v8269_v30 = vld [vmem:[#allocation56_spill] sm:$0xff] }
 0x576   : > { %v3759_v1 = vmax.f32 %v3727_v6, 0.0  ;;  %v3574_v42 = vadd.f32 %v4706_v60, %v8262_v41 }
 0x577   : > { %v3353_v34 = vpop.f32.mrb[52].mxu1 }
 0x578   : > { %3791 = vst [vmem:[%s7774_s16 + $0x40] sm:$0xff] %v3759_v1  ;;  %v3728_v32 = vadd.f32 %v3696_v36, %v3574_v42  ;;  %v4707_v35 = vadd.f32 %v7764_v7, %v3353_v34  ;;  %v3355_v19 = vpop.f32.mrb[53].mxu1  ;;  %v3704_v1 = vld [vmem:[%s5553_s11 + $0x88] sm:$0xff]  ;;  %v8270_v42 = vld [vmem:[#allocation55_spill] sm:$0xff] }
 0x57a   : > { %v3760_v17 = vmax.f32 %v3728_v32, 0.0  ;;  %v3579_v15 = vadd.f32 %v4707_v35, %v8263_v2 }
 0x57b   : > { %v3358_v59 = vpop.f32.mrb[54].mxu1 }
 0x57c   : > { %3792 = vst [vmem:[%s7774_s16 + $0x48] sm:$0xff] %v3760_v17  ;;  %v3729_v54 = vadd.f32 %v3697_v39, %v3579_v15  ;;  %v4708_v11 = vadd.f32 %v7764_v7, %v3358_v59  ;;  %v3360_v4 = vpop.f32.mrb[55].mxu1  ;;  %v3705_v17 = vld [vmem:[%s5553_s11 + $0x90] sm:$0xff]  ;;  %v8271_v15 = vld [vmem:[#allocation21_spill] sm:$0xff] }
 0x57e   : > { %v3761_v28 = vmax.f32 %v3729_v54, 0.0  ;;  %v3584_v43 = vadd.f32 %v4708_v11, %v8264_v22 }
 0x57f   : > { %v3363_v45 = vpop.f32.mrb[56].mxu1 }
 0x580   : > { %3793 = vst [vmem:[%s7774_s16 + $0x50] sm:$0xff] %v3761_v28  ;;  %v3730_v14 = vadd.f32 %v3698_v13, %v3584_v43  ;;  %v4709_v27 = vadd.f32 %v7764_v7, %v3363_v45  ;;  %v3365_v47 = vpop.f32.mrb[57].mxu1  ;;  %v3706_v28 = vld [vmem:[%s5553_s11 + $0x98] sm:$0xff]  ;;  %v8272_v43 = vld [vmem:[#allocation20_spill] sm:$0xff] }
 0x582   : > { %v3762_v58 = vmax.f32 %v3730_v14, 0.0  ;;  %v3589_v20 = vadd.f32 %v4709_v27, %v8265_v25 }
 0x583   : > { %v3368_v63 = vpop.f32.mrb[58].mxu1 }
 0x584   : > { %3794 = vst [vmem:[%s7774_s16 + $0x58] sm:$0xff] %v3762_v58  ;;  %v3731_v51 = vadd.f32 %v3699_v37, %v3589_v20  ;;  %v4710_v40 = vadd.f32 %v7764_v7, %v3368_v63  ;;  %v3370_v53 = vpop.f32.mrb[59].mxu1  ;;  %v3707_v58 = vld [vmem:[%s5553_s11 + $0xa0] sm:$0xff]  ;;  %v8273_v20 = vld [vmem:[#allocation23_spill] sm:$0xff] }
 0x586   : > { %v3763_v21 = vmax.f32 %v3731_v51, 0.0  ;;  %v3594_v0 = vadd.f32 %v4710_v40, %v8266_v61 }
 0x587   : > { %v3373_v5 = vpop.f32.mrb[60].mxu1 }
 0x588   : > { %3795 = vst [vmem:[%s7774_s16 + $0x60] sm:$0xff] %v3763_v21  ;;  %v3732_v56 = vadd.f32 %v3700_v52, %v3594_v0  ;;  %v4711_v46 = vadd.f32 %v7764_v7, %v3373_v5  ;;  %v3375_v50 = vpop.f32.mrb[61].mxu1  ;;  %v3708_v21 = vld [vmem:[%s5553_s11 + $0xa8] sm:$0xff]  ;;  %v8274_v0 = vld [vmem:[#allocation22_spill] sm:$0xff] }
 0x58a   : > { %v3764_v23 = vmax.f32 %v3732_v56, 0.0  ;;  %v3599_v38 = vadd.f32 %v4711_v46, %v8267_v31 }
 0x58b   : > { %v3378_v3 = vpop.f32.mrb[62].mxu1 }
 0x58c   : > { %3796 = vst [vmem:[%s7774_s16 + $0x68] sm:$0xff] %v3764_v23  ;;  %v3733_v16 = vadd.f32 %v3701_v12, %v3599_v38  ;;  %v4712_v29 = vadd.f32 %v7764_v7, %v3378_v3  ;;  %v3380_v33 = vpop.f32.mrb[63].mxu1  ;;  %v3709_v23 = vld [vmem:[%s5553_s11 + $0xb0] sm:$0xff]  ;;  %v8275_v38 = vld [vmem:[#allocation25_spill] sm:$0xff] }
 0x58e   : > { %v3765_v9 = vmax.f32 %v3733_v16, 0.0  ;;  %v3604_v10 = vadd.f32 %v4712_v29, %v8268_v24 }
 0x58f   : > { %v3383_v48 = vpop.f32.mrb[64].mxu1 }
 0x590   : > { %3797 = vst [vmem:[%s7774_s16 + $0x70] sm:$0xff] %v3765_v9  ;;  %v3734_v18 = vadd.f32 %v3702_v49, %v3604_v10  ;;  %v4713_v8 = vadd.f32 %v7764_v7, %v3383_v48  ;;  %v3385_v44 = vpop.f32.mrb[65].mxu1  ;;  %v3710_v9 = vld [vmem:[%s5553_s11 + $0xb8] sm:$0xff]  ;;  %v8276_v10 = vld [vmem:[#allocation24_spill] sm:$0xff] }
 0x592   : > { %v3766_v26 = vmax.f32 %v3734_v18, 0.0  ;;  %v3609_v57 = vadd.f32 %v4713_v8, %v8269_v30 }
 0x593   : > { %v3388_v6 = vpop.f32.mrb[66].mxu1 }
 0x594   : > { %3798 = vst [vmem:[%s7774_s16 + $0x78] sm:$0xff] %v3766_v26  ;;  %v3735_v60 = vadd.f32 %v3703_v62, %v3609_v57  ;;  %v4714_v55 = vadd.f32 %v7764_v7, %v3388_v6  ;;  %v3390_v36 = vpop.f32.mrb[67].mxu1 }
 0x596   : > { %v3767_v41 = vmax.f32 %v3735_v60, 0.0  ;;  %v3614_v34 = vadd.f32 %v4714_v55, %v8270_v42 }
 0x597   : > { %v3393_v32 = vpop.f32.mrb[68].mxu1 }
 0x598   : > { %3799 = vst [vmem:[%s7774_s16 + $0x80] sm:$0xff] %v3767_v41  ;;  %v3736_v35 = vadd.f32 %v3704_v1, %v3614_v34  ;;  %v4715_v19 = vadd.f32 %v7764_v7, %v3393_v32  ;;  %v3395_v39 = vpop.f32.mrb[69].mxu1 }
 0x59a   : > { %v3768_v2 = vmax.f32 %v3736_v35, 0.0  ;;  %v3619_v59 = vadd.f32 %v4715_v19, %v8271_v15  ;;  %v3712_v15 = vld [vmem:[%s5553_s11 + $0xc8] sm:$0xff] }
 0x59b   : > { %v3398_v54 = vpop.f32.mrb[70].mxu1 }
 0x59c   : > { %3800 = vst [vmem:[%s7774_s16 + $0x88] sm:$0xff] %v3768_v2  ;;  %v3737_v11 = vadd.f32 %v3705_v17, %v3619_v59  ;;  %v4716_v4 = vadd.f32 %v7764_v7, %v3398_v54  ;;  %v3400_v13 = vpop.f32.mrb[71].mxu1 }
 0x59e   : > { %v3769_v22 = vmax.f32 %v3737_v11, 0.0  ;;  %v3624_v45 = vadd.f32 %v4716_v4, %v8272_v43  ;;  %v3711_v11 = vld [vmem:[%s5553_s11 + $0xc0] sm:$0xff] }
 0x59f   : > { %v3403_v14 = vpop.f32.mrb[72].mxu1 }
 0x5a0   : > { %3801 = vst [vmem:[%s7774_s16 + $0x90] sm:$0xff] %v3769_v22  ;;  %v3738_v27 = vadd.f32 %v3706_v28, %v3624_v45  ;;  %v4717_v47 = vadd.f32 %v7764_v7, %v3403_v14  ;;  %v3405_v37 = vpop.f32.mrb[73].mxu1  ;;  %v3714_v14 = vld [vmem:[%s5553_s11 + $0xd8] sm:$0xff] }
 0x5a2   : > { %v3770_v25 = vmax.f32 %v3738_v27, 0.0  ;;  %v3629_v63 = vadd.f32 %v4717_v47, %v8273_v20 }
 0x5a3   : > { %v3408_v51 = vpop.f32.mrb[74].mxu1 }
 0x5a4   : > { %3802 = vst [vmem:[%s7774_s16 + $0x98] sm:$0xff] %v3770_v25  ;;  %v3739_v40 = vadd.f32 %v3707_v58, %v3629_v63  ;;  %v4718_v53 = vadd.f32 %v7764_v7, %v3408_v51  ;;  %v3410_v52 = vpop.f32.mrb[75].mxu1  ;;  %v3713_v58 = vld [vmem:[%s5553_s11 + $0xd0] sm:$0xff] }
 0x5a6   : > { %v3771_v61 = vmax.f32 %v3739_v40, 0.0  ;;  %v3634_v5 = vadd.f32 %v4718_v53, %v8274_v0 }
 0x5a7   : > { %v3413_v56 = vpop.f32.mrb[76].mxu1 }
 0x5a8   : > { %3803 = vst [vmem:[%s7774_s16 + $0xa0] sm:$0xff] %v3771_v61  ;;  %v3740_v46 = vadd.f32 %v3708_v21, %v3634_v5  ;;  %v4719_v50 = vadd.f32 %v7764_v7, %v3413_v56  ;;  %v3415_v12 = vpop.f32.mrb[77].mxu1  ;;  %v3716_v21 = vld [vmem:[%s5553_s11 + $0xe8] sm:$0xff]  ;;  %v3715_v56 = vld [vmem:[%s5553_s11 + $0xe0] sm:$0xff] }
 0x5aa   : > { %v3772_v31 = vmax.f32 %v3740_v46, 0.0  ;;  %v3639_v3 = vadd.f32 %v4719_v50, %v8275_v38 }
 0x5ab   : > { %v3418_v16 = vpop.f32.mrb[78].mxu1 }
 0x5ac   : > { %3804 = vst [vmem:[%s7774_s16 + $0xa8] sm:$0xff] %v3772_v31  ;;  %v3741_v29 = vadd.f32 %v3709_v23, %v3639_v3  ;;  %v4720_v33 = vadd.f32 %v7764_v7, %v3418_v16  ;;  %v3420_v49 = vpop.f32.mrb[79].mxu1  ;;  %v3718_v16 = vld [vmem:[%s5553_s11 + $0xf8] sm:$0xff] }
 0x5ae   : > { %v3773_v24 = vmax.f32 %v3741_v29, 0.0  ;;  %v3644_v48 = vadd.f32 %v4720_v33, %v8276_v10 }
 0x5af   : > { %v3423_v18 = vpop.f32.mrb[80].mxu1 }
 0x5b0   : > { %3805 = vst [vmem:[%s7774_s16 + $0xb0] sm:$0xff] %v3773_v24  ;;  %v3742_v8 = vadd.f32 %v3710_v9, %v3644_v48  ;;  %v3425_v44 = vpop.f32.mrb[81].mxu1  ;;  %v4721_v17 = vadd.f32 %v7764_v7, %v3423_v18  ;;  %v3717_v9 = vld [vmem:[%s5553_s11 + $0xf0] sm:$0xff]  ;;  %s5286_s11 = scalar_lea.vmem %s7895_s18, 4096 }
 0x5b1   : > { %p5287_p6 = scmp.ne.s32.totalorder %s7895_s18, %s5286_s11  ;;  %p5294_p3 = scmp.lt.s32.totalorder %s5292_s29, %s5286_s11 }
 0x5b2   : > { %v3774_v62 = vmax.f32 %v3742_v8, 0.0 }
 0x5b3   : > { %v3428_v26 = vpop.f32.mrb[82].mxu1  ;;  %p5288_p8 = pnand %p5287_p6, %p5496_p12  ;;  %p5295_p7 = por %p5294_p3, %p5293_p13 }
 0x5b4   : > { %3806 = vst [vmem:[%s7774_s16 + $0xb8] sm:$0xff] %v3774_v62  ;;  %v3430_v30 = vpop.f32.mrb[83].mxu1  ;;  %v4722_v39 = vadd.f32 %v7764_v7, %v3428_v26 }
 0x5b5   : > { %p5289_p10 = pneg %p5288_p8 }
 0x5b7   : > { %v3433_v57 = vpop.f32.mrb[84].mxu1  ;;  %p5296_p9 = pnand %p5295_p7, %p5289_p10 }
 0x5b8   : > { %v3435_v6 = vpop.f32.mrb[85].mxu1  ;;  %v4723_v22 = vadd.f32 %v7764_v7, %v3433_v57 }
 0x5bb   : > { %v3438_v60 = vpop.f32.mrb[86].mxu1 }
 0x5bc   : > { %v3440_v55 = vpop.f32.mrb[87].mxu1  ;;  %v4724_v13 = vadd.f32 %v7764_v7, %v3438_v60 }
 0x5bf   : > { %v3443_v36 = vpop.f32.mrb[88].mxu1 }
 0x5c0   : > { %v3445_v1 = vpop.f32.mrb[89].mxu1  ;;  %v4725_v40 = vadd.f32 %v7764_v7, %v3443_v36 }
 0x5c3   : > { %v3448_v41 = vpop.f32.mrb[90].mxu1 }
 0x5c4   : > { %v3450_v42 = vpop.f32.mrb[91].mxu1  ;;  %v4726_v63 = vadd.f32 %v7764_v7, %v3448_v41 }
 0x5c7   : > { %v3453_v34 = vpop.f32.mrb[92].mxu1 }
 0x5c8   : > { %v3455_v32 = vpop.f32.mrb[93].mxu1  ;;  %v4727_v31 = vadd.f32 %v7764_v7, %v3453_v34 }
 0x5cb   : > { %v3458_v35 = vpop.f32.mrb[94].mxu1 }
 0x5cc   : > { %v3460_v19 = vpop.f32.mrb[95].mxu1  ;;  %v4728_v12 = vadd.f32 %v7764_v7, %v3458_v35 }
 0x5cf   : > { %v4191_v2 = vpop.f32.mrb[96].mxu1 }
 0x5d0   : > { %v3654_v59 = vadd.f32 %v4722_v39, %v4191_v2  ;;  %v3648_v54 = vpop.f32.mrb[97].mxu1 }
 0x5d1   : > { %v3649_v4 = vadd.f32 %v4721_v17, %v3648_v54 }
 0x5d2   : > { %v3744_v28 = vadd.f32 %v3712_v15, %v3654_v59 }
 0x5d3   : > { %v3743_v43 = vadd.f32 %v3711_v11, %v3649_v4  ;;  %v4194_v45 = vpop.f32.mrb[98].mxu1 }
 0x5d4   : > { %v3776_v27 = vmax.f32 %v3744_v28, 0.0  ;;  %v3664_v47 = vadd.f32 %v4724_v13, %v4194_v45  ;;  %v3658_v37 = vpop.f32.mrb[99].mxu1 }
 0x5d5   : > { %v3775_v25 = vmax.f32 %v3743_v43, 0.0  ;;  %v3659_v20 = vadd.f32 %v4723_v22, %v3658_v37 }
 0x5d6   : > { %3808 = vst [vmem:[%s7774_s16 + $0xc8] sm:$0xff] %v3776_v27  ;;  %v3746_v51 = vadd.f32 %v3714_v14, %v3664_v47 }
 0x5d7   : > { %3807 = vst [vmem:[%s7774_s16 + $0xc0] sm:$0xff] %v3775_v25  ;;  %v3745_v53 = vadd.f32 %v3713_v58, %v3659_v20  ;;  %v4197_v52 = vpop.f32.mrb[100].mxu1 }
 0x5d8   : > { %v3778_v61 = vmax.f32 %v3746_v51, 0.0  ;;  %v3674_v0 = vadd.f32 %v4726_v63, %v4197_v52  ;;  %v3668_v5 = vpop.f32.mrb[101].mxu1 }
 0x5d9   : > { %v3777_v46 = vmax.f32 %v3745_v53, 0.0  ;;  %v3669_v50 = vadd.f32 %v4725_v40, %v3668_v5 }
 0x5da   : > { %3810 = vst [vmem:[%s7774_s16 + $0xd8] sm:$0xff] %v3778_v61  ;;  %v3748_v23 = vadd.f32 %v3716_v21, %v3674_v0 }
 0x5db   : > { %3809 = vst [vmem:[%s7774_s16 + $0xd0] sm:$0xff] %v3777_v46  ;;  %v3747_v38 = vadd.f32 %v3715_v56, %v3669_v50  ;;  %v4200_v3 = vpop.f32.mrb[102].mxu1 }
 0x5dc   : > { %v3780_v29 = vmax.f32 %v3748_v23, 0.0  ;;  %v3684_v33 = vadd.f32 %v4728_v12, %v4200_v3  ;;  %v3678_v49 = vpop.f32.mrb[103].mxu1 }
 0x5dd   : > { %v3779_v24 = vmax.f32 %v3747_v38, 0.0  ;;  %v3679_v10 = vadd.f32 %v4727_v31, %v3678_v49 }
 0x5de   : > { %3812 = vst [vmem:[%s7774_s16 + $0xe8] sm:$0xff] %v3780_v29  ;;  %v3750_v48 = vadd.f32 %v3718_v16, %v3684_v33 }
 0x5df   : > { %3811 = vst [vmem:[%s7774_s16 + $0xe0] sm:$0xff] %v3779_v24  ;;  %v3749_v7 = vadd.f32 %v3717_v9, %v3679_v10 }
 0x5e0   : > { %v3782_v18 = vmax.f32 %v3750_v48, 0.0 }
 0x5e1   : > { %v3781_v8 = vmax.f32 %v3749_v7, 0.0 }
 0x5e2   : > { %3814 = vst [vmem:[%s7774_s16 + $0xf8] sm:$0xff] %v3782_v18 }
 0x5e3   : > { %3813 = vst [vmem:[%s7774_s16 + $0xf0] sm:$0xff] %v3781_v8 }
 0x5e4   : > { %5299 = shalt.err (!%p5296_p9)
}
 0x5e5   : > { %s5300_s10 = scalar_lea.hbm %s7893_s26, 4096  ;;  %s5304_s15 = scalar_lea.hbm %s7947_s6, 8192 }
 0x5e6   : > { %p5301_p1 = scmp.ne.s32.totalorder %s7893_s26, %s5300_s10  ;;  %p5305_p11 = scmp.lt.u32.totalorder %s7893_s26, %s7947_s6 }
 0x5e7   : > { %p5306_p2 = scmp.lt.u32.totalorder %s5304_s15, %s5300_s10  ;;  %p5308_p6 = scmp.lt.u32.totalorder %s5300_s10, %s7893_s26 }
 0x5e8   : > { %p5302_p0 = pnand %p5301_p1, %p5496_p12 }
 0x5e9   : > { %p5307_p4 = por %p5306_p2, %p5305_p11 }
 0x5ea   : > { %p5303_p5 = pneg %p5302_p0 }
 0x5eb   : > { %p5309_p8 = por %p5308_p6, %p5307_p4 }
 0x5ed   : > { %p5310_p10 = pnand %p5309_p8, %p5303_p5 }
 0x5ef   : > { %5313 = shalt.err (!%p5310_p10)
}
 0x5f0   : > { %s5365_s7 = smov 128   ;;  %s5366_s20 = smov 8  }
 0x5f1   : > { %5120 = dma.vmem_to_hbm [thread:$0]  (%p5496_p12), %s7895_s18, 4096, %s7893_s26, %s3816_s25, %s5365_s7, %s5365_s7, %s5366_s20  }
 0x5f2 PF: > { %s3844_s11 = sand.u32 1, %s5344_s21   ;;  %p8277_p13 = scmp.ne.s32.totalorder %s8093_s28, 0 }
 0x5f3   : > { %p8278_p3 = scmp.ge.s32.totalorder %s5356_s24, 2  ;;  %s3845_s19 = scalar_lea.sflag [#allocation5], %s3844_s11 }
 0x5f5   : > { %p5131_p7 = pnand %p8278_p3, %p8277_p13 }
 0x5f7   : > { %5339 = dma.done.wait (!%p5131_p7), %s3845_s19, 4096  }
 0x5f8   : > { %5341 = vsyncadd (!%p5131_p7), %s3845_s19, 4294963200  ;;  %p20_p9 = scmp.ge.s32.totalorder %s5458_s9, 4   ;;  %s8279_s21 = smov %s5348_s22 }
 0x5f9   : > { %s8280_s22 = smov %s5352_s23  ;;  %s8281_s23 = smov %s5492_s13 }
 0x5fa   : > { %s8282_s24 = smov %s5458_s9  ;;  %22 = sbr.rel (!%p20_p9) target bundleno = 6 (0x6), region = 98 }
 0x601   :  { %3850 = vsyncpa [#allocation4], 1 }
 0x602   :  { %3852 = vsyncpa [#allocation4 + $0x1], 1 }
 0x603   :  { %3853 = vsyncpa [#allocation7], 1 }
 0x604   :  { %3854 = vsyncpa [#allocation5], 1 }
 0x605   :  { %3856 = vsyncpa [#allocation5 + $0x1], 1 }

</bundles_post_ra>
